<compile_context>
chip_gen: v7x
topology: tpu7x:2x2x1
jax: 0.10.0
libtpu: 0.0.40
codegen_flags: <defaults>
</compile_context>

<pallas_src>
import functools

import jax
import jax.numpy as jnp
from jax.experimental import pallas as pl
from jax.experimental.pallas import tpu as pltpu

# ---- hyperparameters (match MinimalTransformer.__init__) --------------------
VOCAB_SIZE = 16
EMBED_SIZE = 32
NUM_HEADS = 4
HEAD_DIM = EMBED_SIZE // NUM_HEADS
DIM_FEEDFORWARD = 2048   # PyTorch default (forward_expansion is not wired up)
NUM_LAYERS = 3
MAX_POS = 100
LN_EPS = 1e-5


# ---- slab layout (lane offsets, all chunk starts 128-aligned) ----------------
def _aligned(w):
    return ((w + 127) // 128) * 128


def _build_offsets(chunks):
    offs, col = {}, 0
    for name, width in chunks:
        offs[name] = (col, width)
        col += _aligned(width)
    return offs, col


_W_CHUNKS = [('wqkv', 3 * EMBED_SIZE), ('wo', EMBED_SIZE),
             ('w1', DIM_FEEDFORWARD), ('w2', DIM_FEEDFORWARD)]
_P_CHUNKS = [('bqkv', 3 * EMBED_SIZE), ('bo', EMBED_SIZE),
             ('ln1w', EMBED_SIZE), ('ln1b', EMBED_SIZE),
             ('ln2w', EMBED_SIZE), ('ln2b', EMBED_SIZE),
             ('b1', DIM_FEEDFORWARD), ('b2', EMBED_SIZE)]

W_OFFS, W_LAYER_STRIDE = _build_offsets(_W_CHUNKS)   # bf16 weight slab, (E, *)
P_OFFS, P_LAYER_STRIDE = _build_offsets(_P_CHUNKS)   # f32 bias/LN slab, (1, *)
OUTW_OFF = NUM_LAYERS * W_LAYER_STRIDE
OUTB_OFF = NUM_LAYERS * P_LAYER_STRIDE
W_TOTAL = OUTW_OFF + _aligned(VOCAB_SIZE)
P_TOTAL = OUTB_OFF + _aligned(VOCAB_SIZE)


# ---- in-kernel helpers -------------------------------------------------------
def _layer_norm(x, w, b):
    # x: (T, E) f32, w/b: (1, E) f32; biased variance like torch.nn.LayerNorm
    mu = jnp.mean(x, axis=-1, keepdims=True)
    var = jnp.mean((x - mu) ** 2, axis=-1, keepdims=True)
    return (x - mu) * jax.lax.rsqrt(var + LN_EPS) * w + b


def _linear_kn(x, w, b):
    # x: (M, K) f32, w: (K, N) bf16 lane-dense, b: (1, N) f32; f32 accumulation.
    return jax.lax.dot_general(
        x.astype(jnp.bfloat16), w, (((1,), (0,)), ((), ())),
        preferred_element_type=jnp.float32) + b


def _encoder_layer(xf, attn_bias, wqkv, bqkv, wo, bo,
                   ln1w, ln1b, ln2w, ln2b, w1, b1, w2, b2):
    # xf: (T, E) f32 token slab (batch-major rows); attn_bias: (T, T) f32 mask.
    T, E = xf.shape
    dh = HEAD_DIM

    # ---- multi-head self attention (flat 2D matmuls, block-masked) ----
    qkv = _linear_kn(xf, wqkv, bqkv)                  # (T, 3E) f32, q pre-scaled

    attn = None
    for h in range(NUM_HEADS):                        # static 4-iteration loop
        q = qkv[:, h * dh:(h + 1) * dh].astype(jnp.bfloat16)            # (T, dh)
        k = qkv[:, E + h * dh:E + (h + 1) * dh].astype(jnp.bfloat16)    # (T, dh)
        v = qkv[:, 2 * E + h * dh:2 * E + (h + 1) * dh].astype(jnp.bfloat16)
        s = jax.lax.dot_general(q, k, (((1,), (1,)), ((), ())),
                                preferred_element_type=jnp.float32)     # (T, T)
        s = s + attn_bias
        s = s - jnp.max(s, axis=-1, keepdims=True)
        p = jnp.exp(s)
        denom = jnp.sum(p, axis=-1, keepdims=True)                      # (T, 1)
        ctx = jax.lax.dot_general(p.astype(jnp.bfloat16), v,
                                  (((1,), (0,)), ((), ())),
                                  preferred_element_type=jnp.float32)   # (T, dh)
        ctx = ctx / denom                              # exact softmax normalize
        # per-head slice of the out-projection; summing over heads is exactly
        # concat(heads) @ Wo^T, but avoids the lane concat.
        part = jax.lax.dot_general(ctx.astype(jnp.bfloat16),
                                   wo[h * dh:(h + 1) * dh, :],
                                   (((1,), (0,)), ((), ())),
                                   preferred_element_type=jnp.float32)  # (T, E)
        attn = part if attn is None else attn + part
    attn = attn + bo

    # ---- post-norm residual 1 ----
    x1 = _layer_norm(xf + attn, ln1w, ln1b)

    # ---- feed forward (relu) ----
    h1 = jnp.maximum(_linear_kn(x1, w1, b1), 0.0)     # (T, F) f32
    ff = jax.lax.dot_general(h1.astype(jnp.bfloat16), w2,
                             (((1,), (1,)), ((), ())),
                             preferred_element_type=jnp.float32) + b2   # (T, E)

    # ---- post-norm residual 2 ----
    return _layer_norm(x1 + ff, ln2w, ln2b)


# ---- fully fused kernel ------------------------------------------------------
def fused_transformer_kernel(tok_ref, embpos_ref, wslab_ref, pslab_ref, o_ref,
                             *, batch, seq):
    E, F, V = EMBED_SIZE, DIM_FEEDFORWARD, VOCAB_SIZE
    T = batch * seq

    # ---- embedding gather (one-hot MXU matmul) + positional add ----
    tok = tok_ref[...]                                               # (T, 1) i32
    one_hot = (tok == jax.lax.broadcasted_iota(jnp.int32, (T, V), 1)
               ).astype(jnp.float32)                                 # (T, V)
    xf = jax.lax.dot_general(one_hot, embpos_ref[0:V, :],
                             (((1,), (0,)), ((), ())),
                             preferred_element_type=jnp.float32)     # (T, E)
    pos = embpos_ref[V:V + seq, :]                                   # (seq, E)
    xf = xf + jnp.concatenate([pos] * batch, axis=0)                 # batch-major

    # ---- attention mask: rows attend iff they share a seq index ----
    # (batch_first=False: the caller's batch axis is the attention axis.)
    rows = jax.lax.broadcasted_iota(jnp.int32, (T, T), 0)
    cols = jax.lax.broadcasted_iota(jnp.int32, (T, T), 1)
    diff = rows - cols
    same = diff == 0
    for k in range(1, batch):
        same = jnp.logical_or(same,
                              jnp.logical_or(diff == k * seq, diff == -k * seq))
    attn_bias = jnp.where(same, 0.0, -1e30).astype(jnp.float32)      # (T, T)

    def wslice(layer, name):
        off, width = W_OFFS[name]
        col = layer * W_LAYER_STRIDE + off
        return wslab_ref[:, col:col + width]                         # bf16 view

    def pslice(layer, name):
        off, width = P_OFFS[name]
        col = layer * P_LAYER_STRIDE + off
        return pslab_ref[:, col:col + width]                         # (1, w) f32

    # ---- 3 encoder layers ----
    for layer in range(NUM_LAYERS):
        xf = _encoder_layer(
            xf, attn_bias,
            wslice(layer, 'wqkv'), pslice(layer, 'bqkv'),
            wslice(layer, 'wo'), pslice(layer, 'bo'),
            pslice(layer, 'ln1w'), pslice(layer, 'ln1b'),
            pslice(layer, 'ln2w'), pslice(layer, 'ln2b'),
            wslice(layer, 'w1'), pslice(layer, 'b1'),
            wslice(layer, 'w2'), pslice(layer, 'b2'))

    # ---- vocab projection, stored directly in (batch, seq, V) order ----
    out_w = wslab_ref[:, OUTW_OFF:OUTW_OFF + V]                      # (E, V)
    out_b = pslab_ref[:, OUTB_OFF:OUTB_OFF + V]                      # (1, V)
    logits = jax.lax.dot_general(xf.astype(jnp.bfloat16), out_w,
                                 (((1,), (0,)), ((), ())),
                                 preferred_element_type=jnp.float32) + out_b
    o_ref[...] = logits.reshape(batch, seq, V)


def minimal_transformer_forward(tok, packed):
    # tok: (batch, seq) int32 token ids; packed: dict of pre-packed slabs.
    batch, seq = tok.shape
    tok_col = tok.reshape(batch * seq, 1).astype(jnp.int32)   # batch-major rows

    kernel = functools.partial(fused_transformer_kernel, batch=batch, seq=seq)
    vmem = lambda: pl.BlockSpec(memory_space=pltpu.MemorySpace.VMEM)
    return pl.pallas_call(
        kernel,
        out_shape=jax.ShapeDtypeStruct((batch, seq, VOCAB_SIZE), jnp.float32),
        in_specs=[vmem(), vmem(), vmem(), vmem()],
        out_specs=vmem(),
    )(tok_col, packed['embpos'], packed['wslab'], packed['pslab'])


# ---- parameters (torch-convention shapes) ------------------------------------
def init_params(key):
    keys = jax.random.split(key, 3 + NUM_LAYERS)
    E, F, V = EMBED_SIZE, DIM_FEEDFORWARD, VOCAB_SIZE

    params = {
        'embed': 0.02 * jax.random.normal(keys[0], (V, E), jnp.float32),
        'pos': 0.02 * jax.random.normal(keys[1], (1, MAX_POS, E), jnp.float32),
    }
    layers = []
    for i in range(NUM_LAYERS):
        k = jax.random.split(keys[2 + i], 4)
        layers.append(dict(
            wqkv=0.02 * jax.random.normal(k[0], (3 * E, E), jnp.float32),
            bqkv=jnp.zeros((1, 3 * E), jnp.float32),
            wo=0.02 * jax.random.normal(k[1], (E, E), jnp.float32),
            bo=jnp.zeros((1, E), jnp.float32),
            ln1w=jnp.ones((1, E), jnp.float32),
            ln1b=jnp.zeros((1, E), jnp.float32),
            ln2w=jnp.ones((1, E), jnp.float32),
            ln2b=jnp.zeros((1, E), jnp.float32),
            w1=0.02 * jax.random.normal(k[2], (F, E), jnp.float32),
            b1=jnp.zeros((1, F), jnp.float32),
            w2=0.02 * jax.random.normal(k[3], (E, F), jnp.float32),
            b2=jnp.zeros((1, E), jnp.float32),
        ))
    params['layers'] = layers
    params['out_w'] = 0.02 * jax.random.normal(keys[2 + NUM_LAYERS],
                                               (V, E), jnp.float32)
    params['out_b'] = jnp.zeros((1, V), jnp.float32)
    return params


def pack_params(params):
    # Pack every parameter into 3 slabs:
    #   wslab (E, W_TOTAL) bf16 : lane-dense matmul weights, 1/sqrt(dh) folded
    #                             into the Q columns of wqkv.
    #   pslab (1, P_TOTAL) f32  : biases + LayerNorm params (+ scaled q bias).
    #   embpos (V+MAX_POS, E) f32: embedding table stacked over positional enc.
    E, V = EMBED_SIZE, VOCAB_SIZE
    scale = 1.0 / float(HEAD_DIM) ** 0.5

    wslab = jnp.zeros((E, W_TOTAL), jnp.float32)
    pslab = jnp.zeros((1, P_TOTAL), jnp.float32)

    def put(slab, col, mat2d):
        width = mat2d.shape[-1]
        return slab.at[:, col:col + width].set(mat2d.astype(jnp.float32))

    for i, lp in enumerate(params['layers']):
        wb = i * W_LAYER_STRIDE
        pb = i * P_LAYER_STRIDE
        wqkv_t = lp['wqkv'].T                                     # (E, 3E)
        wqkv_t = jnp.concatenate([wqkv_t[:, :E] * scale, wqkv_t[:, E:]], axis=1)
        bqkv = jnp.concatenate([lp['bqkv'][:, :E] * scale, lp['bqkv'][:, E:]],
                               axis=1)                            # (1, 3E)
        wslab = put(wslab, wb + W_OFFS['wqkv'][0], wqkv_t)
        wslab = put(wslab, wb + W_OFFS['wo'][0], lp['wo'].T)      # (E, E)
        wslab = put(wslab, wb + W_OFFS['w1'][0], lp['w1'].T)      # (E, F)
        wslab = put(wslab, wb + W_OFFS['w2'][0], lp['w2'])        # (E, F) as-is
        pslab = put(pslab, pb + P_OFFS['bqkv'][0], bqkv)
        pslab = put(pslab, pb + P_OFFS['bo'][0], lp['bo'])
        pslab = put(pslab, pb + P_OFFS['ln1w'][0], lp['ln1w'])
        pslab = put(pslab, pb + P_OFFS['ln1b'][0], lp['ln1b'])
        pslab = put(pslab, pb + P_OFFS['ln2w'][0], lp['ln2w'])
        pslab = put(pslab, pb + P_OFFS['ln2b'][0], lp['ln2b'])
        pslab = put(pslab, pb + P_OFFS['b1'][0], lp['b1'])
        pslab = put(pslab, pb + P_OFFS['b2'][0], lp['b2'])

    wslab = put(wslab, OUTW_OFF, params['out_w'].T)               # (E, V)
    pslab = put(pslab, OUTB_OFF, params['out_b'])                 # (1, V)

    embpos = jnp.concatenate([params['embed'], params['pos'][0]], axis=0)
    return {'wslab': wslab.astype(jnp.bfloat16),
            'pslab': pslab,
            'embpos': embpos.astype(jnp.float32)}


if __name__ == "__main__":
    key = jax.random.PRNGKey(0)
    pkey, dkey = jax.random.split(key)
    params = init_params(pkey)
    packed = pack_params(params)

    batch, seq = 2, 8
    tok = jax.random.randint(dkey, (batch, seq), 0, VOCAB_SIZE, dtype=jnp.int32)

    logits = jax.jit(minimal_transformer_forward)(tok, packed)
    jax.block_until_ready(logits)
    assert logits.shape == (batch, seq, VOCAB_SIZE)
    assert bool(jnp.all(jnp.isfinite(logits)))
    print("KERNEL_OK")
</pallas_src>

<mosaic_0001>
module attributes {stable_mosaic.version = 11 : i64} {
  func.func @fused_transformer_kernel(%arg0: memref<16x1xi32, #tpu.memory_space<vmem>>, %arg1: memref<116x32xf32, #tpu.memory_space<vmem>>, %arg2: memref<32x13184xbf16, #tpu.memory_space<vmem>>, %arg3: memref<1x8960xf32, #tpu.memory_space<vmem>>, %arg4: memref<2x8x16xf32, #tpu.memory_space<vmem>>) attributes {dimension_semantics = [], scalar_prefetch = 0 : i64, scratch_operands = 0 : i64, tpu.core_type = #tpu.core_type<tc>} {
    %c0 = arith.constant 0 : index
    %c0_0 = arith.constant 0 : index
    %0 = vector.load %arg0[%c0, %c0_0] : memref<16x1xi32, #tpu.memory_space<vmem>>, vector<16x1xi32>
    %1 = tpu.iota {dimensions = array<i32: 1>} : vector<16x16xi32>
    %2 = vector.broadcast %0 : vector<16x1xi32> to vector<16x16xi32>
    %3 = arith.cmpi eq, %2, %1 : vector<16x16xi32>
    %4 = arith.extui %3 : vector<16x16xi1> to vector<16x16xi32>
    %5 = arith.sitofp %4 : vector<16x16xi32> to vector<16x16xf32>
    %c0_1 = arith.constant 0 : index
    %c0_2 = arith.constant 0 : index
    %6 = vector.load %arg1[%c0_1, %c0_2] : memref<116x32xf32, #tpu.memory_space<vmem>>, vector<16x32xf32>
    %cst = arith.constant dense<0.000000e+00> : vector<16x32xf32>
    %7 = tpu.matmul %5, %6, %cst {dimension_numbers = #tpu.dot_dimension_numbers<[1], [0], [0], [1], [0, 0, 1, 1], [], []>} : vector<16x16xf32>, vector<16x32xf32>, vector<16x32xf32> -> vector<16x32xf32>
    %c16 = arith.constant 16 : index
    %c0_3 = arith.constant 0 : index
    %8 = vector.load %arg1[%c16, %c0_3] : memref<116x32xf32, #tpu.memory_space<vmem>>, vector<8x32xf32>
    %9 = tpu.concatenate %8, %8 in 0 : vector<8x32xf32>, vector<8x32xf32> -> vector<16x32xf32>
    %10 = arith.addf %7, %9 : vector<16x32xf32>
    %11 = tpu.iota {dimensions = array<i32: 0>} : vector<16x16xi32>
    %12 = tpu.iota {dimensions = array<i32: 1>} : vector<16x16xi32>
    %13 = arith.subi %11, %12 : vector<16x16xi32>
    %c0_i32 = arith.constant 0 : i32
    %14 = vector.broadcast %c0_i32 : i32 to vector<16x16xi32>
    %15 = arith.cmpi eq, %13, %14 : vector<16x16xi32>
    %c8_i32 = arith.constant 8 : i32
    %16 = vector.broadcast %c8_i32 : i32 to vector<16x16xi32>
    %17 = arith.cmpi eq, %13, %16 : vector<16x16xi32>
    %c-8_i32 = arith.constant -8 : i32
    %18 = vector.broadcast %c-8_i32 : i32 to vector<16x16xi32>
    %19 = arith.cmpi eq, %13, %18 : vector<16x16xi32>
    %20 = arith.ori %17, %19 : vector<16x16xi1>
    %21 = arith.ori %15, %20 : vector<16x16xi1>
    %cst_4 = arith.constant 0.000000e+00 : f32
    %cst_5 = arith.constant -1.000000e+30 : f32
    %22 = vector.broadcast %cst_4 : f32 to vector<16x16xf32>
    %23 = vector.broadcast %cst_5 : f32 to vector<16x16xf32>
    %24 = arith.select %21, %22, %23 : vector<16x16xi1>, vector<16x16xf32>
    %c0_6 = arith.constant 0 : index
    %c0_7 = arith.constant 0 : index
    %25 = vector.load %arg2[%c0_6, %c0_7] : memref<32x13184xbf16, #tpu.memory_space<vmem>>, vector<32x96xbf16>
    %c0_8 = arith.constant 0 : index
    %c0_9 = arith.constant 0 : index
    %26 = vector.load %arg3[%c0_8, %c0_9] : memref<1x8960xf32, #tpu.memory_space<vmem>>, vector<1x96xf32>
    %c0_10 = arith.constant 0 : index
    %c128 = arith.constant 128 : index
    %27 = vector.load %arg2[%c0_10, %c128] : memref<32x13184xbf16, #tpu.memory_space<vmem>>, vector<32x32xbf16>
    %c0_11 = arith.constant 0 : index
    %c128_12 = arith.constant 128 : index
    %28 = vector.load %arg3[%c0_11, %c128_12] : memref<1x8960xf32, #tpu.memory_space<vmem>>, vector<1x32xf32>
    %c0_13 = arith.constant 0 : index
    %c256 = arith.constant 256 : index
    %29 = vector.load %arg3[%c0_13, %c256] : memref<1x8960xf32, #tpu.memory_space<vmem>>, vector<1x32xf32>
    %c0_14 = arith.constant 0 : index
    %c384 = arith.constant 384 : index
    %30 = vector.load %arg3[%c0_14, %c384] : memref<1x8960xf32, #tpu.memory_space<vmem>>, vector<1x32xf32>
    %c0_15 = arith.constant 0 : index
    %c512 = arith.constant 512 : index
    %31 = vector.load %arg3[%c0_15, %c512] : memref<1x8960xf32, #tpu.memory_space<vmem>>, vector<1x32xf32>
    %c0_16 = arith.constant 0 : index
    %c640 = arith.constant 640 : index
    %32 = vector.load %arg3[%c0_16, %c640] : memref<1x8960xf32, #tpu.memory_space<vmem>>, vector<1x32xf32>
    %c0_17 = arith.constant 0 : index
    %c256_18 = arith.constant 256 : index
    %33 = vector.load %arg2[%c0_17, %c256_18] : memref<32x13184xbf16, #tpu.memory_space<vmem>>, vector<32x2048xbf16>
    %c0_19 = arith.constant 0 : index
    %c768 = arith.constant 768 : index
    %34 = vector.load %arg3[%c0_19, %c768] : memref<1x8960xf32, #tpu.memory_space<vmem>>, vector<1x2048xf32>
    %c0_20 = arith.constant 0 : index
    %c2304 = arith.constant 2304 : index
    %35 = vector.load %arg2[%c0_20, %c2304] : memref<32x13184xbf16, #tpu.memory_space<vmem>>, vector<32x2048xbf16>
    %c0_21 = arith.constant 0 : index
    %c2816 = arith.constant 2816 : index
    %36 = vector.load %arg3[%c0_21, %c2816] : memref<1x8960xf32, #tpu.memory_space<vmem>>, vector<1x32xf32>
    %37 = arith.truncf %10 : vector<16x32xf32> to vector<16x32xbf16>
    %cst_22 = arith.constant dense<0.000000e+00> : vector<16x96xf32>
    %38 = tpu.matmul %37, %25, %cst_22 {dimension_numbers = #tpu.dot_dimension_numbers<[1], [0], [0], [1], [0, 0, 1, 1], [], []>} : vector<16x32xbf16>, vector<32x96xbf16>, vector<16x96xf32> -> vector<16x96xf32>
    %39 = vector.broadcast %26 : vector<1x96xf32> to vector<16x96xf32>
    %40 = arith.addf %38, %39 : vector<16x96xf32>
    %41 = vector.extract_strided_slice %40 {offsets = [0, 0], sizes = [16, 8], strides = [1, 1]} : vector<16x96xf32> to vector<16x8xf32>
    %42 = arith.truncf %41 : vector<16x8xf32> to vector<16x8xbf16>
    %43 = vector.extract_strided_slice %40 {offsets = [0, 32], sizes = [16, 8], strides = [1, 1]} : vector<16x96xf32> to vector<16x8xf32>
    %44 = arith.truncf %43 : vector<16x8xf32> to vector<16x8xbf16>
    %45 = vector.extract_strided_slice %40 {offsets = [0, 64], sizes = [16, 8], strides = [1, 1]} : vector<16x96xf32> to vector<16x8xf32>
    %46 = arith.truncf %45 : vector<16x8xf32> to vector<16x8xbf16>
    %cst_23 = arith.constant dense<0.000000e+00> : vector<16x16xf32>
    %47 = tpu.matmul %42, %44, %cst_23 {dimension_numbers = #tpu.dot_dimension_numbers<[1], [1], [0], [0], [0, 0, 1, 0], [], []>} : vector<16x8xbf16>, vector<16x8xbf16>, vector<16x16xf32> -> vector<16x16xf32>
    %48 = arith.addf %47, %24 : vector<16x16xf32>
    %cst_24 = arith.constant dense<0xFF800000> : vector<16xf32>
    %49 = vector.multi_reduction <maximumf>, %48, %cst_24 [1] : vector<16x16xf32> to vector<16xf32>
    %50 = vector.shape_cast %49 : vector<16xf32> to vector<16x1xf32>
    %51 = vector.broadcast %50 : vector<16x1xf32> to vector<16x16xf32>
    %52 = arith.subf %48, %51 : vector<16x16xf32>
    %53 = math.exp %52 : vector<16x16xf32>
    %cst_25 = arith.constant dense<0.000000e+00> : vector<16xf32>
    %54 = vector.multi_reduction <add>, %53, %cst_25 [1] : vector<16x16xf32> to vector<16xf32>
    %55 = vector.shape_cast %54 : vector<16xf32> to vector<16x1xf32>
    %56 = arith.truncf %53 : vector<16x16xf32> to vector<16x16xbf16>
    %cst_26 = arith.constant dense<0.000000e+00> : vector<16x8xf32>
    %57 = tpu.matmul %56, %46, %cst_26 {dimension_numbers = #tpu.dot_dimension_numbers<[1], [0], [0], [1], [0, 0, 1, 1], [], []>} : vector<16x16xbf16>, vector<16x8xbf16>, vector<16x8xf32> -> vector<16x8xf32>
    %58 = vector.broadcast %55 : vector<16x1xf32> to vector<16x8xf32>
    %59 = arith.divf %57, %58 : vector<16x8xf32>
    %60 = arith.truncf %59 : vector<16x8xf32> to vector<16x8xbf16>
    %61 = vector.extract_strided_slice %27 {offsets = [0, 0], sizes = [8, 32], strides = [1, 1]} : vector<32x32xbf16> to vector<8x32xbf16>
    %cst_27 = arith.constant dense<0.000000e+00> : vector<16x32xf32>
    %62 = tpu.matmul %60, %61, %cst_27 {dimension_numbers = #tpu.dot_dimension_numbers<[1], [0], [0], [1], [0, 0, 1, 1], [], []>} : vector<16x8xbf16>, vector<8x32xbf16>, vector<16x32xf32> -> vector<16x32xf32>
    %63 = vector.extract_strided_slice %40 {offsets = [0, 8], sizes = [16, 8], strides = [1, 1]} : vector<16x96xf32> to vector<16x8xf32>
    %64 = arith.truncf %63 : vector<16x8xf32> to vector<16x8xbf16>
    %65 = vector.extract_strided_slice %40 {offsets = [0, 40], sizes = [16, 8], strides = [1, 1]} : vector<16x96xf32> to vector<16x8xf32>
    %66 = arith.truncf %65 : vector<16x8xf32> to vector<16x8xbf16>
    %67 = vector.extract_strided_slice %40 {offsets = [0, 72], sizes = [16, 8], strides = [1, 1]} : vector<16x96xf32> to vector<16x8xf32>
    %68 = arith.truncf %67 : vector<16x8xf32> to vector<16x8xbf16>
    %cst_28 = arith.constant dense<0.000000e+00> : vector<16x16xf32>
    %69 = tpu.matmul %64, %66, %cst_28 {dimension_numbers = #tpu.dot_dimension_numbers<[1], [1], [0], [0], [0, 0, 1, 0], [], []>} : vector<16x8xbf16>, vector<16x8xbf16>, vector<16x16xf32> -> vector<16x16xf32>
    %70 = arith.addf %69, %24 : vector<16x16xf32>
    %cst_29 = arith.constant dense<0xFF800000> : vector<16xf32>
    %71 = vector.multi_reduction <maximumf>, %70, %cst_29 [1] : vector<16x16xf32> to vector<16xf32>
    %72 = vector.shape_cast %71 : vector<16xf32> to vector<16x1xf32>
    %73 = vector.broadcast %72 : vector<16x1xf32> to vector<16x16xf32>
    %74 = arith.subf %70, %73 : vector<16x16xf32>
    %75 = math.exp %74 : vector<16x16xf32>
    %cst_30 = arith.constant dense<0.000000e+00> : vector<16xf32>
    %76 = vector.multi_reduction <add>, %75, %cst_30 [1] : vector<16x16xf32> to vector<16xf32>
    %77 = vector.shape_cast %76 : vector<16xf32> to vector<16x1xf32>
    %78 = arith.truncf %75 : vector<16x16xf32> to vector<16x16xbf16>
    %cst_31 = arith.constant dense<0.000000e+00> : vector<16x8xf32>
    %79 = tpu.matmul %78, %68, %cst_31 {dimension_numbers = #tpu.dot_dimension_numbers<[1], [0], [0], [1], [0, 0, 1, 1], [], []>} : vector<16x16xbf16>, vector<16x8xbf16>, vector<16x8xf32> -> vector<16x8xf32>
    %80 = vector.broadcast %77 : vector<16x1xf32> to vector<16x8xf32>
    %81 = arith.divf %79, %80 : vector<16x8xf32>
    %82 = arith.truncf %81 : vector<16x8xf32> to vector<16x8xbf16>
    %83 = vector.extract_strided_slice %27 {offsets = [8, 0], sizes = [8, 32], strides = [1, 1]} : vector<32x32xbf16> to vector<8x32xbf16>
    %cst_32 = arith.constant dense<0.000000e+00> : vector<16x32xf32>
    %84 = tpu.matmul %82, %83, %cst_32 {dimension_numbers = #tpu.dot_dimension_numbers<[1], [0], [0], [1], [0, 0, 1, 1], [], []>} : vector<16x8xbf16>, vector<8x32xbf16>, vector<16x32xf32> -> vector<16x32xf32>
    %85 = arith.addf %62, %84 : vector<16x32xf32>
    %86 = vector.extract_strided_slice %40 {offsets = [0, 16], sizes = [16, 8], strides = [1, 1]} : vector<16x96xf32> to vector<16x8xf32>
    %87 = arith.truncf %86 : vector<16x8xf32> to vector<16x8xbf16>
    %88 = vector.extract_strided_slice %40 {offsets = [0, 48], sizes = [16, 8], strides = [1, 1]} : vector<16x96xf32> to vector<16x8xf32>
    %89 = arith.truncf %88 : vector<16x8xf32> to vector<16x8xbf16>
    %90 = vector.extract_strided_slice %40 {offsets = [0, 80], sizes = [16, 8], strides = [1, 1]} : vector<16x96xf32> to vector<16x8xf32>
    %91 = arith.truncf %90 : vector<16x8xf32> to vector<16x8xbf16>
    %cst_33 = arith.constant dense<0.000000e+00> : vector<16x16xf32>
    %92 = tpu.matmul %87, %89, %cst_33 {dimension_numbers = #tpu.dot_dimension_numbers<[1], [1], [0], [0], [0, 0, 1, 0], [], []>} : vector<16x8xbf16>, vector<16x8xbf16>, vector<16x16xf32> -> vector<16x16xf32>
    %93 = arith.addf %92, %24 : vector<16x16xf32>
    %cst_34 = arith.constant dense<0xFF800000> : vector<16xf32>
    %94 = vector.multi_reduction <maximumf>, %93, %cst_34 [1] : vector<16x16xf32> to vector<16xf32>
    %95 = vector.shape_cast %94 : vector<16xf32> to vector<16x1xf32>
    %96 = vector.broadcast %95 : vector<16x1xf32> to vector<16x16xf32>
    %97 = arith.subf %93, %96 : vector<16x16xf32>
    %98 = math.exp %97 : vector<16x16xf32>
    %cst_35 = arith.constant dense<0.000000e+00> : vector<16xf32>
    %99 = vector.multi_reduction <add>, %98, %cst_35 [1] : vector<16x16xf32> to vector<16xf32>
    %100 = vector.shape_cast %99 : vector<16xf32> to vector<16x1xf32>
    %101 = arith.truncf %98 : vector<16x16xf32> to vector<16x16xbf16>
    %cst_36 = arith.constant dense<0.000000e+00> : vector<16x8xf32>
    %102 = tpu.matmul %101, %91, %cst_36 {dimension_numbers = #tpu.dot_dimension_numbers<[1], [0], [0], [1], [0, 0, 1, 1], [], []>} : vector<16x16xbf16>, vector<16x8xbf16>, vector<16x8xf32> -> vector<16x8xf32>
    %103 = vector.broadcast %100 : vector<16x1xf32> to vector<16x8xf32>
    %104 = arith.divf %102, %103 : vector<16x8xf32>
    %105 = arith.truncf %104 : vector<16x8xf32> to vector<16x8xbf16>
    %106 = vector.extract_strided_slice %27 {offsets = [16, 0], sizes = [8, 32], strides = [1, 1]} : vector<32x32xbf16> to vector<8x32xbf16>
    %cst_37 = arith.constant dense<0.000000e+00> : vector<16x32xf32>
    %107 = tpu.matmul %105, %106, %cst_37 {dimension_numbers = #tpu.dot_dimension_numbers<[1], [0], [0], [1], [0, 0, 1, 1], [], []>} : vector<16x8xbf16>, vector<8x32xbf16>, vector<16x32xf32> -> vector<16x32xf32>
    %108 = arith.addf %85, %107 : vector<16x32xf32>
    %109 = vector.extract_strided_slice %40 {offsets = [0, 24], sizes = [16, 8], strides = [1, 1]} : vector<16x96xf32> to vector<16x8xf32>
    %110 = arith.truncf %109 : vector<16x8xf32> to vector<16x8xbf16>
    %111 = vector.extract_strided_slice %40 {offsets = [0, 56], sizes = [16, 8], strides = [1, 1]} : vector<16x96xf32> to vector<16x8xf32>
    %112 = arith.truncf %111 : vector<16x8xf32> to vector<16x8xbf16>
    %113 = vector.extract_strided_slice %40 {offsets = [0, 88], sizes = [16, 8], strides = [1, 1]} : vector<16x96xf32> to vector<16x8xf32>
    %114 = arith.truncf %113 : vector<16x8xf32> to vector<16x8xbf16>
    %cst_38 = arith.constant dense<0.000000e+00> : vector<16x16xf32>
    %115 = tpu.matmul %110, %112, %cst_38 {dimension_numbers = #tpu.dot_dimension_numbers<[1], [1], [0], [0], [0, 0, 1, 0], [], []>} : vector<16x8xbf16>, vector<16x8xbf16>, vector<16x16xf32> -> vector<16x16xf32>
    %116 = arith.addf %115, %24 : vector<16x16xf32>
    %cst_39 = arith.constant dense<0xFF800000> : vector<16xf32>
    %117 = vector.multi_reduction <maximumf>, %116, %cst_39 [1] : vector<16x16xf32> to vector<16xf32>
    %118 = vector.shape_cast %117 : vector<16xf32> to vector<16x1xf32>
    %119 = vector.broadcast %118 : vector<16x1xf32> to vector<16x16xf32>
    %120 = arith.subf %116, %119 : vector<16x16xf32>
    %121 = math.exp %120 : vector<16x16xf32>
    %cst_40 = arith.constant dense<0.000000e+00> : vector<16xf32>
    %122 = vector.multi_reduction <add>, %121, %cst_40 [1] : vector<16x16xf32> to vector<16xf32>
    %123 = vector.shape_cast %122 : vector<16xf32> to vector<16x1xf32>
    %124 = arith.truncf %121 : vector<16x16xf32> to vector<16x16xbf16>
    %cst_41 = arith.constant dense<0.000000e+00> : vector<16x8xf32>
    %125 = tpu.matmul %124, %114, %cst_41 {dimension_numbers = #tpu.dot_dimension_numbers<[1], [0], [0], [1], [0, 0, 1, 1], [], []>} : vector<16x16xbf16>, vector<16x8xbf16>, vector<16x8xf32> -> vector<16x8xf32>
    %126 = vector.broadcast %123 : vector<16x1xf32> to vector<16x8xf32>
    %127 = arith.divf %125, %126 : vector<16x8xf32>
    %128 = arith.truncf %127 : vector<16x8xf32> to vector<16x8xbf16>
    %129 = vector.extract_strided_slice %27 {offsets = [24, 0], sizes = [8, 32], strides = [1, 1]} : vector<32x32xbf16> to vector<8x32xbf16>
    %cst_42 = arith.constant dense<0.000000e+00> : vector<16x32xf32>
    %130 = tpu.matmul %128, %129, %cst_42 {dimension_numbers = #tpu.dot_dimension_numbers<[1], [0], [0], [1], [0, 0, 1, 1], [], []>} : vector<16x8xbf16>, vector<8x32xbf16>, vector<16x32xf32> -> vector<16x32xf32>
    %131 = arith.addf %108, %130 : vector<16x32xf32>
    %132 = vector.broadcast %28 : vector<1x32xf32> to vector<16x32xf32>
    %133 = arith.addf %131, %132 : vector<16x32xf32>
    %134 = arith.addf %10, %133 : vector<16x32xf32>
    %cst_43 = arith.constant dense<0.000000e+00> : vector<16xf32>
    %135 = vector.multi_reduction <add>, %134, %cst_43 [1] : vector<16x32xf32> to vector<16xf32>
    %136 = vector.shape_cast %135 : vector<16xf32> to vector<16x1xf32>
    %cst_44 = arith.constant 3.200000e+01 : f32
    %137 = vector.broadcast %cst_44 : f32 to vector<16x1xf32>
    %138 = arith.divf %136, %137 : vector<16x1xf32>
    %139 = vector.broadcast %138 : vector<16x1xf32> to vector<16x32xf32>
    %140 = arith.subf %134, %139 : vector<16x32xf32>
    %141 = arith.mulf %140, %140 : vector<16x32xf32>
    %cst_45 = arith.constant dense<0.000000e+00> : vector<16xf32>
    %142 = vector.multi_reduction <add>, %141, %cst_45 [1] : vector<16x32xf32> to vector<16xf32>
    %143 = vector.shape_cast %142 : vector<16xf32> to vector<16x1xf32>
    %cst_46 = arith.constant 3.200000e+01 : f32
    %144 = vector.broadcast %cst_46 : f32 to vector<16x1xf32>
    %145 = arith.divf %143, %144 : vector<16x1xf32>
    %146 = vector.broadcast %138 : vector<16x1xf32> to vector<16x32xf32>
    %147 = arith.subf %134, %146 : vector<16x32xf32>
    %cst_47 = arith.constant 9.99999974E-6 : f32
    %148 = vector.broadcast %cst_47 : f32 to vector<16x1xf32>
    %149 = arith.addf %145, %148 : vector<16x1xf32>
    %150 = math.rsqrt %149 : vector<16x1xf32>
    %151 = vector.broadcast %150 : vector<16x1xf32> to vector<16x32xf32>
    %152 = arith.mulf %147, %151 : vector<16x32xf32>
    %153 = vector.broadcast %29 : vector<1x32xf32> to vector<16x32xf32>
    %154 = arith.mulf %152, %153 : vector<16x32xf32>
    %155 = vector.broadcast %30 : vector<1x32xf32> to vector<16x32xf32>
    %156 = arith.addf %154, %155 : vector<16x32xf32>
    %157 = arith.truncf %156 : vector<16x32xf32> to vector<16x32xbf16>
    %cst_48 = arith.constant dense<0.000000e+00> : vector<16x2048xf32>
    %158 = tpu.matmul %157, %33, %cst_48 {dimension_numbers = #tpu.dot_dimension_numbers<[1], [0], [0], [1], [0, 0, 1, 1], [], []>} : vector<16x32xbf16>, vector<32x2048xbf16>, vector<16x2048xf32> -> vector<16x2048xf32>
    %159 = vector.broadcast %34 : vector<1x2048xf32> to vector<16x2048xf32>
    %160 = arith.addf %158, %159 : vector<16x2048xf32>
    %cst_49 = arith.constant 0.000000e+00 : f32
    %161 = vector.broadcast %cst_49 : f32 to vector<16x2048xf32>
    %162 = arith.maximumf %160, %161 : vector<16x2048xf32>
    %163 = arith.truncf %162 : vector<16x2048xf32> to vector<16x2048xbf16>
    %cst_50 = arith.constant dense<0.000000e+00> : vector<16x32xf32>
    %164 = tpu.matmul %163, %35, %cst_50 {dimension_numbers = #tpu.dot_dimension_numbers<[1], [1], [0], [0], [0, 0, 1, 0], [], []>} : vector<16x2048xbf16>, vector<32x2048xbf16>, vector<16x32xf32> -> vector<16x32xf32>
    %165 = vector.broadcast %36 : vector<1x32xf32> to vector<16x32xf32>
    %166 = arith.addf %164, %165 : vector<16x32xf32>
    %167 = arith.addf %156, %166 : vector<16x32xf32>
    %cst_51 = arith.constant dense<0.000000e+00> : vector<16xf32>
    %168 = vector.multi_reduction <add>, %167, %cst_51 [1] : vector<16x32xf32> to vector<16xf32>
    %169 = vector.shape_cast %168 : vector<16xf32> to vector<16x1xf32>
    %cst_52 = arith.constant 3.200000e+01 : f32
    %170 = vector.broadcast %cst_52 : f32 to vector<16x1xf32>
    %171 = arith.divf %169, %170 : vector<16x1xf32>
    %172 = vector.broadcast %171 : vector<16x1xf32> to vector<16x32xf32>
    %173 = arith.subf %167, %172 : vector<16x32xf32>
    %174 = arith.mulf %173, %173 : vector<16x32xf32>
    %cst_53 = arith.constant dense<0.000000e+00> : vector<16xf32>
    %175 = vector.multi_reduction <add>, %174, %cst_53 [1] : vector<16x32xf32> to vector<16xf32>
    %176 = vector.shape_cast %175 : vector<16xf32> to vector<16x1xf32>
    %cst_54 = arith.constant 3.200000e+01 : f32
    %177 = vector.broadcast %cst_54 : f32 to vector<16x1xf32>
    %178 = arith.divf %176, %177 : vector<16x1xf32>
    %179 = vector.broadcast %171 : vector<16x1xf32> to vector<16x32xf32>
    %180 = arith.subf %167, %179 : vector<16x32xf32>
    %cst_55 = arith.constant 9.99999974E-6 : f32
    %181 = vector.broadcast %cst_55 : f32 to vector<16x1xf32>
    %182 = arith.addf %178, %181 : vector<16x1xf32>
    %183 = math.rsqrt %182 : vector<16x1xf32>
    %184 = vector.broadcast %183 : vector<16x1xf32> to vector<16x32xf32>
    %185 = arith.mulf %180, %184 : vector<16x32xf32>
    %186 = vector.broadcast %31 : vector<1x32xf32> to vector<16x32xf32>
    %187 = arith.mulf %185, %186 : vector<16x32xf32>
    %188 = vector.broadcast %32 : vector<1x32xf32> to vector<16x32xf32>
    %189 = arith.addf %187, %188 : vector<16x32xf32>
    %c0_56 = arith.constant 0 : index
    %c4352 = arith.constant 4352 : index
    %190 = vector.load %arg2[%c0_56, %c4352] : memref<32x13184xbf16, #tpu.memory_space<vmem>>, vector<32x96xbf16>
    %c0_57 = arith.constant 0 : index
    %c2944 = arith.constant 2944 : index
    %191 = vector.load %arg3[%c0_57, %c2944] : memref<1x8960xf32, #tpu.memory_space<vmem>>, vector<1x96xf32>
    %c0_58 = arith.constant 0 : index
    %c4480 = arith.constant 4480 : index
    %192 = vector.load %arg2[%c0_58, %c4480] : memref<32x13184xbf16, #tpu.memory_space<vmem>>, vector<32x32xbf16>
    %c0_59 = arith.constant 0 : index
    %c3072 = arith.constant 3072 : index
    %193 = vector.load %arg3[%c0_59, %c3072] : memref<1x8960xf32, #tpu.memory_space<vmem>>, vector<1x32xf32>
    %c0_60 = arith.constant 0 : index
    %c3200 = arith.constant 3200 : index
    %194 = vector.load %arg3[%c0_60, %c3200] : memref<1x8960xf32, #tpu.memory_space<vmem>>, vector<1x32xf32>
    %c0_61 = arith.constant 0 : index
    %c3328 = arith.constant 3328 : index
    %195 = vector.load %arg3[%c0_61, %c3328] : memref<1x8960xf32, #tpu.memory_space<vmem>>, vector<1x32xf32>
    %c0_62 = arith.constant 0 : index
    %c3456 = arith.constant 3456 : index
    %196 = vector.load %arg3[%c0_62, %c3456] : memref<1x8960xf32, #tpu.memory_space<vmem>>, vector<1x32xf32>
    %c0_63 = arith.constant 0 : index
    %c3584 = arith.constant 3584 : index
    %197 = vector.load %arg3[%c0_63, %c3584] : memref<1x8960xf32, #tpu.memory_space<vmem>>, vector<1x32xf32>
    %c0_64 = arith.constant 0 : index
    %c4608 = arith.constant 4608 : index
    %198 = vector.load %arg2[%c0_64, %c4608] : memref<32x13184xbf16, #tpu.memory_space<vmem>>, vector<32x2048xbf16>
    %c0_65 = arith.constant 0 : index
    %c3712 = arith.constant 3712 : index
    %199 = vector.load %arg3[%c0_65, %c3712] : memref<1x8960xf32, #tpu.memory_space<vmem>>, vector<1x2048xf32>
    %c0_66 = arith.constant 0 : index
    %c6656 = arith.constant 6656 : index
    %200 = vector.load %arg2[%c0_66, %c6656] : memref<32x13184xbf16, #tpu.memory_space<vmem>>, vector<32x2048xbf16>
    %c0_67 = arith.constant 0 : index
    %c5760 = arith.constant 5760 : index
    %201 = vector.load %arg3[%c0_67, %c5760] : memref<1x8960xf32, #tpu.memory_space<vmem>>, vector<1x32xf32>
    %202 = arith.truncf %189 : vector<16x32xf32> to vector<16x32xbf16>
    %cst_68 = arith.constant dense<0.000000e+00> : vector<16x96xf32>
    %203 = tpu.matmul %202, %190, %cst_68 {dimension_numbers = #tpu.dot_dimension_numbers<[1], [0], [0], [1], [0, 0, 1, 1], [], []>} : vector<16x32xbf16>, vector<32x96xbf16>, vector<16x96xf32> -> vector<16x96xf32>
    %204 = vector.broadcast %191 : vector<1x96xf32> to vector<16x96xf32>
    %205 = arith.addf %203, %204 : vector<16x96xf32>
    %206 = vector.extract_strided_slice %205 {offsets = [0, 0], sizes = [16, 8], strides = [1, 1]} : vector<16x96xf32> to vector<16x8xf32>
    %207 = arith.truncf %206 : vector<16x8xf32> to vector<16x8xbf16>
    %208 = vector.extract_strided_slice %205 {offsets = [0, 32], sizes = [16, 8], strides = [1, 1]} : vector<16x96xf32> to vector<16x8xf32>
    %209 = arith.truncf %208 : vector<16x8xf32> to vector<16x8xbf16>
    %210 = vector.extract_strided_slice %205 {offsets = [0, 64], sizes = [16, 8], strides = [1, 1]} : vector<16x96xf32> to vector<16x8xf32>
    %211 = arith.truncf %210 : vector<16x8xf32> to vector<16x8xbf16>
    %cst_69 = arith.constant dense<0.000000e+00> : vector<16x16xf32>
    %212 = tpu.matmul %207, %209, %cst_69 {dimension_numbers = #tpu.dot_dimension_numbers<[1], [1], [0], [0], [0, 0, 1, 0], [], []>} : vector<16x8xbf16>, vector<16x8xbf16>, vector<16x16xf32> -> vector<16x16xf32>
    %213 = arith.addf %212, %24 : vector<16x16xf32>
    %cst_70 = arith.constant dense<0xFF800000> : vector<16xf32>
    %214 = vector.multi_reduction <maximumf>, %213, %cst_70 [1] : vector<16x16xf32> to vector<16xf32>
    %215 = vector.shape_cast %214 : vector<16xf32> to vector<16x1xf32>
    %216 = vector.broadcast %215 : vector<16x1xf32> to vector<16x16xf32>
    %217 = arith.subf %213, %216 : vector<16x16xf32>
    %218 = math.exp %217 : vector<16x16xf32>
    %cst_71 = arith.constant dense<0.000000e+00> : vector<16xf32>
    %219 = vector.multi_reduction <add>, %218, %cst_71 [1] : vector<16x16xf32> to vector<16xf32>
    %220 = vector.shape_cast %219 : vector<16xf32> to vector<16x1xf32>
    %221 = arith.truncf %218 : vector<16x16xf32> to vector<16x16xbf16>
    %cst_72 = arith.constant dense<0.000000e+00> : vector<16x8xf32>
    %222 = tpu.matmul %221, %211, %cst_72 {dimension_numbers = #tpu.dot_dimension_numbers<[1], [0], [0], [1], [0, 0, 1, 1], [], []>} : vector<16x16xbf16>, vector<16x8xbf16>, vector<16x8xf32> -> vector<16x8xf32>
    %223 = vector.broadcast %220 : vector<16x1xf32> to vector<16x8xf32>
    %224 = arith.divf %222, %223 : vector<16x8xf32>
    %225 = arith.truncf %224 : vector<16x8xf32> to vector<16x8xbf16>
    %226 = vector.extract_strided_slice %192 {offsets = [0, 0], sizes = [8, 32], strides = [1, 1]} : vector<32x32xbf16> to vector<8x32xbf16>
    %cst_73 = arith.constant dense<0.000000e+00> : vector<16x32xf32>
    %227 = tpu.matmul %225, %226, %cst_73 {dimension_numbers = #tpu.dot_dimension_numbers<[1], [0], [0], [1], [0, 0, 1, 1], [], []>} : vector<16x8xbf16>, vector<8x32xbf16>, vector<16x32xf32> -> vector<16x32xf32>
    %228 = vector.extract_strided_slice %205 {offsets = [0, 8], sizes = [16, 8], strides = [1, 1]} : vector<16x96xf32> to vector<16x8xf32>
    %229 = arith.truncf %228 : vector<16x8xf32> to vector<16x8xbf16>
    %230 = vector.extract_strided_slice %205 {offsets = [0, 40], sizes = [16, 8], strides = [1, 1]} : vector<16x96xf32> to vector<16x8xf32>
    %231 = arith.truncf %230 : vector<16x8xf32> to vector<16x8xbf16>
    %232 = vector.extract_strided_slice %205 {offsets = [0, 72], sizes = [16, 8], strides = [1, 1]} : vector<16x96xf32> to vector<16x8xf32>
    %233 = arith.truncf %232 : vector<16x8xf32> to vector<16x8xbf16>
    %cst_74 = arith.constant dense<0.000000e+00> : vector<16x16xf32>
    %234 = tpu.matmul %229, %231, %cst_74 {dimension_numbers = #tpu.dot_dimension_numbers<[1], [1], [0], [0], [0, 0, 1, 0], [], []>} : vector<16x8xbf16>, vector<16x8xbf16>, vector<16x16xf32> -> vector<16x16xf32>
    %235 = arith.addf %234, %24 : vector<16x16xf32>
    %cst_75 = arith.constant dense<0xFF800000> : vector<16xf32>
    %236 = vector.multi_reduction <maximumf>, %235, %cst_75 [1] : vector<16x16xf32> to vector<16xf32>
    %237 = vector.shape_cast %236 : vector<16xf32> to vector<16x1xf32>
    %238 = vector.broadcast %237 : vector<16x1xf32> to vector<16x16xf32>
    %239 = arith.subf %235, %238 : vector<16x16xf32>
    %240 = math.exp %239 : vector<16x16xf32>
    %cst_76 = arith.constant dense<0.000000e+00> : vector<16xf32>
    %241 = vector.multi_reduction <add>, %240, %cst_76 [1] : vector<16x16xf32> to vector<16xf32>
    %242 = vector.shape_cast %241 : vector<16xf32> to vector<16x1xf32>
    %243 = arith.truncf %240 : vector<16x16xf32> to vector<16x16xbf16>
    %cst_77 = arith.constant dense<0.000000e+00> : vector<16x8xf32>
    %244 = tpu.matmul %243, %233, %cst_77 {dimension_numbers = #tpu.dot_dimension_numbers<[1], [0], [0], [1], [0, 0, 1, 1], [], []>} : vector<16x16xbf16>, vector<16x8xbf16>, vector<16x8xf32> -> vector<16x8xf32>
    %245 = vector.broadcast %242 : vector<16x1xf32> to vector<16x8xf32>
    %246 = arith.divf %244, %245 : vector<16x8xf32>
    %247 = arith.truncf %246 : vector<16x8xf32> to vector<16x8xbf16>
    %248 = vector.extract_strided_slice %192 {offsets = [8, 0], sizes = [8, 32], strides = [1, 1]} : vector<32x32xbf16> to vector<8x32xbf16>
    %cst_78 = arith.constant dense<0.000000e+00> : vector<16x32xf32>
    %249 = tpu.matmul %247, %248, %cst_78 {dimension_numbers = #tpu.dot_dimension_numbers<[1], [0], [0], [1], [0, 0, 1, 1], [], []>} : vector<16x8xbf16>, vector<8x32xbf16>, vector<16x32xf32> -> vector<16x32xf32>
    %250 = arith.addf %227, %249 : vector<16x32xf32>
    %251 = vector.extract_strided_slice %205 {offsets = [0, 16], sizes = [16, 8], strides = [1, 1]} : vector<16x96xf32> to vector<16x8xf32>
    %252 = arith.truncf %251 : vector<16x8xf32> to vector<16x8xbf16>
    %253 = vector.extract_strided_slice %205 {offsets = [0, 48], sizes = [16, 8], strides = [1, 1]} : vector<16x96xf32> to vector<16x8xf32>
    %254 = arith.truncf %253 : vector<16x8xf32> to vector<16x8xbf16>
    %255 = vector.extract_strided_slice %205 {offsets = [0, 80], sizes = [16, 8], strides = [1, 1]} : vector<16x96xf32> to vector<16x8xf32>
    %256 = arith.truncf %255 : vector<16x8xf32> to vector<16x8xbf16>
    %cst_79 = arith.constant dense<0.000000e+00> : vector<16x16xf32>
    %257 = tpu.matmul %252, %254, %cst_79 {dimension_numbers = #tpu.dot_dimension_numbers<[1], [1], [0], [0], [0, 0, 1, 0], [], []>} : vector<16x8xbf16>, vector<16x8xbf16>, vector<16x16xf32> -> vector<16x16xf32>
    %258 = arith.addf %257, %24 : vector<16x16xf32>
    %cst_80 = arith.constant dense<0xFF800000> : vector<16xf32>
    %259 = vector.multi_reduction <maximumf>, %258, %cst_80 [1] : vector<16x16xf32> to vector<16xf32>
    %260 = vector.shape_cast %259 : vector<16xf32> to vector<16x1xf32>
    %261 = vector.broadcast %260 : vector<16x1xf32> to vector<16x16xf32>
    %262 = arith.subf %258, %261 : vector<16x16xf32>
    %263 = math.exp %262 : vector<16x16xf32>
    %cst_81 = arith.constant dense<0.000000e+00> : vector<16xf32>
    %264 = vector.multi_reduction <add>, %263, %cst_81 [1] : vector<16x16xf32> to vector<16xf32>
    %265 = vector.shape_cast %264 : vector<16xf32> to vector<16x1xf32>
    %266 = arith.truncf %263 : vector<16x16xf32> to vector<16x16xbf16>
    %cst_82 = arith.constant dense<0.000000e+00> : vector<16x8xf32>
    %267 = tpu.matmul %266, %256, %cst_82 {dimension_numbers = #tpu.dot_dimension_numbers<[1], [0], [0], [1], [0, 0, 1, 1], [], []>} : vector<16x16xbf16>, vector<16x8xbf16>, vector<16x8xf32> -> vector<16x8xf32>
    %268 = vector.broadcast %265 : vector<16x1xf32> to vector<16x8xf32>
    %269 = arith.divf %267, %268 : vector<16x8xf32>
    %270 = arith.truncf %269 : vector<16x8xf32> to vector<16x8xbf16>
    %271 = vector.extract_strided_slice %192 {offsets = [16, 0], sizes = [8, 32], strides = [1, 1]} : vector<32x32xbf16> to vector<8x32xbf16>
    %cst_83 = arith.constant dense<0.000000e+00> : vector<16x32xf32>
    %272 = tpu.matmul %270, %271, %cst_83 {dimension_numbers = #tpu.dot_dimension_numbers<[1], [0], [0], [1], [0, 0, 1, 1], [], []>} : vector<16x8xbf16>, vector<8x32xbf16>, vector<16x32xf32> -> vector<16x32xf32>
    %273 = arith.addf %250, %272 : vector<16x32xf32>
    %274 = vector.extract_strided_slice %205 {offsets = [0, 24], sizes = [16, 8], strides = [1, 1]} : vector<16x96xf32> to vector<16x8xf32>
    %275 = arith.truncf %274 : vector<16x8xf32> to vector<16x8xbf16>
    %276 = vector.extract_strided_slice %205 {offsets = [0, 56], sizes = [16, 8], strides = [1, 1]} : vector<16x96xf32> to vector<16x8xf32>
    %277 = arith.truncf %276 : vector<16x8xf32> to vector<16x8xbf16>
    %278 = vector.extract_strided_slice %205 {offsets = [0, 88], sizes = [16, 8], strides = [1, 1]} : vector<16x96xf32> to vector<16x8xf32>
    %279 = arith.truncf %278 : vector<16x8xf32> to vector<16x8xbf16>
    %cst_84 = arith.constant dense<0.000000e+00> : vector<16x16xf32>
    %280 = tpu.matmul %275, %277, %cst_84 {dimension_numbers = #tpu.dot_dimension_numbers<[1], [1], [0], [0], [0, 0, 1, 0], [], []>} : vector<16x8xbf16>, vector<16x8xbf16>, vector<16x16xf32> -> vector<16x16xf32>
    %281 = arith.addf %280, %24 : vector<16x16xf32>
    %cst_85 = arith.constant dense<0xFF800000> : vector<16xf32>
    %282 = vector.multi_reduction <maximumf>, %281, %cst_85 [1] : vector<16x16xf32> to vector<16xf32>
    %283 = vector.shape_cast %282 : vector<16xf32> to vector<16x1xf32>
    %284 = vector.broadcast %283 : vector<16x1xf32> to vector<16x16xf32>
    %285 = arith.subf %281, %284 : vector<16x16xf32>
    %286 = math.exp %285 : vector<16x16xf32>
    %cst_86 = arith.constant dense<0.000000e+00> : vector<16xf32>
    %287 = vector.multi_reduction <add>, %286, %cst_86 [1] : vector<16x16xf32> to vector<16xf32>
    %288 = vector.shape_cast %287 : vector<16xf32> to vector<16x1xf32>
    %289 = arith.truncf %286 : vector<16x16xf32> to vector<16x16xbf16>
    %cst_87 = arith.constant dense<0.000000e+00> : vector<16x8xf32>
    %290 = tpu.matmul %289, %279, %cst_87 {dimension_numbers = #tpu.dot_dimension_numbers<[1], [0], [0], [1], [0, 0, 1, 1], [], []>} : vector<16x16xbf16>, vector<16x8xbf16>, vector<16x8xf32> -> vector<16x8xf32>
    %291 = vector.broadcast %288 : vector<16x1xf32> to vector<16x8xf32>
    %292 = arith.divf %290, %291 : vector<16x8xf32>
    %293 = arith.truncf %292 : vector<16x8xf32> to vector<16x8xbf16>
    %294 = vector.extract_strided_slice %192 {offsets = [24, 0], sizes = [8, 32], strides = [1, 1]} : vector<32x32xbf16> to vector<8x32xbf16>
    %cst_88 = arith.constant dense<0.000000e+00> : vector<16x32xf32>
    %295 = tpu.matmul %293, %294, %cst_88 {dimension_numbers = #tpu.dot_dimension_numbers<[1], [0], [0], [1], [0, 0, 1, 1], [], []>} : vector<16x8xbf16>, vector<8x32xbf16>, vector<16x32xf32> -> vector<16x32xf32>
    %296 = arith.addf %273, %295 : vector<16x32xf32>
    %297 = vector.broadcast %193 : vector<1x32xf32> to vector<16x32xf32>
    %298 = arith.addf %296, %297 : vector<16x32xf32>
    %299 = arith.addf %189, %298 : vector<16x32xf32>
    %cst_89 = arith.constant dense<0.000000e+00> : vector<16xf32>
    %300 = vector.multi_reduction <add>, %299, %cst_89 [1] : vector<16x32xf32> to vector<16xf32>
    %301 = vector.shape_cast %300 : vector<16xf32> to vector<16x1xf32>
    %cst_90 = arith.constant 3.200000e+01 : f32
    %302 = vector.broadcast %cst_90 : f32 to vector<16x1xf32>
    %303 = arith.divf %301, %302 : vector<16x1xf32>
    %304 = vector.broadcast %303 : vector<16x1xf32> to vector<16x32xf32>
    %305 = arith.subf %299, %304 : vector<16x32xf32>
    %306 = arith.mulf %305, %305 : vector<16x32xf32>
    %cst_91 = arith.constant dense<0.000000e+00> : vector<16xf32>
    %307 = vector.multi_reduction <add>, %306, %cst_91 [1] : vector<16x32xf32> to vector<16xf32>
    %308 = vector.shape_cast %307 : vector<16xf32> to vector<16x1xf32>
    %cst_92 = arith.constant 3.200000e+01 : f32
    %309 = vector.broadcast %cst_92 : f32 to vector<16x1xf32>
    %310 = arith.divf %308, %309 : vector<16x1xf32>
    %311 = vector.broadcast %303 : vector<16x1xf32> to vector<16x32xf32>
    %312 = arith.subf %299, %311 : vector<16x32xf32>
    %cst_93 = arith.constant 9.99999974E-6 : f32
    %313 = vector.broadcast %cst_93 : f32 to vector<16x1xf32>
    %314 = arith.addf %310, %313 : vector<16x1xf32>
    %315 = math.rsqrt %314 : vector<16x1xf32>
    %316 = vector.broadcast %315 : vector<16x1xf32> to vector<16x32xf32>
    %317 = arith.mulf %312, %316 : vector<16x32xf32>
    %318 = vector.broadcast %194 : vector<1x32xf32> to vector<16x32xf32>
    %319 = arith.mulf %317, %318 : vector<16x32xf32>
    %320 = vector.broadcast %195 : vector<1x32xf32> to vector<16x32xf32>
    %321 = arith.addf %319, %320 : vector<16x32xf32>
    %322 = arith.truncf %321 : vector<16x32xf32> to vector<16x32xbf16>
    %cst_94 = arith.constant dense<0.000000e+00> : vector<16x2048xf32>
    %323 = tpu.matmul %322, %198, %cst_94 {dimension_numbers = #tpu.dot_dimension_numbers<[1], [0], [0], [1], [0, 0, 1, 1], [], []>} : vector<16x32xbf16>, vector<32x2048xbf16>, vector<16x2048xf32> -> vector<16x2048xf32>
    %324 = vector.broadcast %199 : vector<1x2048xf32> to vector<16x2048xf32>
    %325 = arith.addf %323, %324 : vector<16x2048xf32>
    %cst_95 = arith.constant 0.000000e+00 : f32
    %326 = vector.broadcast %cst_95 : f32 to vector<16x2048xf32>
    %327 = arith.maximumf %325, %326 : vector<16x2048xf32>
    %328 = arith.truncf %327 : vector<16x2048xf32> to vector<16x2048xbf16>
    %cst_96 = arith.constant dense<0.000000e+00> : vector<16x32xf32>
    %329 = tpu.matmul %328, %200, %cst_96 {dimension_numbers = #tpu.dot_dimension_numbers<[1], [1], [0], [0], [0, 0, 1, 0], [], []>} : vector<16x2048xbf16>, vector<32x2048xbf16>, vector<16x32xf32> -> vector<16x32xf32>
    %330 = vector.broadcast %201 : vector<1x32xf32> to vector<16x32xf32>
    %331 = arith.addf %329, %330 : vector<16x32xf32>
    %332 = arith.addf %321, %331 : vector<16x32xf32>
    %cst_97 = arith.constant dense<0.000000e+00> : vector<16xf32>
    %333 = vector.multi_reduction <add>, %332, %cst_97 [1] : vector<16x32xf32> to vector<16xf32>
    %334 = vector.shape_cast %333 : vector<16xf32> to vector<16x1xf32>
    %cst_98 = arith.constant 3.200000e+01 : f32
    %335 = vector.broadcast %cst_98 : f32 to vector<16x1xf32>
    %336 = arith.divf %334, %335 : vector<16x1xf32>
    %337 = vector.broadcast %336 : vector<16x1xf32> to vector<16x32xf32>
    %338 = arith.subf %332, %337 : vector<16x32xf32>
    %339 = arith.mulf %338, %338 : vector<16x32xf32>
    %cst_99 = arith.constant dense<0.000000e+00> : vector<16xf32>
    %340 = vector.multi_reduction <add>, %339, %cst_99 [1] : vector<16x32xf32> to vector<16xf32>
    %341 = vector.shape_cast %340 : vector<16xf32> to vector<16x1xf32>
    %cst_100 = arith.constant 3.200000e+01 : f32
    %342 = vector.broadcast %cst_100 : f32 to vector<16x1xf32>
    %343 = arith.divf %341, %342 : vector<16x1xf32>
    %344 = vector.broadcast %336 : vector<16x1xf32> to vector<16x32xf32>
    %345 = arith.subf %332, %344 : vector<16x32xf32>
    %cst_101 = arith.constant 9.99999974E-6 : f32
    %346 = vector.broadcast %cst_101 : f32 to vector<16x1xf32>
    %347 = arith.addf %343, %346 : vector<16x1xf32>
    %348 = math.rsqrt %347 : vector<16x1xf32>
    %349 = vector.broadcast %348 : vector<16x1xf32> to vector<16x32xf32>
    %350 = arith.mulf %345, %349 : vector<16x32xf32>
    %351 = vector.broadcast %196 : vector<1x32xf32> to vector<16x32xf32>
    %352 = arith.mulf %350, %351 : vector<16x32xf32>
    %353 = vector.broadcast %197 : vector<1x32xf32> to vector<16x32xf32>
    %354 = arith.addf %352, %353 : vector<16x32xf32>
    %c0_102 = arith.constant 0 : index
    %c8704 = arith.constant 8704 : index
    %355 = vector.load %arg2[%c0_102, %c8704] : memref<32x13184xbf16, #tpu.memory_space<vmem>>, vector<32x96xbf16>
    %c0_103 = arith.constant 0 : index
    %c5888 = arith.constant 5888 : index
    %356 = vector.load %arg3[%c0_103, %c5888] : memref<1x8960xf32, #tpu.memory_space<vmem>>, vector<1x96xf32>
    %c0_104 = arith.constant 0 : index
    %c8832 = arith.constant 8832 : index
    %357 = vector.load %arg2[%c0_104, %c8832] : memref<32x13184xbf16, #tpu.memory_space<vmem>>, vector<32x32xbf16>
    %c0_105 = arith.constant 0 : index
    %c6016 = arith.constant 6016 : index
    %358 = vector.load %arg3[%c0_105, %c6016] : memref<1x8960xf32, #tpu.memory_space<vmem>>, vector<1x32xf32>
    %c0_106 = arith.constant 0 : index
    %c6144 = arith.constant 6144 : index
    %359 = vector.load %arg3[%c0_106, %c6144] : memref<1x8960xf32, #tpu.memory_space<vmem>>, vector<1x32xf32>
    %c0_107 = arith.constant 0 : index
    %c6272 = arith.constant 6272 : index
    %360 = vector.load %arg3[%c0_107, %c6272] : memref<1x8960xf32, #tpu.memory_space<vmem>>, vector<1x32xf32>
    %c0_108 = arith.constant 0 : index
    %c6400 = arith.constant 6400 : index
    %361 = vector.load %arg3[%c0_108, %c6400] : memref<1x8960xf32, #tpu.memory_space<vmem>>, vector<1x32xf32>
    %c0_109 = arith.constant 0 : index
    %c6528 = arith.constant 6528 : index
    %362 = vector.load %arg3[%c0_109, %c6528] : memref<1x8960xf32, #tpu.memory_space<vmem>>, vector<1x32xf32>
    %c0_110 = arith.constant 0 : index
    %c8960 = arith.constant 8960 : index
    %363 = vector.load %arg2[%c0_110, %c8960] : memref<32x13184xbf16, #tpu.memory_space<vmem>>, vector<32x2048xbf16>
    %c0_111 = arith.constant 0 : index
    %c6656_112 = arith.constant 6656 : index
    %364 = vector.load %arg3[%c0_111, %c6656_112] : memref<1x8960xf32, #tpu.memory_space<vmem>>, vector<1x2048xf32>
    %c0_113 = arith.constant 0 : index
    %c11008 = arith.constant 11008 : index
    %365 = vector.load %arg2[%c0_113, %c11008] : memref<32x13184xbf16, #tpu.memory_space<vmem>>, vector<32x2048xbf16>
    %c0_114 = arith.constant 0 : index
    %c8704_115 = arith.constant 8704 : index
    %366 = vector.load %arg3[%c0_114, %c8704_115] : memref<1x8960xf32, #tpu.memory_space<vmem>>, vector<1x32xf32>
    %367 = arith.truncf %354 : vector<16x32xf32> to vector<16x32xbf16>
    %cst_116 = arith.constant dense<0.000000e+00> : vector<16x96xf32>
    %368 = tpu.matmul %367, %355, %cst_116 {dimension_numbers = #tpu.dot_dimension_numbers<[1], [0], [0], [1], [0, 0, 1, 1], [], []>} : vector<16x32xbf16>, vector<32x96xbf16>, vector<16x96xf32> -> vector<16x96xf32>
    %369 = vector.broadcast %356 : vector<1x96xf32> to vector<16x96xf32>
    %370 = arith.addf %368, %369 : vector<16x96xf32>
    %371 = vector.extract_strided_slice %370 {offsets = [0, 0], sizes = [16, 8], strides = [1, 1]} : vector<16x96xf32> to vector<16x8xf32>
    %372 = arith.truncf %371 : vector<16x8xf32> to vector<16x8xbf16>
    %373 = vector.extract_strided_slice %370 {offsets = [0, 32], sizes = [16, 8], strides = [1, 1]} : vector<16x96xf32> to vector<16x8xf32>
    %374 = arith.truncf %373 : vector<16x8xf32> to vector<16x8xbf16>
    %375 = vector.extract_strided_slice %370 {offsets = [0, 64], sizes = [16, 8], strides = [1, 1]} : vector<16x96xf32> to vector<16x8xf32>
    %376 = arith.truncf %375 : vector<16x8xf32> to vector<16x8xbf16>
    %cst_117 = arith.constant dense<0.000000e+00> : vector<16x16xf32>
    %377 = tpu.matmul %372, %374, %cst_117 {dimension_numbers = #tpu.dot_dimension_numbers<[1], [1], [0], [0], [0, 0, 1, 0], [], []>} : vector<16x8xbf16>, vector<16x8xbf16>, vector<16x16xf32> -> vector<16x16xf32>
    %378 = arith.addf %377, %24 : vector<16x16xf32>
    %cst_118 = arith.constant dense<0xFF800000> : vector<16xf32>
    %379 = vector.multi_reduction <maximumf>, %378, %cst_118 [1] : vector<16x16xf32> to vector<16xf32>
    %380 = vector.shape_cast %379 : vector<16xf32> to vector<16x1xf32>
    %381 = vector.broadcast %380 : vector<16x1xf32> to vector<16x16xf32>
    %382 = arith.subf %378, %381 : vector<16x16xf32>
    %383 = math.exp %382 : vector<16x16xf32>
    %cst_119 = arith.constant dense<0.000000e+00> : vector<16xf32>
    %384 = vector.multi_reduction <add>, %383, %cst_119 [1] : vector<16x16xf32> to vector<16xf32>
    %385 = vector.shape_cast %384 : vector<16xf32> to vector<16x1xf32>
    %386 = arith.truncf %383 : vector<16x16xf32> to vector<16x16xbf16>
    %cst_120 = arith.constant dense<0.000000e+00> : vector<16x8xf32>
    %387 = tpu.matmul %386, %376, %cst_120 {dimension_numbers = #tpu.dot_dimension_numbers<[1], [0], [0], [1], [0, 0, 1, 1], [], []>} : vector<16x16xbf16>, vector<16x8xbf16>, vector<16x8xf32> -> vector<16x8xf32>
    %388 = vector.broadcast %385 : vector<16x1xf32> to vector<16x8xf32>
    %389 = arith.divf %387, %388 : vector<16x8xf32>
    %390 = arith.truncf %389 : vector<16x8xf32> to vector<16x8xbf16>
    %391 = vector.extract_strided_slice %357 {offsets = [0, 0], sizes = [8, 32], strides = [1, 1]} : vector<32x32xbf16> to vector<8x32xbf16>
    %cst_121 = arith.constant dense<0.000000e+00> : vector<16x32xf32>
    %392 = tpu.matmul %390, %391, %cst_121 {dimension_numbers = #tpu.dot_dimension_numbers<[1], [0], [0], [1], [0, 0, 1, 1], [], []>} : vector<16x8xbf16>, vector<8x32xbf16>, vector<16x32xf32> -> vector<16x32xf32>
    %393 = vector.extract_strided_slice %370 {offsets = [0, 8], sizes = [16, 8], strides = [1, 1]} : vector<16x96xf32> to vector<16x8xf32>
    %394 = arith.truncf %393 : vector<16x8xf32> to vector<16x8xbf16>
    %395 = vector.extract_strided_slice %370 {offsets = [0, 40], sizes = [16, 8], strides = [1, 1]} : vector<16x96xf32> to vector<16x8xf32>
    %396 = arith.truncf %395 : vector<16x8xf32> to vector<16x8xbf16>
    %397 = vector.extract_strided_slice %370 {offsets = [0, 72], sizes = [16, 8], strides = [1, 1]} : vector<16x96xf32> to vector<16x8xf32>
    %398 = arith.truncf %397 : vector<16x8xf32> to vector<16x8xbf16>
    %cst_122 = arith.constant dense<0.000000e+00> : vector<16x16xf32>
    %399 = tpu.matmul %394, %396, %cst_122 {dimension_numbers = #tpu.dot_dimension_numbers<[1], [1], [0], [0], [0, 0, 1, 0], [], []>} : vector<16x8xbf16>, vector<16x8xbf16>, vector<16x16xf32> -> vector<16x16xf32>
    %400 = arith.addf %399, %24 : vector<16x16xf32>
    %cst_123 = arith.constant dense<0xFF800000> : vector<16xf32>
    %401 = vector.multi_reduction <maximumf>, %400, %cst_123 [1] : vector<16x16xf32> to vector<16xf32>
    %402 = vector.shape_cast %401 : vector<16xf32> to vector<16x1xf32>
    %403 = vector.broadcast %402 : vector<16x1xf32> to vector<16x16xf32>
    %404 = arith.subf %400, %403 : vector<16x16xf32>
    %405 = math.exp %404 : vector<16x16xf32>
    %cst_124 = arith.constant dense<0.000000e+00> : vector<16xf32>
    %406 = vector.multi_reduction <add>, %405, %cst_124 [1] : vector<16x16xf32> to vector<16xf32>
    %407 = vector.shape_cast %406 : vector<16xf32> to vector<16x1xf32>
    %408 = arith.truncf %405 : vector<16x16xf32> to vector<16x16xbf16>
    %cst_125 = arith.constant dense<0.000000e+00> : vector<16x8xf32>
    %409 = tpu.matmul %408, %398, %cst_125 {dimension_numbers = #tpu.dot_dimension_numbers<[1], [0], [0], [1], [0, 0, 1, 1], [], []>} : vector<16x16xbf16>, vector<16x8xbf16>, vector<16x8xf32> -> vector<16x8xf32>
    %410 = vector.broadcast %407 : vector<16x1xf32> to vector<16x8xf32>
    %411 = arith.divf %409, %410 : vector<16x8xf32>
    %412 = arith.truncf %411 : vector<16x8xf32> to vector<16x8xbf16>
    %413 = vector.extract_strided_slice %357 {offsets = [8, 0], sizes = [8, 32], strides = [1, 1]} : vector<32x32xbf16> to vector<8x32xbf16>
    %cst_126 = arith.constant dense<0.000000e+00> : vector<16x32xf32>
    %414 = tpu.matmul %412, %413, %cst_126 {dimension_numbers = #tpu.dot_dimension_numbers<[1], [0], [0], [1], [0, 0, 1, 1], [], []>} : vector<16x8xbf16>, vector<8x32xbf16>, vector<16x32xf32> -> vector<16x32xf32>
    %415 = arith.addf %392, %414 : vector<16x32xf32>
    %416 = vector.extract_strided_slice %370 {offsets = [0, 16], sizes = [16, 8], strides = [1, 1]} : vector<16x96xf32> to vector<16x8xf32>
    %417 = arith.truncf %416 : vector<16x8xf32> to vector<16x8xbf16>
    %418 = vector.extract_strided_slice %370 {offsets = [0, 48], sizes = [16, 8], strides = [1, 1]} : vector<16x96xf32> to vector<16x8xf32>
    %419 = arith.truncf %418 : vector<16x8xf32> to vector<16x8xbf16>
    %420 = vector.extract_strided_slice %370 {offsets = [0, 80], sizes = [16, 8], strides = [1, 1]} : vector<16x96xf32> to vector<16x8xf32>
    %421 = arith.truncf %420 : vector<16x8xf32> to vector<16x8xbf16>
    %cst_127 = arith.constant dense<0.000000e+00> : vector<16x16xf32>
    %422 = tpu.matmul %417, %419, %cst_127 {dimension_numbers = #tpu.dot_dimension_numbers<[1], [1], [0], [0], [0, 0, 1, 0], [], []>} : vector<16x8xbf16>, vector<16x8xbf16>, vector<16x16xf32> -> vector<16x16xf32>
    %423 = arith.addf %422, %24 : vector<16x16xf32>
    %cst_128 = arith.constant dense<0xFF800000> : vector<16xf32>
    %424 = vector.multi_reduction <maximumf>, %423, %cst_128 [1] : vector<16x16xf32> to vector<16xf32>
    %425 = vector.shape_cast %424 : vector<16xf32> to vector<16x1xf32>
    %426 = vector.broadcast %425 : vector<16x1xf32> to vector<16x16xf32>
    %427 = arith.subf %423, %426 : vector<16x16xf32>
    %428 = math.exp %427 : vector<16x16xf32>
    %cst_129 = arith.constant dense<0.000000e+00> : vector<16xf32>
    %429 = vector.multi_reduction <add>, %428, %cst_129 [1] : vector<16x16xf32> to vector<16xf32>
    %430 = vector.shape_cast %429 : vector<16xf32> to vector<16x1xf32>
    %431 = arith.truncf %428 : vector<16x16xf32> to vector<16x16xbf16>
    %cst_130 = arith.constant dense<0.000000e+00> : vector<16x8xf32>
    %432 = tpu.matmul %431, %421, %cst_130 {dimension_numbers = #tpu.dot_dimension_numbers<[1], [0], [0], [1], [0, 0, 1, 1], [], []>} : vector<16x16xbf16>, vector<16x8xbf16>, vector<16x8xf32> -> vector<16x8xf32>
    %433 = vector.broadcast %430 : vector<16x1xf32> to vector<16x8xf32>
    %434 = arith.divf %432, %433 : vector<16x8xf32>
    %435 = arith.truncf %434 : vector<16x8xf32> to vector<16x8xbf16>
    %436 = vector.extract_strided_slice %357 {offsets = [16, 0], sizes = [8, 32], strides = [1, 1]} : vector<32x32xbf16> to vector<8x32xbf16>
    %cst_131 = arith.constant dense<0.000000e+00> : vector<16x32xf32>
    %437 = tpu.matmul %435, %436, %cst_131 {dimension_numbers = #tpu.dot_dimension_numbers<[1], [0], [0], [1], [0, 0, 1, 1], [], []>} : vector<16x8xbf16>, vector<8x32xbf16>, vector<16x32xf32> -> vector<16x32xf32>
    %438 = arith.addf %415, %437 : vector<16x32xf32>
    %439 = vector.extract_strided_slice %370 {offsets = [0, 24], sizes = [16, 8], strides = [1, 1]} : vector<16x96xf32> to vector<16x8xf32>
    %440 = arith.truncf %439 : vector<16x8xf32> to vector<16x8xbf16>
    %441 = vector.extract_strided_slice %370 {offsets = [0, 56], sizes = [16, 8], strides = [1, 1]} : vector<16x96xf32> to vector<16x8xf32>
    %442 = arith.truncf %441 : vector<16x8xf32> to vector<16x8xbf16>
    %443 = vector.extract_strided_slice %370 {offsets = [0, 88], sizes = [16, 8], strides = [1, 1]} : vector<16x96xf32> to vector<16x8xf32>
    %444 = arith.truncf %443 : vector<16x8xf32> to vector<16x8xbf16>
    %cst_132 = arith.constant dense<0.000000e+00> : vector<16x16xf32>
    %445 = tpu.matmul %440, %442, %cst_132 {dimension_numbers = #tpu.dot_dimension_numbers<[1], [1], [0], [0], [0, 0, 1, 0], [], []>} : vector<16x8xbf16>, vector<16x8xbf16>, vector<16x16xf32> -> vector<16x16xf32>
    %446 = arith.addf %445, %24 : vector<16x16xf32>
    %cst_133 = arith.constant dense<0xFF800000> : vector<16xf32>
    %447 = vector.multi_reduction <maximumf>, %446, %cst_133 [1] : vector<16x16xf32> to vector<16xf32>
    %448 = vector.shape_cast %447 : vector<16xf32> to vector<16x1xf32>
    %449 = vector.broadcast %448 : vector<16x1xf32> to vector<16x16xf32>
    %450 = arith.subf %446, %449 : vector<16x16xf32>
    %451 = math.exp %450 : vector<16x16xf32>
    %cst_134 = arith.constant dense<0.000000e+00> : vector<16xf32>
    %452 = vector.multi_reduction <add>, %451, %cst_134 [1] : vector<16x16xf32> to vector<16xf32>
    %453 = vector.shape_cast %452 : vector<16xf32> to vector<16x1xf32>
    %454 = arith.truncf %451 : vector<16x16xf32> to vector<16x16xbf16>
    %cst_135 = arith.constant dense<0.000000e+00> : vector<16x8xf32>
    %455 = tpu.matmul %454, %444, %cst_135 {dimension_numbers = #tpu.dot_dimension_numbers<[1], [0], [0], [1], [0, 0, 1, 1], [], []>} : vector<16x16xbf16>, vector<16x8xbf16>, vector<16x8xf32> -> vector<16x8xf32>
    %456 = vector.broadcast %453 : vector<16x1xf32> to vector<16x8xf32>
    %457 = arith.divf %455, %456 : vector<16x8xf32>
    %458 = arith.truncf %457 : vector<16x8xf32> to vector<16x8xbf16>
    %459 = vector.extract_strided_slice %357 {offsets = [24, 0], sizes = [8, 32], strides = [1, 1]} : vector<32x32xbf16> to vector<8x32xbf16>
    %cst_136 = arith.constant dense<0.000000e+00> : vector<16x32xf32>
    %460 = tpu.matmul %458, %459, %cst_136 {dimension_numbers = #tpu.dot_dimension_numbers<[1], [0], [0], [1], [0, 0, 1, 1], [], []>} : vector<16x8xbf16>, vector<8x32xbf16>, vector<16x32xf32> -> vector<16x32xf32>
    %461 = arith.addf %438, %460 : vector<16x32xf32>
    %462 = vector.broadcast %358 : vector<1x32xf32> to vector<16x32xf32>
    %463 = arith.addf %461, %462 : vector<16x32xf32>
    %464 = arith.addf %354, %463 : vector<16x32xf32>
    %cst_137 = arith.constant dense<0.000000e+00> : vector<16xf32>
    %465 = vector.multi_reduction <add>, %464, %cst_137 [1] : vector<16x32xf32> to vector<16xf32>
    %466 = vector.shape_cast %465 : vector<16xf32> to vector<16x1xf32>
    %cst_138 = arith.constant 3.200000e+01 : f32
    %467 = vector.broadcast %cst_138 : f32 to vector<16x1xf32>
    %468 = arith.divf %466, %467 : vector<16x1xf32>
    %469 = vector.broadcast %468 : vector<16x1xf32> to vector<16x32xf32>
    %470 = arith.subf %464, %469 : vector<16x32xf32>
    %471 = arith.mulf %470, %470 : vector<16x32xf32>
    %cst_139 = arith.constant dense<0.000000e+00> : vector<16xf32>
    %472 = vector.multi_reduction <add>, %471, %cst_139 [1] : vector<16x32xf32> to vector<16xf32>
    %473 = vector.shape_cast %472 : vector<16xf32> to vector<16x1xf32>
    %cst_140 = arith.constant 3.200000e+01 : f32
    %474 = vector.broadcast %cst_140 : f32 to vector<16x1xf32>
    %475 = arith.divf %473, %474 : vector<16x1xf32>
    %476 = vector.broadcast %468 : vector<16x1xf32> to vector<16x32xf32>
    %477 = arith.subf %464, %476 : vector<16x32xf32>
    %cst_141 = arith.constant 9.99999974E-6 : f32
    %478 = vector.broadcast %cst_141 : f32 to vector<16x1xf32>
    %479 = arith.addf %475, %478 : vector<16x1xf32>
    %480 = math.rsqrt %479 : vector<16x1xf32>
    %481 = vector.broadcast %480 : vector<16x1xf32> to vector<16x32xf32>
    %482 = arith.mulf %477, %481 : vector<16x32xf32>
    %483 = vector.broadcast %359 : vector<1x32xf32> to vector<16x32xf32>
    %484 = arith.mulf %482, %483 : vector<16x32xf32>
    %485 = vector.broadcast %360 : vector<1x32xf32> to vector<16x32xf32>
    %486 = arith.addf %484, %485 : vector<16x32xf32>
    %487 = arith.truncf %486 : vector<16x32xf32> to vector<16x32xbf16>
    %cst_142 = arith.constant dense<0.000000e+00> : vector<16x2048xf32>
    %488 = tpu.matmul %487, %363, %cst_142 {dimension_numbers = #tpu.dot_dimension_numbers<[1], [0], [0], [1], [0, 0, 1, 1], [], []>} : vector<16x32xbf16>, vector<32x2048xbf16>, vector<16x2048xf32> -> vector<16x2048xf32>
    %489 = vector.broadcast %364 : vector<1x2048xf32> to vector<16x2048xf32>
    %490 = arith.addf %488, %489 : vector<16x2048xf32>
    %cst_143 = arith.constant 0.000000e+00 : f32
    %491 = vector.broadcast %cst_143 : f32 to vector<16x2048xf32>
    %492 = arith.maximumf %490, %491 : vector<16x2048xf32>
    %493 = arith.truncf %492 : vector<16x2048xf32> to vector<16x2048xbf16>
    %cst_144 = arith.constant dense<0.000000e+00> : vector<16x32xf32>
    %494 = tpu.matmul %493, %365, %cst_144 {dimension_numbers = #tpu.dot_dimension_numbers<[1], [1], [0], [0], [0, 0, 1, 0], [], []>} : vector<16x2048xbf16>, vector<32x2048xbf16>, vector<16x32xf32> -> vector<16x32xf32>
    %495 = vector.broadcast %366 : vector<1x32xf32> to vector<16x32xf32>
    %496 = arith.addf %494, %495 : vector<16x32xf32>
    %497 = arith.addf %486, %496 : vector<16x32xf32>
    %cst_145 = arith.constant dense<0.000000e+00> : vector<16xf32>
    %498 = vector.multi_reduction <add>, %497, %cst_145 [1] : vector<16x32xf32> to vector<16xf32>
    %499 = vector.shape_cast %498 : vector<16xf32> to vector<16x1xf32>
    %cst_146 = arith.constant 3.200000e+01 : f32
    %500 = vector.broadcast %cst_146 : f32 to vector<16x1xf32>
    %501 = arith.divf %499, %500 : vector<16x1xf32>
    %502 = vector.broadcast %501 : vector<16x1xf32> to vector<16x32xf32>
    %503 = arith.subf %497, %502 : vector<16x32xf32>
    %504 = arith.mulf %503, %503 : vector<16x32xf32>
    %cst_147 = arith.constant dense<0.000000e+00> : vector<16xf32>
    %505 = vector.multi_reduction <add>, %504, %cst_147 [1] : vector<16x32xf32> to vector<16xf32>
    %506 = vector.shape_cast %505 : vector<16xf32> to vector<16x1xf32>
    %cst_148 = arith.constant 3.200000e+01 : f32
    %507 = vector.broadcast %cst_148 : f32 to vector<16x1xf32>
    %508 = arith.divf %506, %507 : vector<16x1xf32>
    %509 = vector.broadcast %501 : vector<16x1xf32> to vector<16x32xf32>
    %510 = arith.subf %497, %509 : vector<16x32xf32>
    %cst_149 = arith.constant 9.99999974E-6 : f32
    %511 = vector.broadcast %cst_149 : f32 to vector<16x1xf32>
    %512 = arith.addf %508, %511 : vector<16x1xf32>
    %513 = math.rsqrt %512 : vector<16x1xf32>
    %514 = vector.broadcast %513 : vector<16x1xf32> to vector<16x32xf32>
    %515 = arith.mulf %510, %514 : vector<16x32xf32>
    %516 = vector.broadcast %361 : vector<1x32xf32> to vector<16x32xf32>
    %517 = arith.mulf %515, %516 : vector<16x32xf32>
    %518 = vector.broadcast %362 : vector<1x32xf32> to vector<16x32xf32>
    %519 = arith.addf %517, %518 : vector<16x32xf32>
    %c0_150 = arith.constant 0 : index
    %c13056 = arith.constant 13056 : index
    %520 = vector.load %arg2[%c0_150, %c13056] : memref<32x13184xbf16, #tpu.memory_space<vmem>>, vector<32x16xbf16>
    %c0_151 = arith.constant 0 : index
    %c8832_152 = arith.constant 8832 : index
    %521 = vector.load %arg3[%c0_151, %c8832_152] : memref<1x8960xf32, #tpu.memory_space<vmem>>, vector<1x16xf32>
    %522 = arith.truncf %519 : vector<16x32xf32> to vector<16x32xbf16>
    %cst_153 = arith.constant dense<0.000000e+00> : vector<16x16xf32>
    %523 = tpu.matmul %522, %520, %cst_153 {dimension_numbers = #tpu.dot_dimension_numbers<[1], [0], [0], [1], [0, 0, 1, 1], [], []>} : vector<16x32xbf16>, vector<32x16xbf16>, vector<16x16xf32> -> vector<16x16xf32>
    %524 = vector.broadcast %521 : vector<1x16xf32> to vector<16x16xf32>
    %525 = arith.addf %523, %524 : vector<16x16xf32>
    %526 = vector.shape_cast %525 : vector<16x16xf32> to vector<2x8x16xf32>
    %c0_154 = arith.constant 0 : index
    %c0_155 = arith.constant 0 : index
    %c0_156 = arith.constant 0 : index
    %527 = vector.load %arg4[%c0_154, %c0_155, %c0_156] : memref<2x8x16xf32, #tpu.memory_space<vmem>>, vector<2x8x16xf32>
    tpu.vector_store %arg4[%c0_154, %c0_155, %c0_156], %526 {strides = array<i32>} : memref<2x8x16xf32, #tpu.memory_space<vmem>>, vector<2x8x16xf32>,
    return
  }
}

</mosaic_0001>

<bundles_post_ra>
// kernel: minimal_transformer_forward.1
= control target key start
LH: loop header
LB: loop body
LE: loop exit
PB: predicated region body
PF: predicated region fallthrough
CT: control target
= control target key end

     0   :  { %9 = vsyncpa [#allocation3], 0  ;;  %s8280_s0 = inlined_call_operand.vmem [shape: s32[16,1], index: 0, kind: input, shape index: {}]   ;;  %s8281_s1 = inlined_call_operand.vmem [shape: f32[116,32], index: 1, kind: input, shape index: {}]   ;;  %s8282_s2 = inlined_call_operand.hbm [shape: bf16[32,13184], index: 2, kind: input, shape index: {}]   ;;  %s8283_s3 = inlined_call_operand.vmem [shape: f32[1,8960], index: 3, kind: input, shape index: {}]   ;;  %s8284_s4 = inlined_call_operand.hbm [shape: f32[2,8,16], index: 4, kind: output, shape index: {}]  }
   0x1   :  { %10 = vsyncpa [#allocation4], 0  ;;  %s7521_s15 = smov [#allocation2]   ;;  %s7473_s19 = scalar_lea.hbm %s8282_s2, 26368 }
   0x2   :  { %s20_s16 = sshll.u32 %s7521_s15, 4  ;;  %p7474_p0 = scmp.ne.s32.totalorder %s8282_s2, %s7473_s19  ;;  %s21_s16 = int_to_ptr.vmem [resolvable:$true] %s20_s16 }
   0x3   :  { %p7477_p1 = scmp.lt.u32.totalorder %s7473_s19, %s8282_s2 }
   0x5   :  { %p7479_p2 = pnand %p7477_p1, %p7474_p0 }
   0x7   :  { %7482 = shalt.err (!%p7479_p2)
}
   0x8   :  { %s7483_s24 = scalar_lea.vmem %s21_s16, 26368  ;;  %p7488_p4 = scmp.lt.s32.totalorder %s21_s16, %s21_s16 }
   0x9   :  { %p7484_p3 = scmp.ne.s32.totalorder %s21_s16, %s7483_s24  ;;  %p7489_p5 = scmp.lt.s32.totalorder %s7483_s24, %s7483_s24 }
   0xb   :  { %p7490_p6 = por %p7489_p5, %p7488_p4 }
   0xd   :  { %p7491_p7 = pnand %p7490_p6, %p7484_p3 }
   0xf   :  { %7494 = shalt.err (!%p7491_p7)
}
  0x10   :  { %s7522_s25 = smov 6592   ;;  %s7523_s26 = smov 412  }
  0x11   :  { %26 = dma.hbm_to_vmem [thread:$0]  %s8282_s2, 26368, %s21_s16, [#allocation3], %s7522_s25, %s7522_s25, %s7523_s26  }
  0x12   :  { %7517 = dma.done.wait [#allocation3], 26368  }
  0x13   :  { %7518 = vsyncadd [#allocation3], 4294940928  ;;  %v7524_v0 = vmov 0   ;;  %v33_v1 = vld [vmem:[%s8280_s0] sm:$0xff]  ;;  %v34_v2 = vld [vmem:[%s8280_s0 + $0x8] sm:$0xff]  ;;  %v7525_v6 = vmov 0.0   ;;  %v35_v8 = vlaneseq }
  0x14   :  { %7056 = vset.pattern.permute.xlu0 %v7524_v0  ;;  %v49_v3 = vld [vmem:[%s8281_s1] sm:$0xff]  ;;  %v50_v4 = vld [vmem:[%s8281_s1 + $0x8] sm:$0xff]  ;;  %6783 = vmatprep.subr.bf16.mxu1 %v7525_v6  ;;  %vm52_vm0 = vcmask 130048   ;;  %vm7526_vm3 = vmmov 0   ;;  %v51_v15 = vld [vmem:[%s8281_s1 + $0x10] sm:$0xff]  ;;  %vm251_vm4 = vcmask 261120  }
  0x15   :  { %38 = vperm.xlu0 %7056, %v33_v1   ;;  %v7031_v5 = vpack.c.bf16 %v50_v4, %v49_v3  ;;  %v7057_v7 = vld [vmem:[#allocation2] ss:$412 sps:$4 sm:$0xff]   ;;  %v36_v9 = vand.u32 127, %v35_v8  ;;  %v7058_v14 = vld [vmem:[#allocation2 + $0x338] ss:$412 sps:$4 sm:$0xff]   ;;  %6787 = vmatprep.mubr.msk.bf16.mxu1 %vm7526_vm3, %v7525_v6  ;;  %s7527_s1 = smov 120  }
  0x16   :  { %6784 = vmatpush3.bf16.msra.mxu1 %v7057_v7  ;;  %v6402_v21 = vld [vmem:[%s8283_s3] ss:$0 sm:$0xff]  ;;  %s7528_s13 = smov 96   ;;  %s7529_s14 = smov 88   ;;  %vm300_vm5 = vcmask 64512   ;;  %v7638_v34 = vshrl.u32 %v35_v8, 7 }
  0x17   :  { %7032 = vmatprep.subr.bf16.mxu0 %v7031_v5  ;;  %6785 = vmatprep.subr.bf16.mxu1 %v7525_v6  ;;  %v7530_v38 = vmov -1e+30   ;;  %s7531_s15 = smov 56   ;;  %s7532_s16 = smov 64   ;;  %vm544_vm14 = vcmask 1043456  }
  0x18   :  { %7034 = vmatpush3.bf16.msra.mxu0 %v7031_v5  ;;  %v136_v35 = vadd.s32 8, %v7638_v34  ;;  %v137_v37 = vsub.s32 %v7638_v34, %v36_v9  ;;  %s7533_s17 = smov 112   ;;  %s7534_s18 = smov 80  }
  0x19   :  { %41 = vperm.xlu0 %7056, %v34_v2   ;;  %6791 = vmatprep.subr.bf16.mxu0 %v7525_v6  ;;  %s7535_s19 = smov 72   ;;  %s7536_s20 = smov 48  }
  0x1a   :  { %6786 = vmatpush3.bf16.msra.mxu1 %v7058_v14  ;;  %v138_v36 = vsub.s32 %v136_v35, %v36_v9  ;;  %vm139_vm8 = vcmp.eq.s32.totalorder %v137_v37, 0  ;;  %vm143_vm9 = vcmp.eq.s32.totalorder %v137_v37, 4294967288  ;;  %s7537_s21 = smov 104   ;;  %s7538_s22 = smov 40  }
  0x1b   :  { %6797 = vmatprep.subr.bf16.mxu1 %v7525_v6  ;;  %vm147_vm12 = vmor %vm139_vm8, %vm143_vm9  ;;  %s7539_s30 = smov [#allocation5]  }
  0x1c   :  { %vm142_vm6 = vcmp.eq.s32.totalorder %v138_v36, 8  ;;  %vm144_vm7 = vcmp.eq.s32.totalorder %v138_v36, 4294967288  ;;  %vm140_vm10 = vcmp.eq.s32.totalorder %v138_v36, 0  ;;  %v7642_v39 = vsel %vm147_vm12, 0.0, %v7530_v38  ;;  %s6386_s5 = sshll.u32 %s7539_s30, 4  ;;  %s6387_s5 = int_to_ptr.vmem [resolvable:$true] %s6386_s5 }
  0x1d   :  { %vm146_vm11 = vmor %vm142_vm6, %vm144_vm7  ;;  %s7495_s6 = scalar_lea.vmem %s6387_s5, 256  ;;  %p7500_p9 = scmp.lt.s32.totalorder %s6387_s5, %s6387_s5 }
  0x1e   :  { %vm148_vm13 = vmor %vm140_vm10, %vm146_vm11  ;;  %p7496_p8 = scmp.ne.s32.totalorder %s6387_s5, %s7495_s6  ;;  %p7501_p10 = scmp.lt.s32.totalorder %s7495_s6, %s7495_s6 }
  0x1f   :  { %v7644_v40 = vsel %vm148_vm13, 0.0, %v7530_v38 }
  0x20   :  { %p7502_p11 = por %p7501_p10, %p7500_p9 }
  0x22   :  { %p7503_p12 = pnand %p7502_p11, %p7496_p8 }
  0x94   :  { %v39_v10 = vpop.permute.xlu0 %38 }
  0x95   :  { %vm43_vm1 = vcmp.eq.s32.totalorder %v39_v10, %v36_v9 }
  0x96   :  { %v6398_v11 = vsel %vm43_vm1, 1.0, %v7525_v6 }
  0x97   :  { %6780 = vmatprep.mubr.msk.f32.mxu0 %vm52_vm0, %v6398_v11 }
  0x98   :  { %v42_v12 = vpop.permute.xlu0 %41 }
  0x99   :  { %vm44_vm2 = vcmp.eq.s32.totalorder %v42_v12, %v36_v9 }
  0x9a   :  { %v6399_v13 = vsel %vm44_vm2, 1.0, %v7525_v6 }
  0x9b   :  { %6781 = vmatmul.mubr.msk.f32.vlgmr.msra.gmra.mrb[0].mxu0 %vm52_vm0, %v6399_v13 }
  0x9c   :  { %6793 = vmatprep.mubr.msk.bf16.mxu0 %vm7526_vm3, %v7525_v6 }
 0x16e   :  { %v6782_v16 = vpop.f32.mrb[0].mxu0 }
 0x16f   :  { %v7607_v17 = vadd.f32 %v6782_v16, %v51_v15  ;;  %v125_v18 = vpop.f32.mrb[1].mxu0 }
 0x170   :  { %v7609_v19 = vadd.f32 %v125_v18, %v51_v15 }
 0x172   :  { %v232_v20 = vpack.c.bf16 %v7607_v17, %v7609_v19 }
 0x174   :  { %6788 = vmatmul.mubr.msk.bf16.vlgmr.msra.gmra.mrb[0].mxu1 %vm251_vm4, %v232_v20 }
 0x175   :  { %6799 = vmatprep.mubr.msk.bf16.mxu1 %vm7526_vm3, %v7525_v6 }
 0x247   :  { %v289_v22 = vpop.f32.mrb[0].mxu1 }
 0x248   :  { %v6789_v23 = vpop.f32.mrb[1].mxu1  ;;  %v290_v25 = vadd.f32 %v6402_v21, %v289_v22 }
 0x249   :  { %v292_v24 = vpop.f32.mrb[2].mxu1  ;;  %v157_v23 = vld [vmem:[#allocation2 + $0x1a0] sm:$0xf] }
 0x24a   :  { %v293_v26 = vadd.f32 %v6402_v21, %v292_v24  ;;  %v6790_v27 = vpop.f32.mrb[3].mxu1  ;;  %v156_v21 = vld [vmem:[#allocation2 + $0x4] sm:$0xf]  ;;  %v546_v24 = vsel %vm544_vm14, %v157_v23, 0 }
 0x24b   :  { %v593_v22 = vsel %vm544_vm14, %v156_v21, 0 }
 0x24c   :  { %v7619_v28 = vpack.c.bf16 %v293_v26, %v290_v25 }
 0x24e   :  { %419 = vrot.lane.b32.xlu0 %v7619_v28, %s7527_s1  ;;  %298 = vrot.lane.b32.xlu1 %v7619_v28, %s7528_s13 }
 0x252   :  { %421 = vrot.lane.b32.xlu1 %v7619_v28, %s7529_s14 }
 0x2c0   :  { %v299_v29 = vpop.permute.xlu1 %298  ;;  %v420_v33 = vpop.permute.xlu0 %419 }
 0x2c1   :  { %v305_v30 = vsel %vm300_vm5, %v299_v29, 0 }
 0x2c2   :  { %6792 = vmatpush3.bf16.xpose.msra.mxu0 %v305_v30 }
 0x2c3   :  { %6803 = vmatprep.subr.bf16.mxu0 %v7525_v6 }
 0x2c4   :  { %v422_v31 = vpop.permute.xlu1 %421 }
 0x2c5   :  { %v427_v32 = vsel %vm300_vm5, %v422_v31, 0 }
 0x2c9   :  { %6794 = vmatmul.mubr.msk.bf16.vlgmr.msra.gmra.mrb[4].mxu0 %vm300_vm5, %v7619_v28 }
 0x2ca   :  { %6804 = vmatpush3.bf16.xpose.msra.mxu0 %v427_v32  ;;  %6805 = vmatprep.mubr.msk.bf16.mxu0 %vm7526_vm3, %v7525_v6 }
 0x2cb   :  { %6815 = vmatprep.subr.bf16.mxu0 %v7525_v6 }
 0x2d1   :  { %6806 = vmatmul.mubr.msk.bf16.vlgmr.msra.gmra.mrb[8].mxu0 %vm300_vm5, %v420_v33 }
 0x2d2   :  { %6817 = vmatprep.mubr.msk.bf16.mxu0 %vm7526_vm3, %v7525_v6  ;;  %6816 = vmatpush3.bf16.msra.mxu0 %v546_v24 }
 0x2d3   :  { %6827 = vmatprep.subr.bf16.mxu0 %v7525_v6 }
 0x39c   :  { %v341_v41 = vpop.f32.mrb[4].mxu0 }
 0x39d   :  { %v342_v42 = vadd.f32 %v341_v41, %v7642_v39  ;;  %v6795_v43 = vpop.f32.mrb[5].mxu0 }
 0x39e   :  { %v344_v44 = vpop.f32.mrb[6].mxu0 }
 0x39f   :  { %v345_v45 = vadd.f32 %v344_v44, %v7644_v40  ;;  %v6796_v46 = vpop.f32.mrb[7].mxu0  ;;  %v348_v47 = vsel %vm52_vm0, %v342_v42, -inf }
 0x3a0   :  { %349 = vmax.xlane.f32.xlu1 %v348_v47 }
 0x3a1   :  { %v351_v48 = vsel %vm52_vm0, %v345_v45, -inf }
 0x3a2   :  { %352 = vmax.xlane.f32.xlu0 %v351_v48 }
 0x3a4   :  { %v463_v49 = vpop.f32.mrb[8].mxu0 }
 0x3a5   :  { %v464_v50 = vadd.f32 %v463_v49, %v7642_v39  ;;  %v6807_v51 = vpop.f32.mrb[9].mxu0 }
 0x3a6   :  { %v466_v52 = vpop.f32.mrb[10].mxu0 }
 0x3a7   :  { %v467_v53 = vadd.f32 %v466_v52, %v7644_v40  ;;  %v6808_v54 = vpop.f32.mrb[11].mxu0  ;;  %v470_v55 = vsel %vm52_vm0, %v464_v50, -inf }
 0x3a8   :  { %471 = vmax.xlane.f32.xlu0 %v470_v55 }
 0x3a9   :  { %v473_v56 = vsel %vm52_vm0, %v467_v53, -inf }
 0x3aa   :  { %474 = vmax.xlane.f32.xlu1 %v473_v56 }
 0x3bb   :  { %489 = vrot.lane.b32.xlu1 %v7619_v28, %s7531_s15 }
 0x3be   :  { %367 = vrot.lane.b32.xlu0 %v7619_v28, %s7532_s16 }
 0x42d   :  { %v350_v57 = vpop.xlane.xlu1 %349 }
 0x42e   :  { %v354_v58 = vsub.f32 %v342_v42, %v350_v57 }
 0x42f   :  { %v353_v59 = vpop.xlane.xlu0 %352 }
 0x430   :  { %v356_v60 = vmul.f32 1.442695, %v354_v58  ;;  %v355_v61 = vsub.f32 %v345_v45, %v353_v59 }
 0x432   :  { %v358_v62 = vmul.f32 1.442695, %v355_v61  ;;  %7353 = vpow2.f32 %v356_v60 }
 0x434   :  { %7355 = vpow2.f32 %v358_v62 }
 0x435   :  { %v472_v63 = vpop.xlane.xlu0 %471 }
 0x436   :  { %v476_v1 = vsub.f32 %v464_v50, %v472_v63 }
 0x437   :  { %v475_v2 = vpop.xlane.xlu1 %474 }
 0x438   :  { %v478_v3 = vmul.f32 1.442695, %v476_v1  ;;  %v477_v4 = vsub.f32 %v467_v53, %v475_v2 }
 0x439   :  { %v368_v5 = vpop.permute.xlu0 %367 }
 0x43a   :  { %7357 = vpow2.f32 %v478_v3  ;;  %v480_v7 = vmul.f32 1.442695, %v477_v4  ;;  %6798 = vmatpush3.bf16.msra.mxu1 %v368_v5 }
 0x43b   :  { %6809 = vmatprep.subr.bf16.mxu1 %v7525_v6  ;;  %v490_v11 = vpop.permute.xlu1 %489 }
 0x43c   :  { %7359 = vpow2.f32 %v480_v7  ;;  %v7354_v8 = vpop.eup %7353 }
 0x43d   :  { %v360_v18 = vsel %vm52_vm0, %v7354_v8, 0.0 }
 0x43e   :  { %v7356_v9 = vpop.eup %7355 }
 0x43f   :  { %v366_v10 = vpack.c.bf16 %v7356_v9, %v7354_v8  ;;  %v363_v20 = vsel %vm52_vm0, %v7356_v9, 0.0 }
 0x441   :  { %6800 = vmatmul.mubr.msk.bf16.vlgmr.msra.gmra.mrb[4].mxu1 %vm52_vm0, %v366_v10 }
 0x442   :  { %6810 = vmatpush3.bf16.msra.mxu1 %v490_v11  ;;  %6811 = vmatprep.mubr.msk.bf16.mxu1 %vm7526_vm3, %v7525_v6 }
 0x443   :  { %6821 = vmatprep.subr.bf16.mxu1 %v7525_v6 }
 0x444   :  { %v7358_v12 = vpop.eup %7357 }
 0x445   :  { %v482_v13 = vsel %vm52_vm0, %v7358_v12, 0.0 }
 0x446   :  { %v7360_v14 = vpop.eup %7359  ;;  %483 = vadd.xlane.f32.xlu1 %v482_v13 }
 0x447   :  { %v485_v15 = vsel %vm52_vm0, %v7360_v14, 0.0  ;;  %v488_v16 = vpack.c.bf16 %v7360_v14, %v7358_v12 }
 0x448   :  { %486 = vadd.xlane.f32.xlu0 %v485_v15 }
 0x449   :  { %6812 = vmatmul.mubr.msk.bf16.vlgmr.msra.gmra.mrb[8].mxu1 %vm52_vm0, %v488_v16 }
 0x44a   :  { %6823 = vmatprep.mubr.msk.bf16.mxu1 %vm7526_vm3, %v7525_v6  ;;  %6822 = vmatpush3.bf16.msra.mxu1 %v593_v22 }
 0x44b   :  { %6833 = vmatprep.subr.bf16.mxu1 %v7525_v6 }
 0x457   :  { %636 = vrot.lane.b32.xlu1 %v7619_v28, %s7533_s17 }
 0x45e   :  { %638 = vrot.lane.b32.xlu0 %v7619_v28, %s7534_s18 }
 0x47b   :  { %361 = vadd.xlane.f32.xlu1 %v360_v18 }
 0x47d   :  { %364 = vadd.xlane.f32.xlu0 %v363_v20 }
 0x4d3   :  { %v484_v25 = vpop.xlane.xlu1 %483 }
 0x4d5   :  { %v487_v26 = vpop.xlane.xlu0 %486 }
 0x4d7   :  { %v637_v27 = vpop.permute.xlu1 %636 }
 0x4d9   :  { %v639_v29 = vpop.permute.xlu0 %638 }
 0x4da   :  { %v644_v53 = vsel %vm300_vm5, %v639_v29, 0 }
 0x508   :  { %v362_v30 = vpop.xlane.xlu1 %361 }
 0x509   :  { %7361 = vrcp.f32 %v362_v30 }
 0x50a   :  { %v365_v31 = vpop.xlane.xlu0 %364 }
 0x50b   :  { %7363 = vrcp.f32 %v365_v31 }
 0x50c   :  { %7365 = vrcp.f32 %v484_v25 }
 0x50d   :  { %7367 = vrcp.f32 %v487_v26 }
 0x513   :  { %v7362_v32 = vpop.eup %7361 }
 0x514   :  { %v407_v33 = vpop.f32.mrb[4].mxu1 }
 0x515   :  { %v7364_v35 = vpop.eup %7363  ;;  %v6801_v36 = vpop.f32.mrb[5].mxu1  ;;  %v415_v38 = vmul.f32 %v7362_v32, %v407_v33 }
 0x516   :  { %v410_v37 = vpop.f32.mrb[6].mxu1  ;;  %v7366_v45 = vpop.eup %7365 }
 0x517   :  { %v417_v41 = vmul.f32 %v7364_v35, %v410_v37  ;;  %v6802_v42 = vpop.f32.mrb[7].mxu1  ;;  %v7368_v47 = vpop.eup %7367 }
 0x519   :  { %v418_v43 = vpack.c.bf16 %v417_v41, %v415_v38 }
 0x51b   :  { %6824 = vmatmul.mubr.msk.bf16.vlgmr.msra.gmra.mrb[12].mxu1 %vm300_vm5, %v418_v43 }
 0x51c   :  { %v529_v44 = vpop.f32.mrb[8].mxu1  ;;  %6835 = vmatprep.mubr.msk.bf16.mxu1 %vm7526_vm3, %v7525_v6 }
 0x51d   :  { %v6813_v46 = vpop.f32.mrb[9].mxu1  ;;  %v537_v49 = vmul.f32 %v7366_v45, %v529_v44 }
 0x51e   :  { %v532_v48 = vpop.f32.mrb[10].mxu1 }
 0x51f   :  { %v539_v50 = vmul.f32 %v7368_v47, %v532_v48  ;;  %v6814_v51 = vpop.f32.mrb[11].mxu1 }
 0x521   :  { %v540_v52 = vpack.c.bf16 %v539_v50, %v537_v49 }
 0x523   :  { %6818 = vmatmul.mubr.msk.bf16.vlgmr.msra.gmra.mrb[12].mxu0 %vm300_vm5, %v540_v52 }
 0x524   :  { %6828 = vmatpush3.bf16.xpose.msra.mxu0 %v644_v53  ;;  %6829 = vmatprep.mubr.msk.bf16.mxu0 %vm7526_vm3, %v7525_v6 }
 0x525   :  { %6839 = vmatprep.subr.bf16.mxu0 %v7525_v6 }
 0x52b   :  { %6830 = vmatmul.mubr.msk.bf16.vlgmr.msra.gmra.mrb[16].mxu0 %vm300_vm5, %v637_v27  ;;  %v158_v27 = vld [vmem:[#allocation2 + $0x33c] sm:$0xf] }
 0x52c   :  { %6841 = vmatprep.mubr.msk.bf16.mxu0 %vm7526_vm3, %v7525_v6  ;;  %v762_v29 = vsel %vm544_vm14, %v158_v27, 0 }
 0x52d   :  { %6840 = vmatpush3.bf16.msra.mxu0 %v762_v29 }
 0x52e   :  { %6851 = vmatprep.subr.bf16.mxu0 %v7525_v6 }
 0x5ee   :  { %v629_v54 = vpop.f32.mrb[12].mxu1 }
 0x5ef   :  { %v6825_v55 = vpop.f32.mrb[13].mxu1 }
 0x5f0   :  { %v632_v56 = vpop.f32.mrb[14].mxu1 }
 0x5f1   :  { %v6826_v57 = vpop.f32.mrb[15].mxu1 }
 0x5f6   :  { %v582_v58 = vpop.f32.mrb[12].mxu0 }
 0x5f7   :  { %v7689_v59 = vadd.f32 %v629_v54, %v582_v58  ;;  %v6819_v60 = vpop.f32.mrb[13].mxu0 }
 0x5f8   :  { %v585_v61 = vpop.f32.mrb[14].mxu0 }
 0x5f9   :  { %v7691_v62 = vadd.f32 %v632_v56, %v585_v61  ;;  %v6820_v63 = vpop.f32.mrb[15].mxu0 }
 0x5fe   :  { %v680_v1 = vpop.f32.mrb[16].mxu0 }
 0x5ff   :  { %v681_v2 = vadd.f32 %v680_v1, %v7642_v39  ;;  %v6831_v3 = vpop.f32.mrb[17].mxu0 }
 0x600   :  { %v683_v4 = vpop.f32.mrb[18].mxu0 }
 0x601   :  { %v684_v5 = vadd.f32 %v683_v4, %v7644_v40  ;;  %v6832_v7 = vpop.f32.mrb[19].mxu0  ;;  %v687_v8 = vsel %vm52_vm0, %v681_v2, -inf }
 0x602   :  { %688 = vmax.xlane.f32.xlu0 %v687_v8 }
 0x603   :  { %v690_v9 = vsel %vm52_vm0, %v684_v5, -inf }
 0x604   :  { %691 = vmax.xlane.f32.xlu1 %v690_v9  ;;  %v159_v9 = vld [vmem:[#allocation2 + $0x4d8] sm:$0xf] }
 0x615   :  { %809 = vrot.lane.b32.xlu1 %v7619_v28, %s7535_s19 }
 0x618   :  { %706 = vrot.lane.b32.xlu0 %v7619_v28, %s7536_s20 }
 0x619   :  { %807 = vrot.lane.b32.xlu1 %v7619_v28, %s7537_s21 }
 0x68f   :  { %v689_v10 = vpop.xlane.xlu0 %688 }
 0x690   :  { %v693_v11 = vsub.f32 %v681_v2, %v689_v10  ;;  %v933_v10 = vsel %vm544_vm14, %v159_v9, 0 }
 0x691   :  { %v692_v12 = vpop.xlane.xlu1 %691 }
 0x692   :  { %v695_v13 = vmul.f32 1.442695, %v693_v11  ;;  %v694_v14 = vsub.f32 %v684_v5, %v692_v12 }
 0x693   :  { %v707_v15 = vpop.permute.xlu0 %706 }
 0x694   :  { %7369 = vpow2.f32 %v695_v13  ;;  %v697_v16 = vmul.f32 1.442695, %v694_v14  ;;  %6834 = vmatpush3.bf16.msra.mxu1 %v707_v15 }
 0x695   :  { %6845 = vmatprep.subr.bf16.mxu1 %v7525_v6  ;;  %v810_v22 = vpop.permute.xlu1 %809 }
 0x696   :  { %7371 = vpow2.f32 %v697_v16  ;;  %v815_v25 = vsel %vm300_vm5, %v810_v22, 0 }
 0x699   :  { %v808_v26 = vpop.permute.xlu1 %807 }
 0x69e   :  { %v7370_v18 = vpop.eup %7369 }
 0x69f   :  { %v699_v20 = vsel %vm52_vm0, %v7370_v18, 0.0 }
 0x6a0   :  { %v7372_v21 = vpop.eup %7371  ;;  %700 = vadd.xlane.f32.xlu0 %v699_v20 }
 0x6a1   :  { %v702_v23 = vsel %vm52_vm0, %v7372_v21, 0.0  ;;  %v705_v24 = vpack.c.bf16 %v7372_v21, %v7370_v18 }
 0x6a2   :  { %703 = vadd.xlane.f32.xlu1 %v702_v23 }
 0x6a3   :  { %6836 = vmatmul.mubr.msk.bf16.vlgmr.msra.gmra.mrb[16].mxu1 %vm52_vm0, %v705_v24 }
 0x6a4   :  { %6846 = vmatpush3.bf16.xpose.msra.mxu1 %v815_v25  ;;  %6847 = vmatprep.mubr.msk.bf16.mxu1 %vm7526_vm3, %v7525_v6 }
 0x6a5   :  { %6857 = vmatprep.subr.bf16.mxu1 %v7525_v6 }
 0x6ab   :  { %6848 = vmatmul.mubr.msk.bf16.vlgmr.msra.gmra.mrb[20].mxu1 %vm300_vm5, %v808_v26 }
 0x6ac   :  { %6859 = vmatprep.mubr.msk.bf16.mxu1 %vm7526_vm3, %v7525_v6  ;;  %6858 = vmatpush3.bf16.msra.mxu1 %v933_v10 }
 0x6b3   :  { %877 = vrot.lane.b32.xlu1 %v7619_v28, %s7538_s22 }
 0x72d   :  { %v701_v30 = vpop.xlane.xlu0 %700 }
 0x72e   :  { %7373 = vrcp.f32 %v701_v30 }
 0x72f   :  { %v704_v31 = vpop.xlane.xlu1 %703 }
 0x730   :  { %7375 = vrcp.f32 %v704_v31 }
 0x733   :  { %v878_v28 = vpop.permute.xlu1 %877 }
 0x738   :  { %v7374_v33 = vpop.eup %7373 }
 0x73a   :  { %v7376_v36 = vpop.eup %7375 }
 0x776   :  { %v746_v32 = vpop.f32.mrb[16].mxu1 }
 0x777   :  { %v6837_v35 = vpop.f32.mrb[17].mxu1  ;;  %v754_v38 = vmul.f32 %v7374_v33, %v746_v32 }
 0x778   :  { %v749_v37 = vpop.f32.mrb[18].mxu1 }
 0x779   :  { %v756_v41 = vmul.f32 %v7376_v36, %v749_v37  ;;  %v6838_v42 = vpop.f32.mrb[19].mxu1 }
 0x77b   :  { %v757_v43 = vpack.c.bf16 %v756_v41, %v754_v38 }
 0x77d   :  { %6842 = vmatmul.mubr.msk.bf16.vlgmr.msra.gmra.mrb[20].mxu0 %vm300_vm5, %v757_v43 }
 0x77e   :  { %6852 = vmatpush3.bf16.msra.mxu0 %v878_v28  ;;  %v851_v44 = vpop.f32.mrb[20].mxu1  ;;  %6853 = vmatprep.mubr.msk.bf16.mxu0 %vm7526_vm3, %v7525_v6 }
 0x77f   :  { %v852_v45 = vadd.f32 %v851_v44, %v7642_v39  ;;  %v6849_v46 = vpop.f32.mrb[21].mxu1 }
 0x780   :  { %v854_v47 = vpop.f32.mrb[22].mxu1 }
 0x781   :  { %v855_v48 = vadd.f32 %v854_v47, %v7644_v40  ;;  %v6850_v49 = vpop.f32.mrb[23].mxu1  ;;  %v858_v50 = vsel %vm52_vm0, %v852_v45, -inf  ;;  %v7061_v47 = vld [vmem:[#allocation2 + $0xc] ss:$412 sps:$4 sm:$0xff]  }
 0x782   :  { %859 = vmax.xlane.f32.xlu0 %v858_v50  ;;  %v7062_v49 = vld [vmem:[#allocation2 + $0x10] ss:$412 sps:$4 sm:$0xff]   ;;  %1277 = vmatprep.subr.bf16.mxu0 %v7061_v47  ;;  %v7067_v50 = vld [vmem:[#allocation2 + $0x344] ss:$412 sps:$4 sm:$0xff]   ;;  %v7770_v47 = vsub.s32 0, %v7638_v34 }
 0x783   :  { %v861_v51 = vsel %vm52_vm0, %v855_v48, -inf }
 0x786   :  { %862 = vmax.xlane.f32.xlu0 %v861_v51  ;;  %v7070_v51 = vld [vmem:[#allocation2 + $0x34c] ss:$412 sps:$4 sm:$0xff]  }
 0x80f   :  { %v860_v52 = vpop.xlane.xlu0 %859 }
 0x810   :  { %v864_v53 = vsub.f32 %v852_v45, %v860_v52  ;;  %v7065_v52 = vld [vmem:[#allocation2 + $0x340] ss:$412 sps:$4 sm:$0xff]  }
 0x812   :  { %v866_v54 = vmul.f32 1.442695, %v864_v53  ;;  %v7068_v53 = vld [vmem:[#allocation2 + $0x348] ss:$412 sps:$4 sm:$0xff]  }
 0x813   :  { %v863_v55 = vpop.xlane.xlu0 %862 }
 0x814   :  { %7377 = vpow2.f32 %v866_v54  ;;  %v865_v56 = vsub.f32 %v855_v48, %v863_v55  ;;  %v7059_v48 = vld [vmem:[#allocation2 + $0x8] ss:$412 sps:$4 sm:$0xff]   ;;  %v7073_v54 = vld [vmem:[#allocation2 + $0x1c] ss:$412 sps:$4 sm:$0xff]  }
 0x815   :  { %v7076_v55 = vld [vmem:[#allocation2 + $0x24] ss:$412 sps:$4 sm:$0xff]  }
 0x816   :  { %v868_v57 = vmul.f32 1.442695, %v865_v56 }
 0x818   :  { %7379 = vpow2.f32 %v868_v57 }
 0x81e   :  { %v7378_v58 = vpop.eup %7377 }
 0x81f   :  { %v870_v60 = vsel %vm52_vm0, %v7378_v58, 0.0 }
 0x820   :  { %871 = vadd.xlane.f32.xlu0 %v870_v60 }
 0x822   :  { %v7380_v61 = vpop.eup %7379 }
 0x823   :  { %v873_v63 = vsel %vm52_vm0, %v7380_v61, 0.0  ;;  %v876_v1 = vpack.c.bf16 %v7380_v61, %v7378_v58 }
 0x824   :  { %874 = vadd.xlane.f32.xlu0 %v873_v63 }
 0x825   :  { %6854 = vmatmul.mubr.msk.bf16.vlgmr.msra.gmra.mrb[24].mxu0 %vm52_vm0, %v876_v1 }
 0x826   :  { %1309 = vmatprep.mubr.bf16.mxu0 %v7524_v0  ;;  %1278 = vmatpush1.bf16.msra.mxu0 %v7059_v48  ;;  %v197_v48 = vld [vmem:[%s8283_s3 + $0x6] sm:$0xff] }
 0x827   :  { %1279 = vmatprep.subr.bf16.mxu0 %v7067_v50  ;;  %v7782_v50 = vsub.s32 3, %v7638_v34 }
 0x82a   :  { %1280 = vmatpush1.bf16.msra.mxu0 %v7065_v52 }
 0x82b   :  { %1363 = vmatprep.subr.bf16.mxu0 %v7073_v54  ;;  %v1049_v54 = vrot.slane %v197_v48, %v7782_v50 }
 0x850   :  { %v798_v2 = vpop.f32.mrb[20].mxu0 }
 0x851   :  { %v805_v3 = vadd.f32 %v798_v2, %v7689_v59  ;;  %v6843_v4 = vpop.f32.mrb[21].mxu0 }
 0x852   :  { %v801_v5 = vpop.f32.mrb[22].mxu0 }
 0x853   :  { %v806_v7 = vadd.f32 %v801_v5, %v7691_v62  ;;  %v6844_v8 = vpop.f32.mrb[23].mxu0  ;;  %v6418_v62 = vld [vmem:[%s8283_s3 + $0x1] ss:$0 sm:$0xff] }
 0x854   :  { %v6420_v8 = vld [vmem:[%s8283_s3 + $0x3] ss:$0 sm:$0xff] }
 0x8ad   :  { %v872_v11 = vpop.xlane.xlu0 %871 }
 0x8ae   :  { %7381 = vrcp.f32 %v872_v11 }
 0x8b1   :  { %v875_v12 = vpop.xlane.xlu0 %874 }
 0x8b2   :  { %7383 = vrcp.f32 %v875_v12  ;;  %v7071_v12 = vld [vmem:[#allocation2 + $0x18] ss:$412 sps:$4 sm:$0xff]  }
 0x8b8   :  { %v7382_v14 = vpop.eup %7381 }
 0x8bc   :  { %v7384_v16 = vpop.eup %7383 }
 0x8f8   :  { %v917_v13 = vpop.f32.mrb[24].mxu0 }
 0x8f9   :  { %v6855_v15 = vpop.f32.mrb[25].mxu0  ;;  %v925_v20 = vmul.f32 %v7382_v14, %v917_v13  ;;  %v7074_v13 = vld [vmem:[#allocation2 + $0x20] ss:$412 sps:$4 sm:$0xff]  }
 0x8fa   :  { %v920_v18 = vpop.f32.mrb[26].mxu0  ;;  %v7079_v15 = vld [vmem:[#allocation2 + $0x354] ss:$412 sps:$4 sm:$0xff]  }
 0x8fb   :  { %v927_v59 = vmul.f32 %v7384_v16, %v920_v18  ;;  %v6856_v21 = vpop.f32.mrb[27].mxu0  ;;  %v7082_v16 = vld [vmem:[#allocation2 + $0x35c] ss:$412 sps:$4 sm:$0xff]   ;;  %v7077_v18 = vld [vmem:[#allocation2 + $0x350] ss:$412 sps:$4 sm:$0xff]  }
 0x8fc   :  { %v7088_v21 = vld [vmem:[#allocation2 + $0x34] ss:$412 sps:$4 sm:$0xff]  }
 0x8fd   :  { %v928_v22 = vpack.c.bf16 %v927_v59, %v925_v20  ;;  %v7080_v20 = vld [vmem:[#allocation2 + $0x358] ss:$412 sps:$4 sm:$0xff]   ;;  %v7085_v59 = vld [vmem:[#allocation2 + $0x2c] ss:$412 sps:$4 sm:$0xff]  }
 0x8ff   :  { %6860 = vmatmul.mubr.msk.bf16.vlgmr.msra.gmra.mrb[24].mxu1 %vm300_vm5, %v928_v22  ;;  %v7083_v22 = vld [vmem:[#allocation2 + $0x28] ss:$412 sps:$4 sm:$0xff]  }
 0x900   :  { %1352 = vmatprep.mubr.bf16.mxu1 %v7524_v0 }
 0x9d2   :  { %v969_v23 = vpop.f32.mrb[24].mxu1 }
 0x9d3   :  { %v976_v24 = vadd.f32 %v969_v23, %v805_v3  ;;  %v6861_v25 = vpop.f32.mrb[25].mxu1  ;;  %v6419_v3 = vld [vmem:[%s8283_s3 + $0x2] ss:$0 sm:$0xff]  ;;  %v7091_v23 = vld [vmem:[#allocation2 + $0x364] ss:$412 sps:$4 sm:$0xff]  }
 0x9d4   :  { %v972_v26 = vpop.f32.mrb[26].mxu1  ;;  %v7089_v25 = vld [vmem:[#allocation2 + $0x360] ss:$412 sps:$4 sm:$0xff]  }
 0x9d5   :  { %v984_v27 = vadd.f32 %v6418_v62, %v976_v24  ;;  %v977_v29 = vadd.f32 %v972_v26, %v806_v7  ;;  %v6862_v30 = vpop.f32.mrb[27].mxu1  ;;  %v7094_v24 = vld [vmem:[#allocation2 + $0x36c] ss:$412 sps:$4 sm:$0xff]  }
 0x9d6   :  { %v7092_v26 = vld [vmem:[#allocation2 + $0x368] ss:$412 sps:$4 sm:$0xff]   ;;  %v7095_v30 = vld [vmem:[#allocation2 + $0x38] ss:$412 sps:$4 sm:$0xff]  }
 0x9d7   :  { %v985_v31 = vadd.f32 %v6418_v62, %v977_v29  ;;  %v986_v32 = vadd.f32 %v984_v27, %v7609_v19  ;;  %v7086_v62 = vld [vmem:[#allocation2 + $0x30] ss:$412 sps:$4 sm:$0xff]   ;;  %v7097_v27 = vld [vmem:[#allocation2 + $0x3c] ss:$412 sps:$4 sm:$0xff]   ;;  %v7100_v29 = vld [vmem:[#allocation2 + $0x44] ss:$412 sps:$4 sm:$0xff]  }
 0x9d9   :  { %v988_v33 = vsel %vm251_vm4, %v986_v32, 0.0  ;;  %v987_v35 = vadd.f32 %v985_v31, %v7607_v17  ;;  %v7064_v17 = vld [vmem:[#allocation2 + $0x14] ss:$412 sps:$4 sm:$0xff]   ;;  %v7098_v31 = vld [vmem:[#allocation2 + $0x40] ss:$412 sps:$4 sm:$0xff]  }
 0x9da   :  { %989 = vadd.xlane.f32.xlu0 %v988_v33  ;;  %1320 = vmatprep.subr.bf16.mxu1 %v7064_v17  ;;  %v7106_v33 = vld [vmem:[#allocation2 + $0x37c] ss:$412 sps:$4 sm:$0xff]   ;;  %v7773_v17 = vsub.s32 2, %v7638_v34 }
 0x9db   :  { %v991_v36 = vsel %vm251_vm4, %v987_v35, 0.0  ;;  %1321 = vmatpush1.bf16.msra.mxu1 %v7062_v49  ;;  %v7779_v49 = vsub.s32 1, %v7638_v34 }
 0x9dc   :  { %1322 = vmatprep.subr.bf16.mxu1 %v7070_v51  ;;  %v1037_v51 = vrot.slane %v197_v48, %v7770_v47  ;;  %v1045_v52 = vrot.slane %v197_v48, %v7773_v17 }
 0x9de   :  { %992 = vadd.xlane.f32.xlu0 %v991_v36  ;;  %v7104_v36 = vld [vmem:[#allocation2 + $0x378] ss:$412 sps:$4 sm:$0xff]  }
 0x9df   :  { %1323 = vmatpush1.bf16.msra.mxu1 %v7068_v53  ;;  %v1041_v53 = vrot.slane %v197_v48, %v7779_v49 }
 0x9e0   :  { %1406 = vmatprep.subr.bf16.mxu1 %v7076_v55  ;;  %v7789_v55 = vsub.s32 4, %v7638_v34 }
 0xa67   :  { %v990_v37 = vpop.xlane.xlu0 %989 }
 0xa68   :  { %v995_v38 = vmul.f32 0.03125, %v990_v37  ;;  %v7109_v37 = vld [vmem:[#allocation2 + $0x4c] ss:$412 sps:$4 sm:$0xff]  }
 0xa6a   :  { %v997_v41 = vsub.f32 %v986_v32, %v995_v38  ;;  %v7103_v32 = vld [vmem:[#allocation2 + $0x374] ss:$412 sps:$4 sm:$0xff]  }
 0xa6b   :  { %v993_v42 = vpop.xlane.xlu0 %992  ;;  %v7112_v38 = vld [vmem:[#allocation2 + $0x54] ss:$412 sps:$4 sm:$0xff]  }
 0xa6c   :  { %v996_v43 = vmul.f32 0.03125, %v993_v42  ;;  %v999_v28 = vmul.f32 %v997_v41, %v997_v41  ;;  %v7110_v42 = vld [vmem:[#allocation2 + $0x50] ss:$412 sps:$4 sm:$0xff]  }
 0xa6e   :  { %v998_v44 = vsub.f32 %v987_v35, %v996_v43  ;;  %v1001_v45 = vsel %vm251_vm4, %v999_v28, 0.0  ;;  %v7101_v35 = vld [vmem:[#allocation2 + $0x370] ss:$412 sps:$4 sm:$0xff]   ;;  %v7115_v43 = vld [vmem:[#allocation2 + $0x384] ss:$412 sps:$4 sm:$0xff]  }
 0xa6f   :  { %1002 = vadd.xlane.f32.xlu1 %v1001_v45  ;;  %v7118_v28 = vld [vmem:[#allocation2 + $0x38c] ss:$412 sps:$4 sm:$0xff]  }
 0xa70   :  { %v1000_v46 = vmul.f32 %v998_v44, %v998_v44  ;;  %v7116_v45 = vld [vmem:[#allocation2 + $0x388] ss:$412 sps:$4 sm:$0xff]  }
 0xa72   :  { %v1004_v19 = vsel %vm251_vm4, %v1000_v46, 0.0  ;;  %v7121_v46 = vld [vmem:[#allocation2 + $0x5c] ss:$412 sps:$4 sm:$0xff]  }
 0xa73   :  { %1005 = vadd.xlane.f32.xlu0 %v1004_v19  ;;  %v7124_v19 = vld [vmem:[#allocation2 + $0x64] ss:$412 sps:$4 sm:$0xff]  }
 0xafc   :  { %v1003_v56 = vpop.xlane.xlu1 %1002 }
 0xafd   :  { %v1007_v57 = vmul.f32 0.03125, %v1003_v56  ;;  %v7792_v56 = vsub.s32 6, %v7638_v34 }
 0xaff   :  { %v1009_v58 = vadd.f32 1e-05, %v1007_v57 }
 0xb00   :  { %v1006_v60 = vpop.xlane.xlu0 %1005 }
 0xb01   :  { %7385 = vrsqrt.f32 %v1009_v58  ;;  %v1008_v61 = vmul.f32 0.03125, %v1006_v60  ;;  %v7795_v60 = vsub.s32 5, %v7638_v34 }
 0xb03   :  { %v1010_v63 = vadd.f32 1e-05, %v1008_v61  ;;  %v7798_v61 = vsub.s32 7, %v7638_v34  ;;  %v1057_v34 = vrot.slane %v197_v48, %v7795_v60 }
 0xb05   :  { %7387 = vrsqrt.f32 %v1010_v63 }
 0xb0b   :  { %v7386_v1 = vpop.eup %7385 }
 0xb0c   :  { %v1013_v2 = vmul.f32 %v7386_v1, %v997_v41  ;;  %v7107_v41 = vld [vmem:[#allocation2 + $0x48] ss:$412 sps:$4 sm:$0xff]  }
 0xb0e   :  { %v1021_v5 = vmul.f32 %v6419_v3, %v1013_v2 }
 0xb0f   :  { %v7388_v4 = vpop.eup %7387 }
 0xb10   :  { %v1014_v7 = vmul.f32 %v7388_v4, %v998_v44  ;;  %v7749_v10 = vadd.f32 %v6420_v8, %v1021_v5  ;;  %v7113_v44 = vld [vmem:[#allocation2 + $0x380] ss:$412 sps:$4 sm:$0xff]  }
 0xb12   :  { %v1022_v9 = vmul.f32 %v6419_v3, %v1014_v7 }
 0xb14   :  { %v7751_v11 = vadd.f32 %v6420_v8, %v1022_v9 }
 0xb16   :  { %v1031_v14 = vpack.c.bf16 %v7751_v11, %v7749_v10 }
 0xb18   :  { %6453 = vmatmul.mubr.msk.bf16.vlgmr.msra.gmra.mrb[28].mxu0 %vm251_vm4, %v1031_v14  ;;  %6454 = vmatmul.mubr.msk.bf16.vlgmr.msra.gmra.mrb[28].mxu1 %vm251_vm4, %v1031_v14 }
 0xb19   :  { %1364 = vmatpush1.bf16.msra.mxu0 %v7071_v12  ;;  %1407 = vmatpush1.bf16.msra.mxu1 %v7074_v13 }
 0xb1a   :  { %1365 = vmatprep.subr.bf16.mxu0 %v7079_v15  ;;  %1408 = vmatprep.subr.bf16.mxu1 %v7082_v16  ;;  %v1053_v15 = vrot.slane %v197_v48, %v7789_v55  ;;  %v1061_v16 = vrot.slane %v197_v48, %v7792_v56 }
 0xb1b   :  { %1395 = vmatprep.mubr.bf16.mxu0 %v7524_v0  ;;  %1438 = vmatprep.mubr.bf16.mxu1 %v7524_v0 }
 0xb1d   :  { %1366 = vmatpush1.bf16.msra.mxu0 %v7077_v18  ;;  %1409 = vmatpush1.bf16.msra.mxu1 %v7080_v20 }
 0xb1e   :  { %1449 = vmatprep.subr.bf16.mxu0 %v7085_v59  ;;  %1492 = vmatprep.subr.bf16.mxu1 %v7088_v21  ;;  %v1065_v59 = vrot.slane %v197_v48, %v7798_v61 }
 0xb20   :  { %6455 = vmatmul.mubr.msk.bf16.vlgmr.msra.gmra.mrb[32].mxu0 %vm251_vm4, %v1031_v14  ;;  %6456 = vmatmul.mubr.msk.bf16.vlgmr.msra.gmra.mrb[32].mxu1 %vm251_vm4, %v1031_v14 }
 0xb21   :  { %1450 = vmatpush1.bf16.msra.mxu0 %v7083_v22  ;;  %1493 = vmatpush1.bf16.msra.mxu1 %v7086_v62 }
 0xb22   :  { %1451 = vmatprep.subr.bf16.mxu0 %v7091_v23  ;;  %1494 = vmatprep.subr.bf16.mxu1 %v7094_v24 }
 0xb23   :  { %1481 = vmatprep.mubr.bf16.mxu0 %v7524_v0  ;;  %1524 = vmatprep.mubr.bf16.mxu1 %v7524_v0 }
 0xb25   :  { %1452 = vmatpush1.bf16.msra.mxu0 %v7089_v25  ;;  %1495 = vmatpush1.bf16.msra.mxu1 %v7092_v26 }
 0xb26   :  { %1535 = vmatprep.subr.bf16.mxu0 %v7097_v27  ;;  %1578 = vmatprep.subr.bf16.mxu1 %v7100_v29  ;;  %v7807_v29 = vld [vmem:[%s8283_s3 + $0xe] sm:$0xff] }
 0xb28   :  { %6457 = vmatmul.mubr.msk.bf16.vlgmr.msra.gmra.mrb[36].mxu0 %vm251_vm4, %v1031_v14  ;;  %6458 = vmatmul.mubr.msk.bf16.vlgmr.msra.gmra.mrb[36].mxu1 %vm251_vm4, %v1031_v14 }
 0xb29   :  { %1536 = vmatpush1.bf16.msra.mxu0 %v7095_v30  ;;  %1579 = vmatpush1.bf16.msra.mxu1 %v7098_v31 }
 0xb2a   :  { %1537 = vmatprep.subr.bf16.mxu0 %v7103_v32  ;;  %1580 = vmatprep.subr.bf16.mxu1 %v7106_v33 }
 0xb2b   :  { %1567 = vmatprep.mubr.bf16.mxu0 %v7524_v0  ;;  %1610 = vmatprep.mubr.bf16.mxu1 %v7524_v0 }
 0xb2d   :  { %1538 = vmatpush1.bf16.msra.mxu0 %v7101_v35  ;;  %1581 = vmatpush1.bf16.msra.mxu1 %v7104_v36 }
 0xb2e   :  { %1835 = vmatprep.subr.bf16.mxu0 %v7109_v37  ;;  %1876 = vmatprep.subr.bf16.mxu1 %v7112_v38  ;;  %v7119_v37 = vld [vmem:[#allocation2 + $0x58] ss:$412 sps:$4 sm:$0xff]   ;;  %v7122_v38 = vld [vmem:[#allocation2 + $0x60] ss:$412 sps:$4 sm:$0xff]  }
 0xb30   :  { %6459 = vmatmul.mubr.msk.bf16.vlgmr.msra.gmra.mrb[40].mxu0 %vm251_vm4, %v1031_v14  ;;  %6460 = vmatmul.mubr.msk.bf16.vlgmr.msra.gmra.mrb[40].mxu1 %vm251_vm4, %v1031_v14 }
 0xb36   :  { %1836 = vmatpush1.bf16.xpose.msra.mxu0 %v7107_v41  ;;  %1877 = vmatpush1.bf16.xpose.msra.mxu1 %v7110_v42 }
 0xb37   :  { %1837 = vmatprep.subr.bf16.mxu0 %v7115_v43  ;;  %1878 = vmatprep.subr.bf16.mxu1 %v7118_v28 }
 0xb3e   :  { %1838 = vmatpush1.bf16.xpose.msra.mxu0 %v7113_v44  ;;  %1879 = vmatpush1.bf16.xpose.msra.mxu1 %v7116_v45  ;;  %v1069_v44 = vrot.slane %v7807_v29, %v7770_v47  ;;  %v7127_v45 = vld [vmem:[#allocation2 + $0x394] ss:$412 sps:$4 sm:$0xff]  }
 0xb3f   :  { %1917 = vmatprep.subr.bf16.mxu0 %v7121_v46  ;;  %1958 = vmatprep.subr.bf16.mxu1 %v7124_v19  ;;  %v7130_v46 = vld [vmem:[#allocation2 + $0x39c] ss:$412 sps:$4 sm:$0xff]  }
 0xbeb   :  { %v1311_v57 = vpop.f32.mrb[28].mxu0  ;;  %v1354_v58 = vpop.f32.mrb[28].mxu1 }
 0xbec   :  { %v1312_v63 = vadd.f32 %v1311_v57, %v1037_v51  ;;  %v1355_v1 = vadd.f32 %v1354_v58, %v1045_v52  ;;  %v1313_v2 = vpop.f32.mrb[29].mxu0  ;;  %v1356_v3 = vpop.f32.mrb[29].mxu1 }
 0xbed   :  { %v1314_v4 = vadd.f32 %v1313_v2, %v1041_v53  ;;  %v1357_v5 = vadd.f32 %v1356_v3, %v1049_v54  ;;  %v1315_v7 = vpop.f32.mrb[30].mxu0  ;;  %v1358_v8 = vpop.f32.mrb[30].mxu1 }
 0xbee   :  { %v1316_v9 = vadd.f32 %v1315_v7, %v1037_v51  ;;  %v1359_v12 = vadd.f32 %v1358_v8, %v1045_v52  ;;  %v1317_v13 = vpop.f32.mrb[31].mxu0  ;;  %v1360_v14 = vpop.f32.mrb[31].mxu1  ;;  %v1621_v21 = vmax.f32 %v1312_v63, 0.0  ;;  %v1623_v22 = vmax.f32 %v1355_v1, 0.0 }
 0xbef   :  { %v1318_v18 = vadd.f32 %v1317_v13, %v1041_v53  ;;  %v1361_v20 = vadd.f32 %v1360_v14, %v1049_v54  ;;  %v1622_v24 = vmax.f32 %v1314_v4, 0.0  ;;  %v1624_v25 = vmax.f32 %v1357_v5, 0.0 }
 0xbf0   :  { %v1637_v62 = vmax.f32 %v1316_v9, 0.0  ;;  %v1639_v23 = vmax.f32 %v1359_v12, 0.0  ;;  %v1077_v53 = vrot.slane %v7807_v29, %v7773_v17  ;;  %v1073_v1 = vrot.slane %v7807_v29, %v7779_v49 }
 0xbf1   :  { %v1638_v26 = vmax.f32 %v1318_v18, 0.0  ;;  %v1640_v27 = vmax.f32 %v1361_v20, 0.0  ;;  %v1081_v4 = vrot.slane %v7807_v29, %v7782_v50 }
 0xbf2   :  { %v1653_v30 = vpack.c.bf16 %v1637_v62, %v1621_v21  ;;  %v1655_v31 = vpack.c.bf16 %v1639_v23, %v1623_v22  ;;  %v7125_v22 = vld [vmem:[#allocation2 + $0x390] ss:$412 sps:$4 sm:$0xff]   ;;  %v7128_v62 = vld [vmem:[#allocation2 + $0x398] ss:$412 sps:$4 sm:$0xff]  }
 0xbf3   :  { %v1654_v32 = vpack.c.bf16 %v1638_v26, %v1622_v24  ;;  %v1656_v33 = vpack.c.bf16 %v1640_v27, %v1624_v25  ;;  %v1397_v35 = vpop.f32.mrb[32].mxu0  ;;  %v1440_v36 = vpop.f32.mrb[32].mxu1  ;;  %v7133_v27 = vld [vmem:[#allocation2 + $0x6c] ss:$412 sps:$4 sm:$0xff]  }
 0xbf4   :  { %v1398_v41 = vadd.f32 %v1397_v35, %v1053_v15  ;;  %v1441_v42 = vadd.f32 %v1440_v36, %v1061_v16  ;;  %v1399_v43 = vpop.f32.mrb[33].mxu0  ;;  %v1442_v28 = vpop.f32.mrb[33].mxu1  ;;  %v1085_v36 = vrot.slane %v7807_v29, %v7789_v55 }
 0xbf5   :  { %v1400_v19 = vadd.f32 %v1399_v43, %v1057_v34  ;;  %v1443_v48 = vadd.f32 %v1442_v28, %v1065_v59  ;;  %v1401_v51 = vpop.f32.mrb[34].mxu0  ;;  %v1444_v52 = vpop.f32.mrb[34].mxu1  ;;  %1867 = vmatprep.mubr.bf16.mxu0 %v1654_v32  ;;  %1908 = vmatprep.mubr.bf16.mxu1 %v1656_v33  ;;  %v1093_v43 = vrot.slane %v7807_v29, %v7792_v56 }
 0xbf6   :  { %v1402_v54 = vadd.f32 %v1401_v51, %v1053_v15  ;;  %v1445_v57 = vadd.f32 %v1444_v52, %v1061_v16  ;;  %v1403_v58 = vpop.f32.mrb[35].mxu0  ;;  %v1446_v63 = vpop.f32.mrb[35].mxu1  ;;  %1868 = vmatmul.mubr.bf16.vlgmr.msra.gmra.mrb[44].mxu0 %v1653_v30  ;;  %1909 = vmatmul.mubr.bf16.vlgmr.msra.gmra.mrb[44].mxu1 %v1655_v31  ;;  %v1625_v5 = vmax.f32 %v1398_v41, 0.0  ;;  %v1627_v7 = vmax.f32 %v1441_v42, 0.0  ;;  %v7136_v30 = vld [vmem:[#allocation2 + $0x74] ss:$412 sps:$4 sm:$0xff]  }
 0xbf7   :  { %v1404_v2 = vadd.f32 %v1403_v58, %v1057_v34  ;;  %v1447_v3 = vadd.f32 %v1446_v63, %v1065_v59  ;;  %1918 = vmatpush1.bf16.xpose.msra.mxu0 %v7119_v37  ;;  %1959 = vmatpush1.bf16.xpose.msra.mxu1 %v7122_v38  ;;  %v1626_v12 = vmax.f32 %v1400_v19, 0.0  ;;  %v1628_v13 = vmax.f32 %v1443_v48, 0.0 }
 0xbf8   :  { %v1641_v8 = vmax.f32 %v1402_v54, 0.0  ;;  %v1643_v9 = vmax.f32 %v1445_v57, 0.0  ;;  %1919 = vmatprep.subr.bf16.mxu0 %v7127_v45  ;;  %1960 = vmatprep.subr.bf16.mxu1 %v7130_v46  ;;  %v1089_v28 = vrot.slane %v7807_v29, %v7795_v60  ;;  %v1097_v19 = vrot.slane %v7807_v29, %v7798_v61 }
 0xbf9   :  { %v1642_v14 = vmax.f32 %v1404_v2, 0.0  ;;  %v1644_v15 = vmax.f32 %v1447_v3, 0.0 }
 0xbfa   :  { %v1657_v16 = vpack.c.bf16 %v1641_v8, %v1625_v5  ;;  %v1659_v18 = vpack.c.bf16 %v1643_v9, %v1627_v7  ;;  %v7131_v7 = vld [vmem:[#allocation2 + $0x68] ss:$412 sps:$4 sm:$0xff]  }
 0xbfb   :  { %v1658_v20 = vpack.c.bf16 %v1642_v14, %v1626_v12  ;;  %v1660_v34 = vpack.c.bf16 %v1644_v15, %v1628_v13  ;;  %v1483_v59 = vpop.f32.mrb[36].mxu0  ;;  %v1526_v21 = vpop.f32.mrb[36].mxu1  ;;  %v7134_v13 = vld [vmem:[#allocation2 + $0x70] ss:$412 sps:$4 sm:$0xff]  }
 0xbfc   :  { %v1484_v23 = vadd.f32 %v1483_v59, %v1069_v44  ;;  %v1527_v24 = vadd.f32 %v1526_v21, %v1077_v53  ;;  %v1485_v25 = vpop.f32.mrb[37].mxu0  ;;  %v1528_v26 = vpop.f32.mrb[37].mxu1  ;;  %v7139_v59 = vld [vmem:[#allocation2 + $0x3a4] ss:$412 sps:$4 sm:$0xff]   ;;  %v7142_v21 = vld [vmem:[#allocation2 + $0x3ac] ss:$412 sps:$4 sm:$0xff]  }
 0xbfd   :  { %v1486_v31 = vadd.f32 %v1485_v25, %v1073_v1  ;;  %v1529_v32 = vadd.f32 %v1528_v26, %v1081_v4  ;;  %v1487_v33 = vpop.f32.mrb[38].mxu0  ;;  %v1530_v35 = vpop.f32.mrb[38].mxu1  ;;  %1949 = vmatprep.mubr.bf16.mxu0 %v1658_v20  ;;  %1990 = vmatprep.mubr.bf16.mxu1 %v1660_v34 }
 0xbfe   :  { %v1488_v37 = vadd.f32 %v1487_v33, %v1069_v44  ;;  %v1531_v38 = vadd.f32 %v1530_v35, %v1077_v53  ;;  %v1489_v41 = vpop.f32.mrb[39].mxu0  ;;  %v1532_v42 = vpop.f32.mrb[39].mxu1  ;;  %v1629_v48 = vmax.f32 %v1484_v23, 0.0  ;;  %v1631_v51 = vmax.f32 %v1527_v24, 0.0 }
 0xbff   :  { %v1490_v45 = vadd.f32 %v1489_v41, %v1073_v1  ;;  %v1533_v46 = vadd.f32 %v1532_v42, %v1081_v4  ;;  %1920 = vmatpush1.bf16.xpose.msra.mxu0 %v7125_v22  ;;  %1961 = vmatpush1.bf16.xpose.msra.mxu1 %v7128_v62  ;;  %v1630_v53 = vmax.f32 %v1486_v31, 0.0  ;;  %v1632_v54 = vmax.f32 %v1529_v32, 0.0  ;;  %v7137_v42 = vld [vmem:[#allocation2 + $0x3a0] ss:$412 sps:$4 sm:$0xff]  }
 0xc00   :  { %v1645_v52 = vmax.f32 %v1488_v37, 0.0  ;;  %v1647_v44 = vmax.f32 %v1531_v38, 0.0  ;;  %1999 = vmatprep.subr.bf16.mxu0 %v7133_v27  ;;  %2040 = vmatprep.subr.bf16.mxu1 %v7136_v30 }
 0xc01   :  { %v1646_v57 = vmax.f32 %v1490_v45, 0.0  ;;  %v1648_v58 = vmax.f32 %v1533_v46, 0.0  ;;  %v7148_v45 = vld [vmem:[#allocation2 + $0x84] ss:$412 sps:$4 sm:$0xff]   ;;  %v7143_v46 = vld [vmem:[#allocation2 + $0x78] ss:$412 sps:$4 sm:$0xff]  }
 0xc02   :  { %v1661_v63 = vpack.c.bf16 %v1645_v52, %v1629_v48  ;;  %v1663_v2 = vpack.c.bf16 %v1647_v44, %v1631_v51  ;;  %v7151_v48 = vld [vmem:[#allocation2 + $0x3b4] ss:$412 sps:$4 sm:$0xff]   ;;  %v7154_v51 = vld [vmem:[#allocation2 + $0x3bc] ss:$412 sps:$4 sm:$0xff]  }
 0xc03   :  { %v1662_v3 = vpack.c.bf16 %v1646_v57, %v1630_v53  ;;  %v1664_v1 = vpack.c.bf16 %v1648_v58, %v1632_v54  ;;  %v1569_v4 = vpop.f32.mrb[40].mxu0  ;;  %v1612_v5 = vpop.f32.mrb[40].mxu1  ;;  %v7149_v52 = vld [vmem:[#allocation2 + $0x3b0] ss:$412 sps:$4 sm:$0xff]   ;;  %v7152_v44 = vld [vmem:[#allocation2 + $0x3b8] ss:$412 sps:$4 sm:$0xff]  }
 0xc04   :  { %v1570_v8 = vadd.f32 %v1569_v4, %v1085_v36  ;;  %v1613_v9 = vadd.f32 %v1612_v5, %v1093_v43  ;;  %v1571_v29 = vpop.f32.mrb[41].mxu0  ;;  %v1614_v12 = vpop.f32.mrb[41].mxu1  ;;  %v6461_v53 = vld [vmem:[%s8283_s3 + $0x16] ss:$0 sm:$0xff] }
 0xc05   :  { %v1572_v14 = vadd.f32 %v1571_v29, %v1089_v28  ;;  %v1615_v15 = vadd.f32 %v1614_v12, %v1097_v19  ;;  %v1573_v20 = vpop.f32.mrb[42].mxu0  ;;  %v1616_v34 = vpop.f32.mrb[42].mxu1 }
 0xc06   :  { %v1574_v22 = vadd.f32 %v1573_v20, %v1085_v36  ;;  %v1617_v62 = vadd.f32 %v1616_v34, %v1093_v43  ;;  %1950 = vmatmul.mubr.bf16.vlgmr.msra.gmra.mrb[48].mxu0 %v1657_v16  ;;  %1991 = vmatmul.mubr.bf16.vlgmr.msra.gmra.mrb[48].mxu1 %v1659_v18  ;;  %v1575_v23 = vpop.f32.mrb[43].mxu0  ;;  %v1618_v24 = vpop.f32.mrb[43].mxu1  ;;  %v1633_v27 = vmax.f32 %v1570_v8, 0.0  ;;  %v1635_v30 = vmax.f32 %v1613_v9, 0.0  ;;  %v7140_v43 = vld [vmem:[#allocation2 + $0x3a8] ss:$412 sps:$4 sm:$0xff]  }
 0xc07   :  { %v1576_v25 = vadd.f32 %v1575_v23, %v1089_v28  ;;  %v1619_v26 = vadd.f32 %v1618_v24, %v1097_v19  ;;  %2000 = vmatpush1.bf16.xpose.msra.mxu0 %v7131_v7  ;;  %2031 = vmatprep.mubr.bf16.mxu0 %v1662_v3  ;;  %v1634_v33 = vmax.f32 %v1572_v14, 0.0  ;;  %v1636_v35 = vmax.f32 %v1615_v15, 0.0  ;;  %v7145_v28 = vld [vmem:[#allocation2 + $0x7c] ss:$412 sps:$4 sm:$0xff]  }
 0xc08   :  { %v1649_v31 = vmax.f32 %v1574_v22, 0.0  ;;  %v1651_v32 = vmax.f32 %v1617_v62, 0.0  ;;  %2041 = vmatpush1.bf16.xpose.msra.mxu1 %v7134_v13  ;;  %2072 = vmatprep.mubr.bf16.mxu1 %v1664_v1  ;;  %v7146_v19 = vld [vmem:[#allocation2 + $0x80] ss:$412 sps:$4 sm:$0xff]  }
 0xc09   :  { %v1650_v37 = vmax.f32 %v1576_v25, 0.0  ;;  %v1652_v38 = vmax.f32 %v1619_v26, 0.0  ;;  %2001 = vmatprep.subr.bf16.mxu0 %v7139_v59  ;;  %2042 = vmatprep.subr.bf16.mxu1 %v7142_v21 }
 0xc0a   :  { %v1665_v16 = vpack.c.bf16 %v1649_v31, %v1633_v27  ;;  %v1667_v18 = vpack.c.bf16 %v1651_v32, %v1635_v30 }
 0xc0b   :  { %v1666_v36 = vpack.c.bf16 %v1650_v37, %v1634_v33  ;;  %v1668_v41 = vpack.c.bf16 %v1652_v38, %v1636_v35 }
 0xc0f   :  { %2002 = vmatpush1.bf16.xpose.msra.mxu0 %v7137_v42 }
 0xc10   :  { %2043 = vmatpush1.bf16.xpose.msra.mxu1 %v7140_v43  ;;  %2081 = vmatprep.subr.bf16.mxu0 %v7145_v28 }
 0xc11   :  { %2122 = vmatprep.subr.bf16.mxu1 %v7148_v45 }
 0xc16   :  { %2032 = vmatmul.mubr.bf16.vlgmr.msra.gmra.mrb[52].mxu0 %v1661_v63 }
 0xc17   :  { %2073 = vmatmul.mubr.bf16.vlgmr.msra.gmra.mrb[52].mxu1 %v1663_v2  ;;  %2082 = vmatpush1.bf16.xpose.msra.mxu0 %v7143_v46 }
 0xc18   :  { %2113 = vmatprep.mubr.bf16.mxu0 %v1666_v36  ;;  %2123 = vmatpush1.bf16.xpose.msra.mxu1 %v7146_v19 }
 0xc19   :  { %2154 = vmatprep.mubr.bf16.mxu1 %v1668_v41  ;;  %2083 = vmatprep.subr.bf16.mxu0 %v7151_v48 }
 0xc1a   :  { %2124 = vmatprep.subr.bf16.mxu1 %v7154_v51 }
 0xc1f   :  { %2084 = vmatpush1.bf16.xpose.msra.mxu0 %v7149_v52 }
 0xc20   :  { %2125 = vmatpush1.bf16.xpose.msra.mxu1 %v7152_v44  ;;  %6863 = vmatprep.subr.bf16.mxu0 %v7525_v6 }
 0xc21   :  { %6871 = vmatprep.subr.bf16.mxu1 %v7525_v6 }
 0xc26   :  { %2114 = vmatmul.mubr.bf16.vlgmr.msra.gmra.mrb[56].mxu0 %v1665_v16 }
 0xc27   :  { %2155 = vmatmul.mubr.bf16.vlgmr.msra.gmra.mrb[56].mxu1 %v1667_v18  ;;  %6867 = vmatprep.mubr.msk.bf16.mxu0 %vm7526_vm3, %v7525_v6 }
 0xc28   :  { %6873 = vmatprep.mubr.msk.bf16.mxu1 %vm7526_vm3, %v7525_v6 }
 0xcc9   :  { %v1869_v54 = vpop.f32.mrb[44].mxu0  ;;  %v1910_v57 = vpop.f32.mrb[44].mxu1 }
 0xcca   :  { %v1870_v58 = vadd.f32 %v6461_v53, %v1869_v54  ;;  %v1871_v63 = vpop.f32.mrb[45].mxu0  ;;  %v1912_v2 = vpop.f32.mrb[45].mxu1 }
 0xccb   :  { %v1872_v3 = vpop.f32.mrb[46].mxu0  ;;  %v1913_v1 = vpop.f32.mrb[46].mxu1 }
 0xccc   :  { %v1911_v4 = vadd.f32 %v1910_v57, %v1870_v58  ;;  %v1873_v5 = vadd.f32 %v6461_v53, %v1872_v3  ;;  %v1874_v7 = vpop.f32.mrb[47].mxu0  ;;  %v1915_v8 = vpop.f32.mrb[47].mxu1 }
 0xcce   :  { %v1914_v9 = vadd.f32 %v1913_v1, %v1873_v5 }
 0xcd9   :  { %v1951_v29 = vpop.f32.mrb[48].mxu0  ;;  %v1992_v12 = vpop.f32.mrb[48].mxu1 }
 0xcda   :  { %v1952_v13 = vadd.f32 %v1951_v29, %v1911_v4  ;;  %v1953_v14 = vpop.f32.mrb[49].mxu0  ;;  %v1994_v15 = vpop.f32.mrb[49].mxu1 }
 0xcdb   :  { %v1954_v20 = vpop.f32.mrb[50].mxu0  ;;  %v1995_v34 = vpop.f32.mrb[50].mxu1 }
 0xcdc   :  { %v1993_v59 = vadd.f32 %v1992_v12, %v1952_v13  ;;  %v1955_v21 = vadd.f32 %v1954_v20, %v1914_v9  ;;  %v1956_v22 = vpop.f32.mrb[51].mxu0  ;;  %v1997_v62 = vpop.f32.mrb[51].mxu1  ;;  %v7155_v9 = vld [vmem:[#allocation2 + $0x88] ss:$412 sps:$4 sm:$0xff]  }
 0xcdd   :  { %6864 = vmatpush3.bf16.msra.mxu0 %v7155_v9 }
 0xcde   :  { %v1996_v23 = vadd.f32 %v1995_v34, %v1955_v21  ;;  %6865 = vmatprep.subr.bf16.mxu0 %v7525_v6  ;;  %v6494_v21 = vld [vmem:[%s8283_s3 + $0x4] ss:$0 sm:$0xff] }
 0xce9   :  { %v2033_v24 = vpop.f32.mrb[52].mxu0 }
 0xcea   :  { %v2034_v25 = vadd.f32 %v2033_v24, %v1993_v59  ;;  %v2074_v26 = vpop.f32.mrb[52].mxu1  ;;  %v2035_v27 = vpop.f32.mrb[53].mxu0  ;;  %v6495_v24 = vld [vmem:[%s8283_s3 + $0x5] ss:$0 sm:$0xff] }
 0xceb   :  { %v2076_v30 = vpop.f32.mrb[53].mxu1  ;;  %v2036_v31 = vpop.f32.mrb[54].mxu0 }
 0xcec   :  { %v2075_v32 = vadd.f32 %v2074_v26, %v2034_v25  ;;  %v2037_v33 = vadd.f32 %v2036_v31, %v1996_v23  ;;  %v2077_v35 = vpop.f32.mrb[54].mxu1  ;;  %v2038_v37 = vpop.f32.mrb[55].mxu0  ;;  %v6496_v31 = vld [vmem:[%s8283_s3 + $0x17] ss:$0 sm:$0xff] }
 0xced   :  { %v2079_v38 = vpop.f32.mrb[55].mxu1 }
 0xcee   :  { %v2078_v16 = vadd.f32 %v2077_v35, %v2037_v33 }
 0xcf9   :  { %v2115_v18 = vpop.f32.mrb[56].mxu0 }
 0xcfa   :  { %v2116_v36 = vadd.f32 %v2115_v18, %v2075_v32  ;;  %v2156_v41 = vpop.f32.mrb[56].mxu1  ;;  %v2117_v42 = vpop.f32.mrb[57].mxu0 }
 0xcfb   :  { %v2158_v43 = vpop.f32.mrb[57].mxu1  ;;  %v2118_v28 = vpop.f32.mrb[58].mxu0 }
 0xcfc   :  { %v2157_v45 = vadd.f32 %v2156_v41, %v2116_v36  ;;  %v2119_v46 = vadd.f32 %v2118_v28, %v2078_v16  ;;  %v2159_v19 = vpop.f32.mrb[58].mxu1  ;;  %v2120_v48 = vpop.f32.mrb[59].mxu0 }
 0xcfd   :  { %v2161_v51 = vpop.f32.mrb[59].mxu1 }
 0xcfe   :  { %v2160_v52 = vadd.f32 %v2159_v19, %v2119_v46  ;;  %v2163_v44 = vadd.f32 %v2157_v45, %v7749_v10 }
 0xd00   :  { %v2165_v53 = vsel %vm251_vm4, %v2163_v44, 0.0  ;;  %v2164_v54 = vadd.f32 %v2160_v52, %v7751_v11  ;;  %v7156_v11 = vld [vmem:[#allocation2 + $0x3c0] ss:$412 sps:$4 sm:$0xff]  }
 0xd01   :  { %2166 = vadd.xlane.f32.xlu0 %v2165_v53  ;;  %6866 = vmatpush3.bf16.msra.mxu0 %v7156_v11 }
 0xd02   :  { %v2168_v57 = vsel %vm251_vm4, %v2164_v54, 0.0  ;;  %6877 = vmatprep.subr.bf16.mxu0 %v7525_v6 }
 0xd05   :  { %2169 = vadd.xlane.f32.xlu0 %v2168_v57 }
 0xd8e   :  { %v2167_v58 = vpop.xlane.xlu0 %2166 }
 0xd8f   :  { %v2171_v63 = vmul.f32 0.03125, %v2167_v58 }
 0xd91   :  { %v2173_v2 = vsub.f32 %v2163_v44, %v2171_v63 }
 0xd92   :  { %v2170_v3 = vpop.xlane.xlu0 %2169 }
 0xd93   :  { %v2172_v1 = vmul.f32 0.03125, %v2170_v3  ;;  %v2175_v4 = vmul.f32 %v2173_v2, %v2173_v2 }
 0xd95   :  { %v2174_v5 = vsub.f32 %v2164_v54, %v2172_v1  ;;  %v2177_v7 = vsel %vm251_vm4, %v2175_v4, 0.0 }
 0xd96   :  { %2178 = vadd.xlane.f32.xlu0 %v2177_v7 }
 0xd97   :  { %v2176_v8 = vmul.f32 %v2174_v5, %v2174_v5 }
 0xd99   :  { %v2180_v10 = vsel %vm251_vm4, %v2176_v8, 0.0 }
 0xd9a   :  { %2181 = vadd.xlane.f32.xlu0 %v2180_v10 }
 0xe23   :  { %v2179_v29 = vpop.xlane.xlu0 %2178 }
 0xe24   :  { %v2183_v12 = vmul.f32 0.03125, %v2179_v29 }
 0xe26   :  { %v2185_v13 = vadd.f32 1e-05, %v2183_v12 }
 0xe27   :  { %v2182_v14 = vpop.xlane.xlu0 %2181 }
 0xe28   :  { %7389 = vrsqrt.f32 %v2185_v13  ;;  %v2184_v15 = vmul.f32 0.03125, %v2182_v14 }
 0xe2a   :  { %v2186_v20 = vadd.f32 1e-05, %v2184_v15 }
 0xe2c   :  { %7391 = vrsqrt.f32 %v2186_v20 }
 0xe32   :  { %v7390_v34 = vpop.eup %7389 }
 0xe33   :  { %v2189_v59 = vmul.f32 %v7390_v34, %v2173_v2 }
 0xe35   :  { %v2197_v62 = vmul.f32 %v6494_v21, %v2189_v59 }
 0xe36   :  { %v7392_v22 = vpop.eup %7391 }
 0xe37   :  { %v2190_v23 = vmul.f32 %v7392_v22, %v2174_v5  ;;  %v7848_v26 = vadd.f32 %v6495_v24, %v2197_v62 }
 0xe39   :  { %v2198_v25 = vmul.f32 %v6494_v21, %v2190_v23 }
 0xe3b   :  { %v7850_v27 = vadd.f32 %v6495_v24, %v2198_v25 }
 0xe3d   :  { %v2288_v30 = vpack.c.bf16 %v7850_v27, %v7848_v26 }
 0xe3f   :  { %6868 = vmatmul.mubr.msk.bf16.vlgmr.msra.gmra.mrb[60].mxu0 %vm251_vm4, %v2288_v30 }
 0xe40   :  { %6879 = vmatprep.mubr.msk.bf16.mxu0 %vm7526_vm3, %v7525_v6 }
 0xf12   :  { %v2344_v32 = vpop.f32.mrb[60].mxu0 }
 0xf13   :  { %v6869_v33 = vpop.f32.mrb[61].mxu0  ;;  %v2345_v37 = vadd.f32 %v6496_v31, %v2344_v32 }
 0xf14   :  { %v2347_v35 = vpop.f32.mrb[62].mxu0 }
 0xf15   :  { %v2348_v38 = vadd.f32 %v6496_v31, %v2347_v35  ;;  %v6870_v16 = vpop.f32.mrb[63].mxu0  ;;  %v2212_v35 = vld [vmem:[#allocation2 + $0x8c] sm:$0xf] }
 0xf17   :  { %v7860_v18 = vpack.c.bf16 %v2348_v38, %v2345_v37  ;;  %v2646_v37 = vsel %vm544_vm14, %v2212_v35, 0  ;;  %v2213_v38 = vld [vmem:[#allocation2 + $0x228] sm:$0xf] }
 0xf18   :  { %v2599_v16 = vsel %vm544_vm14, %v2213_v38, 0 }
 0xf19   :  { %2475 = vrot.lane.b32.xlu1 %v7860_v18, %s7529_s14  ;;  %2353 = vrot.lane.b32.xlu0 %v7860_v18, %s7528_s13 }
 0xf1d   :  { %2473 = vrot.lane.b32.xlu0 %v7860_v18, %s7527_s1 }
 0xf8b   :  { %v2354_v36 = vpop.permute.xlu0 %2353  ;;  %v2476_v42 = vpop.permute.xlu1 %2475 }
 0xf8c   :  { %v2359_v41 = vsel %vm300_vm5, %v2354_v36, 0  ;;  %v2481_v43 = vsel %vm300_vm5, %v2476_v42, 0 }
 0xf8d   :  { %6872 = vmatpush3.bf16.xpose.msra.mxu1 %v2359_v41 }
 0xf8e   :  { %6883 = vmatprep.subr.bf16.mxu1 %v7525_v6 }
 0xf8f   :  { %v2474_v28 = vpop.permute.xlu0 %2473 }
 0xf94   :  { %6874 = vmatmul.mubr.msk.bf16.vlgmr.msra.gmra.mrb[60].mxu1 %vm300_vm5, %v7860_v18 }
 0xf95   :  { %6884 = vmatpush3.bf16.xpose.msra.mxu1 %v2481_v43  ;;  %6885 = vmatprep.mubr.msk.bf16.mxu1 %vm7526_vm3, %v7525_v6 }
 0xf96   :  { %6895 = vmatprep.subr.bf16.mxu1 %v7525_v6 }
 0xf9c   :  { %6886 = vmatmul.mubr.msk.bf16.vlgmr.msra.gmra.mrb[64].mxu1 %vm300_vm5, %v2474_v28 }
 0xf9d   :  { %6897 = vmatprep.mubr.msk.bf16.mxu1 %vm7526_vm3, %v7525_v6  ;;  %6896 = vmatpush3.bf16.msra.mxu1 %v2599_v16 }
 0xf9e   :  { %6907 = vmatprep.subr.bf16.mxu1 %v7525_v6 }
0x1067   :  { %v2395_v45 = vpop.f32.mrb[60].mxu1 }
0x1068   :  { %v2396_v46 = vadd.f32 %v2395_v45, %v7642_v39  ;;  %v6875_v19 = vpop.f32.mrb[61].mxu1 }
0x1069   :  { %v2398_v48 = vpop.f32.mrb[62].mxu1 }
0x106a   :  { %v2399_v51 = vadd.f32 %v2398_v48, %v7644_v40  ;;  %v6876_v52 = vpop.f32.mrb[63].mxu1  ;;  %v2402_v44 = vsel %vm52_vm0, %v2396_v46, -inf }
0x106b   :  { %2403 = vmax.xlane.f32.xlu0 %v2402_v44 }
0x106c   :  { %v2405_v53 = vsel %vm52_vm0, %v2399_v51, -inf }
0x106d   :  { %2406 = vmax.xlane.f32.xlu1 %v2405_v53 }
0x106f   :  { %v2517_v54 = vpop.f32.mrb[64].mxu1 }
0x1070   :  { %v2518_v57 = vadd.f32 %v2517_v54, %v7642_v39  ;;  %v6887_v58 = vpop.f32.mrb[65].mxu1 }
0x1071   :  { %v2520_v63 = vpop.f32.mrb[66].mxu1 }
0x1072   :  { %v2521_v2 = vadd.f32 %v2520_v63, %v7644_v40  ;;  %v6888_v3 = vpop.f32.mrb[67].mxu1  ;;  %v2524_v1 = vsel %vm52_vm0, %v2518_v57, -inf }
0x1073   :  { %2525 = vmax.xlane.f32.xlu0 %v2524_v1 }
0x1074   :  { %v2527_v4 = vsel %vm52_vm0, %v2521_v2, -inf }
0x1077   :  { %2528 = vmax.xlane.f32.xlu0 %v2527_v4 }
0x107e   :  { %2543 = vrot.lane.b32.xlu1 %v7860_v18, %s7531_s15 }
0x108d   :  { %2421 = vrot.lane.b32.xlu0 %v7860_v18, %s7532_s16 }
0x10f8   :  { %v2404_v5 = vpop.xlane.xlu0 %2403 }
0x10f9   :  { %v2408_v7 = vsub.f32 %v2396_v46, %v2404_v5 }
0x10fa   :  { %v2407_v8 = vpop.xlane.xlu1 %2406 }
0x10fb   :  { %v2410_v10 = vmul.f32 1.442695, %v2408_v7  ;;  %v2409_v9 = vsub.f32 %v2399_v51, %v2407_v8 }
0x10fd   :  { %v2412_v11 = vmul.f32 1.442695, %v2409_v9  ;;  %7393 = vpow2.f32 %v2410_v10 }
0x10fe   :  { %v2544_v62 = vpop.permute.xlu1 %2543 }
0x10ff   :  { %7395 = vpow2.f32 %v2412_v11 }
0x1100   :  { %v2526_v29 = vpop.xlane.xlu0 %2525 }
0x1101   :  { %v2530_v12 = vsub.f32 %v2518_v57, %v2526_v29 }
0x1103   :  { %v2532_v13 = vmul.f32 1.442695, %v2530_v12 }
0x1104   :  { %v2529_v14 = vpop.xlane.xlu0 %2528 }
0x1105   :  { %7397 = vpow2.f32 %v2532_v13  ;;  %v2531_v15 = vsub.f32 %v2521_v2, %v2529_v14 }
0x1107   :  { %v2534_v20 = vmul.f32 1.442695, %v2531_v15  ;;  %v7394_v34 = vpop.eup %7393 }
0x1108   :  { %v2422_v59 = vpop.permute.xlu0 %2421  ;;  %v2414_v32 = vsel %vm52_vm0, %v7394_v34, 0.0 }
0x1109   :  { %v7396_v21 = vpop.eup %7395  ;;  %7399 = vpow2.f32 %v2534_v20  ;;  %6878 = vmatpush3.bf16.msra.mxu0 %v2422_v59 }
0x110a   :  { %v2420_v22 = vpack.c.bf16 %v7396_v21, %v7394_v34  ;;  %6889 = vmatprep.subr.bf16.mxu0 %v7525_v6  ;;  %v2417_v33 = vsel %vm52_vm0, %v7396_v21, 0.0 }
0x110c   :  { %6880 = vmatmul.mubr.msk.bf16.vlgmr.msra.gmra.mrb[64].mxu0 %vm52_vm0, %v2420_v22 }
0x110d   :  { %6890 = vmatpush3.bf16.msra.mxu0 %v2544_v62  ;;  %6891 = vmatprep.mubr.msk.bf16.mxu0 %vm7526_vm3, %v7525_v6 }
0x110e   :  { %6901 = vmatprep.subr.bf16.mxu0 %v7525_v6 }
0x110f   :  { %v7398_v23 = vpop.eup %7397 }
0x1110   :  { %v2536_v24 = vsel %vm52_vm0, %v7398_v23, 0.0 }
0x1111   :  { %2537 = vadd.xlane.f32.xlu1 %v2536_v24 }
0x1113   :  { %v7400_v25 = vpop.eup %7399 }
0x1114   :  { %v2539_v30 = vsel %vm52_vm0, %v7400_v25, 0.0  ;;  %v2542_v31 = vpack.c.bf16 %v7400_v25, %v7398_v23 }
0x1115   :  { %2540 = vadd.xlane.f32.xlu0 %v2539_v30 }
0x1116   :  { %6892 = vmatmul.mubr.msk.bf16.vlgmr.msra.gmra.mrb[68].mxu0 %vm52_vm0, %v2542_v31 }
0x1117   :  { %6903 = vmatprep.mubr.msk.bf16.mxu0 %vm7526_vm3, %v7525_v6  ;;  %6902 = vmatpush3.bf16.msra.mxu0 %v2646_v37 }
0x1118   :  { %6913 = vmatprep.subr.bf16.mxu0 %v7525_v6 }
0x1122   :  { %2689 = vrot.lane.b32.xlu1 %v7860_v18, %s7533_s17 }
0x112b   :  { %2691 = vrot.lane.b32.xlu0 %v7860_v18, %s7534_s18 }
0x1146   :  { %2415 = vadd.xlane.f32.xlu1 %v2414_v32 }
0x114a   :  { %2418 = vadd.xlane.f32.xlu0 %v2417_v33 }
0x119e   :  { %v2538_v36 = vpop.xlane.xlu1 %2537 }
0x11a2   :  { %v2541_v41 = vpop.xlane.xlu0 %2540  ;;  %v2690_v42 = vpop.permute.xlu1 %2689 }
0x11a6   :  { %v2692_v43 = vpop.permute.xlu0 %2691 }
0x11a7   :  { %v2697_v10 = vsel %vm300_vm5, %v2692_v43, 0 }
0x11d3   :  { %v2416_v28 = vpop.xlane.xlu1 %2415 }
0x11d4   :  { %7401 = vrcp.f32 %v2416_v28 }
0x11d7   :  { %v2419_v45 = vpop.xlane.xlu0 %2418 }
0x11d8   :  { %7403 = vrcp.f32 %v2419_v45 }
0x11d9   :  { %7405 = vrcp.f32 %v2538_v36 }
0x11da   :  { %7407 = vrcp.f32 %v2541_v41 }
0x11de   :  { %v7402_v19 = vpop.eup %7401 }
0x11df   :  { %v2461_v46 = vpop.f32.mrb[64].mxu0 }
0x11e0   :  { %v6881_v48 = vpop.f32.mrb[65].mxu0  ;;  %v2469_v53 = vmul.f32 %v7402_v19, %v2461_v46 }
0x11e1   :  { %v2464_v51 = vpop.f32.mrb[66].mxu0 }
0x11e2   :  { %v7404_v52 = vpop.eup %7403  ;;  %v6882_v44 = vpop.f32.mrb[67].mxu0 }
0x11e3   :  { %v2471_v54 = vmul.f32 %v7404_v52, %v2464_v51  ;;  %v7406_v63 = vpop.eup %7405  ;;  %v2214_v51 = vld [vmem:[#allocation2 + $0x3c4] sm:$0xf] }
0x11e4   :  { %v7408_v3 = vpop.eup %7407  ;;  %v2815_v52 = vsel %vm544_vm14, %v2214_v51, 0 }
0x11e5   :  { %v2472_v57 = vpack.c.bf16 %v2471_v54, %v2469_v53 }
0x11e7   :  { %6904 = vmatmul.mubr.msk.bf16.vlgmr.msra.gmra.mrb[72].mxu0 %vm300_vm5, %v2472_v57 }
0x11e8   :  { %6915 = vmatprep.mubr.msk.bf16.mxu0 %vm7526_vm3, %v7525_v6 }
0x11e9   :  { %v2583_v58 = vpop.f32.mrb[68].mxu0 }
0x11ea   :  { %v6893_v2 = vpop.f32.mrb[69].mxu0  ;;  %v2591_v4 = vmul.f32 %v7406_v63, %v2583_v58 }
0x11eb   :  { %v2586_v1 = vpop.f32.mrb[70].mxu0 }
0x11ec   :  { %v2593_v5 = vmul.f32 %v7408_v3, %v2586_v1  ;;  %v6894_v7 = vpop.f32.mrb[71].mxu0 }
0x11ee   :  { %v2594_v8 = vpack.c.bf16 %v2593_v5, %v2591_v4 }
0x11f0   :  { %6898 = vmatmul.mubr.msk.bf16.vlgmr.msra.gmra.mrb[68].mxu1 %vm300_vm5, %v2594_v8 }
0x11f1   :  { %6908 = vmatpush3.bf16.xpose.msra.mxu1 %v2697_v10  ;;  %6909 = vmatprep.mubr.msk.bf16.mxu1 %vm7526_vm3, %v7525_v6 }
0x11f2   :  { %6919 = vmatprep.subr.bf16.mxu1 %v7525_v6 }
0x11f8   :  { %6910 = vmatmul.mubr.msk.bf16.vlgmr.msra.gmra.mrb[72].mxu1 %vm300_vm5, %v2690_v42 }
0x11f9   :  { %6921 = vmatprep.mubr.msk.bf16.mxu1 %vm7526_vm3, %v7525_v6  ;;  %6920 = vmatpush3.bf16.msra.mxu1 %v2815_v52 }
0x11fa   :  { %6931 = vmatprep.subr.bf16.mxu1 %v7525_v6 }
0x12ba   :  { %v2682_v9 = vpop.f32.mrb[72].mxu0 }
0x12bb   :  { %v6905_v11 = vpop.f32.mrb[73].mxu0 }
0x12bc   :  { %v2685_v29 = vpop.f32.mrb[74].mxu0 }
0x12bd   :  { %v6906_v12 = vpop.f32.mrb[75].mxu0 }
0x12c3   :  { %v2635_v13 = vpop.f32.mrb[68].mxu1 }
0x12c4   :  { %v7922_v14 = vadd.f32 %v2682_v9, %v2635_v13  ;;  %v6899_v15 = vpop.f32.mrb[69].mxu1 }
0x12c5   :  { %v2638_v20 = vpop.f32.mrb[70].mxu1 }
0x12c6   :  { %v7924_v34 = vadd.f32 %v2685_v29, %v2638_v20  ;;  %v6900_v59 = vpop.f32.mrb[71].mxu1 }
0x12cb   :  { %v2733_v21 = vpop.f32.mrb[72].mxu1 }
0x12cc   :  { %v2734_v22 = vadd.f32 %v2733_v21, %v7642_v39  ;;  %v6911_v62 = vpop.f32.mrb[73].mxu1 }
0x12cd   :  { %v2736_v23 = vpop.f32.mrb[74].mxu1 }
0x12ce   :  { %v2737_v24 = vadd.f32 %v2736_v23, %v7644_v40  ;;  %v6912_v25 = vpop.f32.mrb[75].mxu1  ;;  %v2740_v30 = vsel %vm52_vm0, %v2734_v22, -inf }
0x12cf   :  { %2741 = vmax.xlane.f32.xlu0 %v2740_v30 }
0x12d0   :  { %v2743_v31 = vsel %vm52_vm0, %v2737_v24, -inf }
0x12d1   :  { %2744 = vmax.xlane.f32.xlu1 %v2743_v31 }
0x12e2   :  { %2862 = vrot.lane.b32.xlu1 %v7860_v18, %s7535_s19 }
0x12e5   :  { %2759 = vrot.lane.b32.xlu0 %v7860_v18, %s7536_s20 }
0x12e6   :  { %2860 = vrot.lane.b32.xlu1 %v7860_v18, %s7537_s21 }
0x135c   :  { %v2742_v32 = vpop.xlane.xlu0 %2741 }
0x135d   :  { %v2746_v33 = vsub.f32 %v2734_v22, %v2742_v32 }
0x135e   :  { %v2745_v35 = vpop.xlane.xlu1 %2744 }
0x135f   :  { %v2748_v37 = vmul.f32 1.442695, %v2746_v33  ;;  %v2747_v38 = vsub.f32 %v2737_v24, %v2745_v35 }
0x1360   :  { %v2760_v16 = vpop.permute.xlu0 %2759 }
0x1361   :  { %7409 = vpow2.f32 %v2748_v37  ;;  %v2750_v36 = vmul.f32 1.442695, %v2747_v38  ;;  %6914 = vmatpush3.bf16.msra.mxu0 %v2760_v16 }
0x1362   :  { %6925 = vmatprep.subr.bf16.mxu0 %v7525_v6  ;;  %v2863_v28 = vpop.permute.xlu1 %2862 }
0x1363   :  { %7411 = vpow2.f32 %v2750_v36  ;;  %v2868_v19 = vsel %vm300_vm5, %v2863_v28, 0  ;;  %v2215_v36 = vld [vmem:[#allocation2 + $0x560] sm:$0xf] }
0x1366   :  { %v2861_v48 = vpop.permute.xlu1 %2860 }
0x136b   :  { %v7410_v41 = vpop.eup %7409 }
0x136c   :  { %v2752_v42 = vsel %vm52_vm0, %v7410_v41, 0.0 }
0x136d   :  { %v7412_v43 = vpop.eup %7411  ;;  %2753 = vadd.xlane.f32.xlu0 %v2752_v42 }
0x136e   :  { %v2755_v45 = vsel %vm52_vm0, %v7412_v43, 0.0  ;;  %v2758_v46 = vpack.c.bf16 %v7412_v43, %v7410_v41  ;;  %v2986_v41 = vsel %vm544_vm14, %v2215_v36, 0 }
0x136f   :  { %2756 = vadd.xlane.f32.xlu1 %v2755_v45 }
0x1370   :  { %6916 = vmatmul.mubr.msk.bf16.vlgmr.msra.gmra.mrb[76].mxu0 %vm52_vm0, %v2758_v46 }
0x1371   :  { %6926 = vmatpush3.bf16.xpose.msra.mxu0 %v2868_v19  ;;  %6927 = vmatprep.mubr.msk.bf16.mxu0 %vm7526_vm3, %v7525_v6 }
0x1372   :  { %6937 = vmatprep.subr.bf16.mxu0 %v7525_v6 }
0x1378   :  { %6928 = vmatmul.mubr.msk.bf16.vlgmr.msra.gmra.mrb[80].mxu0 %vm300_vm5, %v2861_v48 }
0x1379   :  { %6939 = vmatprep.mubr.msk.bf16.mxu0 %vm7526_vm3, %v7525_v6  ;;  %6938 = vmatpush3.bf16.msra.mxu0 %v2986_v41 }
0x1380   :  { %2930 = vrot.lane.b32.xlu1 %v7860_v18, %s7538_s22 }
0x13fa   :  { %v2754_v44 = vpop.xlane.xlu0 %2753 }
0x13fb   :  { %7413 = vrcp.f32 %v2754_v44 }
0x13fc   :  { %v2757_v53 = vpop.xlane.xlu1 %2756 }
0x13fd   :  { %7415 = vrcp.f32 %v2757_v53 }
0x1400   :  { %v2931_v18 = vpop.permute.xlu1 %2930 }
0x1405   :  { %v7414_v57 = vpop.eup %7413 }
0x1407   :  { %v7416_v63 = vpop.eup %7415 }
0x1443   :  { %v2799_v54 = vpop.f32.mrb[76].mxu0 }
0x1444   :  { %v6917_v58 = vpop.f32.mrb[77].mxu0  ;;  %v2807_v3 = vmul.f32 %v7414_v57, %v2799_v54 }
0x1445   :  { %v2802_v2 = vpop.f32.mrb[78].mxu0 }
0x1446   :  { %v2809_v1 = vmul.f32 %v7416_v63, %v2802_v2  ;;  %v6918_v4 = vpop.f32.mrb[79].mxu0 }
0x1448   :  { %v2810_v5 = vpack.c.bf16 %v2809_v1, %v2807_v3 }
0x144a   :  { %6922 = vmatmul.mubr.msk.bf16.vlgmr.msra.gmra.mrb[76].mxu1 %vm300_vm5, %v2810_v5 }
0x144b   :  { %6932 = vmatpush3.bf16.msra.mxu1 %v2931_v18  ;;  %v2904_v7 = vpop.f32.mrb[80].mxu0  ;;  %6933 = vmatprep.mubr.msk.bf16.mxu1 %vm7526_vm3, %v7525_v6 }
0x144c   :  { %v2905_v8 = vadd.f32 %v2904_v7, %v7642_v39  ;;  %v6929_v10 = vpop.f32.mrb[81].mxu0 }
0x144d   :  { %v2907_v9 = vpop.f32.mrb[82].mxu0 }
0x144e   :  { %v2908_v11 = vadd.f32 %v2907_v9, %v7644_v40  ;;  %v6930_v29 = vpop.f32.mrb[83].mxu0  ;;  %v2911_v12 = vsel %vm52_vm0, %v2905_v8, -inf }
0x144f   :  { %2912 = vmax.xlane.f32.xlu0 %v2911_v12 }
0x1450   :  { %v2914_v13 = vsel %vm52_vm0, %v2908_v11, -inf }
0x1453   :  { %2915 = vmax.xlane.f32.xlu0 %v2914_v13 }
0x14dc   :  { %v2913_v15 = vpop.xlane.xlu0 %2912 }
0x14dd   :  { %v2917_v20 = vsub.f32 %v2905_v8, %v2913_v15 }
0x14df   :  { %v2919_v59 = vmul.f32 1.442695, %v2917_v20 }
0x14e0   :  { %v2916_v21 = vpop.xlane.xlu0 %2915 }
0x14e1   :  { %7417 = vpow2.f32 %v2919_v59  ;;  %v2918_v22 = vsub.f32 %v2908_v11, %v2916_v21  ;;  %v7159_v59 = vld [vmem:[#allocation2 + $0x94] ss:$412 sps:$4 sm:$0xff]  }
0x14e2   :  { %v7157_v21 = vld [vmem:[#allocation2 + $0x90] ss:$412 sps:$4 sm:$0xff]   ;;  %3329 = vmatprep.subr.bf16.mxu1 %v7159_v59  ;;  %v7208_v59 = vld [vmem:[#allocation2 + $0xd8] ss:$412 sps:$4 sm:$0xff]  }
0x14e3   :  { %v2921_v62 = vmul.f32 1.442695, %v2918_v22  ;;  %v7160_v22 = vld [vmem:[#allocation2 + $0x98] ss:$412 sps:$4 sm:$0xff]  }
0x14e5   :  { %7419 = vpow2.f32 %v2921_v62  ;;  %v7165_v62 = vld [vmem:[#allocation2 + $0x3cc] ss:$412 sps:$4 sm:$0xff]  }
0x14eb   :  { %v7418_v23 = vpop.eup %7417 }
0x14ec   :  { %v2923_v24 = vsel %vm52_vm0, %v7418_v23, 0.0 }
0x14ed   :  { %2924 = vadd.xlane.f32.xlu0 %v2923_v24  ;;  %v7163_v24 = vld [vmem:[#allocation2 + $0x3c8] ss:$412 sps:$4 sm:$0xff]  }
0x14ef   :  { %v7420_v25 = vpop.eup %7419 }
0x14f0   :  { %v2926_v30 = vsel %vm52_vm0, %v7420_v25, 0.0  ;;  %v2929_v31 = vpack.c.bf16 %v7420_v25, %v7418_v23  ;;  %v7168_v23 = vld [vmem:[#allocation2 + $0x3d4] ss:$412 sps:$4 sm:$0xff]  }
0x14f1   :  { %2927 = vadd.xlane.f32.xlu0 %v2926_v30  ;;  %v7166_v25 = vld [vmem:[#allocation2 + $0x3d0] ss:$412 sps:$4 sm:$0xff]   ;;  %v7171_v30 = vld [vmem:[#allocation2 + $0xa4] ss:$412 sps:$4 sm:$0xff]  }
0x14f2   :  { %6934 = vmatmul.mubr.msk.bf16.vlgmr.msra.gmra.mrb[80].mxu1 %vm52_vm0, %v2929_v31  ;;  %v7174_v31 = vld [vmem:[#allocation2 + $0xac] ss:$412 sps:$4 sm:$0xff]  }
0x14f3   :  { %3361 = vmatprep.mubr.bf16.mxu1 %v7524_v0  ;;  %3330 = vmatpush1.bf16.msra.mxu1 %v7157_v21  ;;  %v7216_v21 = vld [vmem:[#allocation2 + $0x414] ss:$412 sps:$4 sm:$0xff]  }
0x14f4   :  { %3331 = vmatprep.subr.bf16.mxu1 %v7165_v62  ;;  %v7214_v62 = vld [vmem:[#allocation2 + $0x410] ss:$412 sps:$4 sm:$0xff]  }
0x14f7   :  { %3332 = vmatpush1.bf16.msra.mxu1 %v7163_v24  ;;  %v7222_v24 = vld [vmem:[#allocation2 + $0xec] ss:$412 sps:$4 sm:$0xff]  }
0x14f8   :  { %3415 = vmatprep.subr.bf16.mxu1 %v7171_v30 }
0x151d   :  { %v2851_v32 = vpop.f32.mrb[76].mxu1 }
0x151e   :  { %v2858_v33 = vadd.f32 %v2851_v32, %v7922_v14  ;;  %v6923_v35 = vpop.f32.mrb[77].mxu1 }
0x151f   :  { %v2854_v37 = vpop.f32.mrb[78].mxu1 }
0x1520   :  { %v2859_v38 = vadd.f32 %v2854_v37, %v7924_v34  ;;  %v6924_v16 = vpop.f32.mrb[79].mxu1  ;;  %v6512_v34 = vld [vmem:[%s8283_s3 + $0x18] ss:$0 sm:$0xff] }
0x157a   :  { %v2925_v42 = vpop.xlane.xlu0 %2924 }
0x157b   :  { %7421 = vrcp.f32 %v2925_v42  ;;  %v6513_v42 = vld [vmem:[%s8283_s3 + $0x19] ss:$0 sm:$0xff] }
0x157e   :  { %v2928_v43 = vpop.xlane.xlu0 %2927 }
0x157f   :  { %7423 = vrcp.f32 %v2928_v43 }
0x1585   :  { %v7422_v45 = vpop.eup %7421 }
0x1589   :  { %v7424_v19 = vpop.eup %7423 }
0x15c5   :  { %v2970_v28 = vpop.f32.mrb[80].mxu1 }
0x15c6   :  { %v6935_v46 = vpop.f32.mrb[81].mxu1  ;;  %v2978_v51 = vmul.f32 %v7422_v45, %v2970_v28 }
0x15c7   :  { %v2973_v48 = vpop.f32.mrb[82].mxu1  ;;  %v6514_v46 = vld [vmem:[%s8283_s3 + $0x1a] ss:$0 sm:$0xff] }
0x15c8   :  { %v2980_v14 = vmul.f32 %v7424_v19, %v2973_v48  ;;  %v6936_v52 = vpop.f32.mrb[83].mxu1 }
0x15c9   :  { %v7172_v52 = vld [vmem:[#allocation2 + $0xa8] ss:$412 sps:$4 sm:$0xff]  }
0x15ca   :  { %v2981_v44 = vpack.c.bf16 %v2980_v14, %v2978_v51  ;;  %v7169_v14 = vld [vmem:[#allocation2 + $0xa0] ss:$412 sps:$4 sm:$0xff]  }
0x15cc   :  { %6940 = vmatmul.mubr.msk.bf16.vlgmr.msra.gmra.mrb[84].mxu0 %vm300_vm5, %v2981_v44 }
0x15cd   :  { %3404 = vmatprep.mubr.bf16.mxu0 %v7524_v0 }
0x169f   :  { %v3022_v53 = vpop.f32.mrb[84].mxu0 }
0x16a0   :  { %v3029_v54 = vadd.f32 %v3022_v53, %v2858_v33  ;;  %v6941_v57 = vpop.f32.mrb[85].mxu0  ;;  %v7180_v53 = vld [vmem:[#allocation2 + $0x3e4] ss:$412 sps:$4 sm:$0xff]  }
0x16a1   :  { %v3025_v58 = vpop.f32.mrb[86].mxu0  ;;  %v7178_v57 = vld [vmem:[#allocation2 + $0x3e0] ss:$412 sps:$4 sm:$0xff]  }
0x16a2   :  { %v3037_v63 = vadd.f32 %v6512_v34, %v3029_v54  ;;  %v3030_v2 = vadd.f32 %v3025_v58, %v2859_v38  ;;  %v6942_v3 = vpop.f32.mrb[87].mxu0  ;;  %v7175_v54 = vld [vmem:[#allocation2 + $0x3d8] ss:$412 sps:$4 sm:$0xff]  }
0x16a3   :  { %v7183_v58 = vld [vmem:[#allocation2 + $0xb4] ss:$412 sps:$4 sm:$0xff]  }
0x16a4   :  { %v3038_v1 = vadd.f32 %v6512_v34, %v3030_v2  ;;  %v3039_v4 = vadd.f32 %v3037_v63, %v7848_v26  ;;  %v7177_v34 = vld [vmem:[#allocation2 + $0x3dc] ss:$412 sps:$4 sm:$0xff]   ;;  %v7181_v2 = vld [vmem:[#allocation2 + $0xb0] ss:$412 sps:$4 sm:$0xff]  }
0x16a5   :  { %v7186_v63 = vld [vmem:[#allocation2 + $0xbc] ss:$412 sps:$4 sm:$0xff]  }
0x16a6   :  { %v3041_v5 = vsel %vm251_vm4, %v3039_v4, 0.0  ;;  %v3040_v18 = vadd.f32 %v3038_v1, %v7850_v27  ;;  %v7162_v27 = vld [vmem:[#allocation2 + $0x9c] ss:$412 sps:$4 sm:$0xff]   ;;  %v7189_v1 = vld [vmem:[#allocation2 + $0x3ec] ss:$412 sps:$4 sm:$0xff]  }
0x16a7   :  { %3042 = vadd.xlane.f32.xlu0 %v3041_v5  ;;  %3372 = vmatprep.subr.bf16.mxu0 %v7162_v27  ;;  %v7184_v3 = vld [vmem:[#allocation2 + $0xb8] ss:$412 sps:$4 sm:$0xff]   ;;  %v7187_v5 = vld [vmem:[#allocation2 + $0x3e8] ss:$412 sps:$4 sm:$0xff]  }
0x16a8   :  { %v3044_v7 = vsel %vm251_vm4, %v3040_v18, 0.0  ;;  %3373 = vmatpush1.bf16.msra.mxu0 %v7160_v22  ;;  %v7213_v27 = vld [vmem:[#allocation2 + $0x40c] ss:$412 sps:$4 sm:$0xff]  }
0x16a9   :  { %3374 = vmatprep.subr.bf16.mxu0 %v7168_v23  ;;  %v7211_v22 = vld [vmem:[#allocation2 + $0x408] ss:$412 sps:$4 sm:$0xff]  }
0x16aa   :  { %v7219_v23 = vld [vmem:[#allocation2 + $0xe4] ss:$412 sps:$4 sm:$0xff]  }
0x16ab   :  { %3045 = vadd.xlane.f32.xlu0 %v3044_v7  ;;  %v7195_v7 = vld [vmem:[#allocation2 + $0xc4] ss:$412 sps:$4 sm:$0xff]  }
0x16ac   :  { %3375 = vmatpush1.bf16.msra.mxu0 %v7166_v25  ;;  %v2253_v25 = vld [vmem:[%s8283_s3 + $0x1d] sm:$0xff] }
0x16ad   :  { %3458 = vmatprep.subr.bf16.mxu0 %v7174_v31  ;;  %v3089_v30 = vrot.slane %v2253_v25, %v7770_v47  ;;  %v3097_v31 = vrot.slane %v2253_v25, %v7773_v17 }
0x1734   :  { %v3043_v8 = vpop.xlane.xlu0 %3042 }
0x1735   :  { %v3047_v10 = vmul.f32 0.03125, %v3043_v8  ;;  %v7198_v8 = vld [vmem:[#allocation2 + $0xcc] ss:$412 sps:$4 sm:$0xff]  }
0x1737   :  { %v3049_v9 = vsub.f32 %v3039_v4, %v3047_v10  ;;  %v7192_v4 = vld [vmem:[#allocation2 + $0x3f4] ss:$412 sps:$4 sm:$0xff]   ;;  %v7193_v10 = vld [vmem:[#allocation2 + $0xc0] ss:$412 sps:$4 sm:$0xff]  }
0x1738   :  { %v3046_v11 = vpop.xlane.xlu0 %3045 }
0x1739   :  { %v3048_v29 = vmul.f32 0.03125, %v3046_v11  ;;  %v3051_v12 = vmul.f32 %v3049_v9, %v3049_v9  ;;  %v7201_v11 = vld [vmem:[#allocation2 + $0x3fc] ss:$412 sps:$4 sm:$0xff]  }
0x173b   :  { %v3050_v13 = vsub.f32 %v3040_v18, %v3048_v29  ;;  %v3053_v15 = vsel %vm251_vm4, %v3051_v12, 0.0  ;;  %v7190_v18 = vld [vmem:[#allocation2 + $0x3f0] ss:$412 sps:$4 sm:$0xff]   ;;  %v7204_v29 = vld [vmem:[#allocation2 + $0x404] ss:$412 sps:$4 sm:$0xff]  }
0x173c   :  { %3054 = vadd.xlane.f32.xlu1 %v3053_v15  ;;  %v7199_v12 = vld [vmem:[#allocation2 + $0x3f8] ss:$412 sps:$4 sm:$0xff]  }
0x173d   :  { %v3052_v20 = vmul.f32 %v3050_v13, %v3050_v13  ;;  %v7207_v15 = vld [vmem:[#allocation2 + $0xd4] ss:$412 sps:$4 sm:$0xff]  }
0x173f   :  { %v3056_v26 = vsel %vm251_vm4, %v3052_v20, 0.0  ;;  %v7210_v20 = vld [vmem:[#allocation2 + $0xdc] ss:$412 sps:$4 sm:$0xff]  }
0x1740   :  { %3057 = vadd.xlane.f32.xlu0 %v3056_v26  ;;  %v7205_v26 = vld [vmem:[#allocation2 + $0xd0] ss:$412 sps:$4 sm:$0xff]  }
0x17c9   :  { %v3055_v32 = vpop.xlane.xlu1 %3054 }
0x17ca   :  { %v3059_v33 = vmul.f32 0.03125, %v3055_v32  ;;  %v3093_v32 = vrot.slane %v2253_v25, %v7779_v49 }
0x17cc   :  { %v3061_v35 = vadd.f32 1e-05, %v3059_v33  ;;  %v3101_v33 = vrot.slane %v2253_v25, %v7782_v50 }
0x17cd   :  { %v3058_v37 = vpop.xlane.xlu0 %3057 }
0x17ce   :  { %7425 = vrsqrt.f32 %v3061_v35  ;;  %v3060_v38 = vmul.f32 0.03125, %v3058_v37 }
0x17d0   :  { %v3062_v16 = vadd.f32 1e-05, %v3060_v38 }
0x17d2   :  { %7427 = vrsqrt.f32 %v3062_v16 }
0x17d8   :  { %v7426_v36 = vpop.eup %7425 }
0x17d9   :  { %v3065_v41 = vmul.f32 %v7426_v36, %v3049_v9  ;;  %v7196_v9 = vld [vmem:[#allocation2 + $0xc8] ss:$412 sps:$4 sm:$0xff]  }
0x17db   :  { %v3073_v28 = vmul.f32 %v6513_v42, %v3065_v41 }
0x17dc   :  { %v7428_v43 = vpop.eup %7427 }
0x17dd   :  { %v3066_v45 = vmul.f32 %v7428_v43, %v3050_v13  ;;  %v7982_v48 = vadd.f32 %v6514_v46, %v3073_v28  ;;  %v7202_v13 = vld [vmem:[#allocation2 + $0x400] ss:$412 sps:$4 sm:$0xff]  }
0x17df   :  { %v3074_v19 = vmul.f32 %v6513_v42, %v3066_v45 }
0x17e1   :  { %v7984_v51 = vadd.f32 %v6514_v46, %v3074_v19 }
0x17e3   :  { %v3083_v44 = vpack.c.bf16 %v7984_v51, %v7982_v48 }
0x17e5   :  { %6547 = vmatmul.mubr.msk.bf16.vlgmr.msra.gmra.mrb[84].mxu1 %vm251_vm4, %v3083_v44  ;;  %6548 = vmatmul.mubr.msk.bf16.vlgmr.msra.gmra.mrb[88].mxu0 %vm251_vm4, %v3083_v44 }
0x17e6   :  { %3416 = vmatpush1.bf16.msra.mxu1 %v7169_v14  ;;  %3459 = vmatpush1.bf16.msra.mxu0 %v7172_v52 }
0x17e7   :  { %3417 = vmatprep.subr.bf16.mxu1 %v7177_v34  ;;  %3460 = vmatprep.subr.bf16.mxu0 %v7180_v53  ;;  %v3113_v34 = vrot.slane %v2253_v25, %v7792_v56 }
0x17e8   :  { %3447 = vmatprep.mubr.bf16.mxu1 %v7524_v0  ;;  %3490 = vmatprep.mubr.bf16.mxu0 %v7524_v0 }
0x17ea   :  { %3418 = vmatpush1.bf16.msra.mxu1 %v7175_v54  ;;  %3461 = vmatpush1.bf16.msra.mxu0 %v7178_v57  ;;  %v3109_v57 = vrot.slane %v2253_v25, %v7795_v60 }
0x17eb   :  { %3501 = vmatprep.subr.bf16.mxu1 %v7183_v58  ;;  %3544 = vmatprep.subr.bf16.mxu0 %v7186_v63  ;;  %v3117_v58 = vrot.slane %v2253_v25, %v7798_v61 }
0x17ed   :  { %6549 = vmatmul.mubr.msk.bf16.vlgmr.msra.gmra.mrb[88].mxu1 %vm251_vm4, %v3083_v44  ;;  %6550 = vmatmul.mubr.msk.bf16.vlgmr.msra.gmra.mrb[92].mxu0 %vm251_vm4, %v3083_v44 }
0x17ee   :  { %3502 = vmatpush1.bf16.msra.mxu1 %v7181_v2  ;;  %3545 = vmatpush1.bf16.msra.mxu0 %v7184_v3 }
0x17ef   :  { %3503 = vmatprep.subr.bf16.mxu1 %v7189_v1  ;;  %3546 = vmatprep.subr.bf16.mxu0 %v7192_v4 }
0x17f0   :  { %3533 = vmatprep.mubr.bf16.mxu1 %v7524_v0  ;;  %3576 = vmatprep.mubr.bf16.mxu0 %v7524_v0 }
0x17f2   :  { %3504 = vmatpush1.bf16.msra.mxu1 %v7187_v5  ;;  %3547 = vmatpush1.bf16.msra.mxu0 %v7190_v18 }
0x17f3   :  { %3587 = vmatprep.subr.bf16.mxu1 %v7195_v7  ;;  %3630 = vmatprep.subr.bf16.mxu0 %v7198_v8  ;;  %v8016_v8 = vld [vmem:[%s8283_s3 + $0x25] sm:$0xff] }
0x17f5   :  { %6551 = vmatmul.mubr.msk.bf16.vlgmr.msra.gmra.mrb[92].mxu1 %vm251_vm4, %v3083_v44  ;;  %6552 = vmatmul.mubr.msk.bf16.vlgmr.msra.gmra.mrb[96].mxu0 %vm251_vm4, %v3083_v44 }
0x17f6   :  { %3588 = vmatpush1.bf16.msra.mxu1 %v7193_v10  ;;  %3631 = vmatpush1.bf16.msra.mxu0 %v7196_v9 }
0x17f7   :  { %3589 = vmatprep.subr.bf16.mxu1 %v7201_v11  ;;  %3632 = vmatprep.subr.bf16.mxu0 %v7204_v29 }
0x17f8   :  { %3619 = vmatprep.mubr.bf16.mxu1 %v7524_v0  ;;  %3662 = vmatprep.mubr.bf16.mxu0 %v7524_v0 }
0x17fa   :  { %3590 = vmatpush1.bf16.msra.mxu1 %v7199_v12  ;;  %3633 = vmatpush1.bf16.msra.mxu0 %v7202_v13 }
0x17fb   :  { %3887 = vmatprep.subr.bf16.mxu1 %v7207_v15  ;;  %3928 = vmatprep.subr.bf16.mxu0 %v7210_v20  ;;  %v7217_v15 = vld [vmem:[#allocation2 + $0xe0] ss:$412 sps:$4 sm:$0xff]   ;;  %v7220_v20 = vld [vmem:[#allocation2 + $0xe8] ss:$412 sps:$4 sm:$0xff]  }
0x17fd   :  { %6553 = vmatmul.mubr.msk.bf16.vlgmr.msra.gmra.mrb[96].mxu1 %vm251_vm4, %v3083_v44  ;;  %6554 = vmatmul.mubr.msk.bf16.vlgmr.msra.gmra.mrb[100].mxu0 %vm251_vm4, %v3083_v44  ;;  %v3105_v44 = vrot.slane %v2253_v25, %v7789_v55 }
0x1803   :  { %3888 = vmatpush1.bf16.xpose.msra.mxu1 %v7205_v26  ;;  %3929 = vmatpush1.bf16.xpose.msra.mxu0 %v7208_v59 }
0x1804   :  { %3889 = vmatprep.subr.bf16.mxu1 %v7213_v27  ;;  %3930 = vmatprep.subr.bf16.mxu0 %v7216_v21 }
0x180b   :  { %3890 = vmatpush1.bf16.xpose.msra.mxu1 %v7211_v22  ;;  %3931 = vmatpush1.bf16.xpose.msra.mxu0 %v7214_v62  ;;  %v3121_v22 = vrot.slane %v8016_v8, %v7770_v47  ;;  %v7225_v62 = vld [vmem:[#allocation2 + $0x41c] ss:$412 sps:$4 sm:$0xff]  }
0x180c   :  { %3969 = vmatprep.subr.bf16.mxu1 %v7219_v23  ;;  %4010 = vmatprep.subr.bf16.mxu0 %v7222_v24  ;;  %v7228_v23 = vld [vmem:[#allocation2 + $0x424] ss:$412 sps:$4 sm:$0xff]  }
0x18b8   :  { %v3363_v35 = vpop.f32.mrb[84].mxu1  ;;  %v3406_v37 = vpop.f32.mrb[88].mxu0 }
0x18b9   :  { %v3364_v38 = vadd.f32 %v3363_v35, %v3089_v30  ;;  %v3407_v16 = vadd.f32 %v3406_v37, %v3097_v31  ;;  %v3365_v36 = vpop.f32.mrb[85].mxu1  ;;  %v3408_v41 = vpop.f32.mrb[89].mxu0 }
0x18ba   :  { %v3366_v42 = vadd.f32 %v3365_v36, %v3093_v32  ;;  %v3409_v43 = vadd.f32 %v3408_v41, %v3101_v33  ;;  %v3367_v28 = vpop.f32.mrb[86].mxu1  ;;  %v3410_v45 = vpop.f32.mrb[90].mxu0 }
0x18bb   :  { %v3368_v46 = vadd.f32 %v3367_v28, %v3089_v30  ;;  %v3411_v19 = vadd.f32 %v3410_v45, %v3097_v31  ;;  %v3369_v14 = vpop.f32.mrb[87].mxu1  ;;  %v3412_v52 = vpop.f32.mrb[91].mxu0  ;;  %v3673_v63 = vmax.f32 %v3364_v38, 0.0  ;;  %v3675_v2 = vmax.f32 %v3407_v16, 0.0 }
0x18bc   :  { %v3370_v53 = vadd.f32 %v3369_v14, %v3093_v32  ;;  %v3413_v54 = vadd.f32 %v3412_v52, %v3101_v33  ;;  %v3674_v4 = vmax.f32 %v3366_v42, 0.0  ;;  %v3676_v5 = vmax.f32 %v3409_v43, 0.0 }
0x18bd   :  { %v3689_v3 = vmax.f32 %v3368_v46, 0.0  ;;  %v3691_v1 = vmax.f32 %v3411_v19, 0.0  ;;  %v3129_v32 = vrot.slane %v8016_v8, %v7773_v17  ;;  %v3125_v16 = vrot.slane %v8016_v8, %v7779_v49 }
0x18be   :  { %v3690_v18 = vmax.f32 %v3370_v53, 0.0  ;;  %v3692_v7 = vmax.f32 %v3413_v54, 0.0  ;;  %v3133_v42 = vrot.slane %v8016_v8, %v7782_v50 }
0x18bf   :  { %v3705_v10 = vpack.c.bf16 %v3689_v3, %v3673_v63  ;;  %v3707_v9 = vpack.c.bf16 %v3691_v1, %v3675_v2  ;;  %v7223_v2 = vld [vmem:[#allocation2 + $0x418] ss:$412 sps:$4 sm:$0xff]   ;;  %v7226_v3 = vld [vmem:[#allocation2 + $0x420] ss:$412 sps:$4 sm:$0xff]  }
0x18c0   :  { %v3706_v11 = vpack.c.bf16 %v3690_v18, %v3674_v4  ;;  %v3708_v29 = vpack.c.bf16 %v3692_v7, %v3676_v5  ;;  %v3449_v12 = vpop.f32.mrb[88].mxu1  ;;  %v3492_v13 = vpop.f32.mrb[92].mxu0  ;;  %v7231_v7 = vld [vmem:[#allocation2 + $0xf4] ss:$412 sps:$4 sm:$0xff]  }
0x18c1   :  { %v3450_v26 = vadd.f32 %v3449_v12, %v3105_v44  ;;  %v3493_v59 = vadd.f32 %v3492_v13, %v3113_v34  ;;  %v3451_v27 = vpop.f32.mrb[89].mxu1  ;;  %v3494_v21 = vpop.f32.mrb[93].mxu0  ;;  %v3137_v13 = vrot.slane %v8016_v8, %v7789_v55 }
0x18c2   :  { %v3452_v24 = vadd.f32 %v3451_v27, %v3109_v57  ;;  %v3495_v25 = vadd.f32 %v3494_v21, %v3117_v58  ;;  %v3453_v30 = vpop.f32.mrb[90].mxu1  ;;  %v3496_v31 = vpop.f32.mrb[94].mxu0  ;;  %3919 = vmatprep.mubr.bf16.mxu1 %v3706_v11  ;;  %3960 = vmatprep.mubr.bf16.mxu0 %v3708_v29  ;;  %v3145_v27 = vrot.slane %v8016_v8, %v7792_v56 }
0x18c3   :  { %v3454_v33 = vadd.f32 %v3453_v30, %v3105_v44  ;;  %v3497_v35 = vadd.f32 %v3496_v31, %v3113_v34  ;;  %v3455_v37 = vpop.f32.mrb[91].mxu1  ;;  %v3498_v38 = vpop.f32.mrb[95].mxu0  ;;  %3920 = vmatmul.mubr.bf16.vlgmr.msra.gmra.mrb[100].mxu1 %v3705_v10  ;;  %3961 = vmatmul.mubr.bf16.vlgmr.msra.gmra.mrb[104].mxu0 %v3707_v9  ;;  %v3677_v43 = vmax.f32 %v3450_v26, 0.0  ;;  %v3679_v28 = vmax.f32 %v3493_v59, 0.0  ;;  %v7234_v10 = vld [vmem:[#allocation2 + $0xfc] ss:$412 sps:$4 sm:$0xff]  }
0x18c4   :  { %v3456_v36 = vadd.f32 %v3455_v37, %v3109_v57  ;;  %v3499_v41 = vadd.f32 %v3498_v38, %v3117_v58  ;;  %3970 = vmatpush1.bf16.xpose.msra.mxu1 %v7217_v15  ;;  %4011 = vmatpush1.bf16.xpose.msra.mxu0 %v7220_v20  ;;  %v3678_v19 = vmax.f32 %v3452_v24, 0.0  ;;  %v3680_v14 = vmax.f32 %v3495_v25, 0.0 }
0x18c5   :  { %v3693_v45 = vmax.f32 %v3454_v33, 0.0  ;;  %v3695_v46 = vmax.f32 %v3497_v35, 0.0  ;;  %3971 = vmatprep.subr.bf16.mxu1 %v7225_v62  ;;  %4012 = vmatprep.subr.bf16.mxu0 %v7228_v23  ;;  %v3141_v21 = vrot.slane %v8016_v8, %v7795_v60  ;;  %v3149_v24 = vrot.slane %v8016_v8, %v7798_v61 }
0x18c6   :  { %v3694_v52 = vmax.f32 %v3456_v36, 0.0  ;;  %v3696_v44 = vmax.f32 %v3499_v41, 0.0 }
0x18c7   :  { %v3709_v34 = vpack.c.bf16 %v3693_v45, %v3677_v43  ;;  %v3711_v53 = vpack.c.bf16 %v3695_v46, %v3679_v28  ;;  %v7229_v28 = vld [vmem:[#allocation2 + $0xf0] ss:$412 sps:$4 sm:$0xff]  }
0x18c8   :  { %v3710_v54 = vpack.c.bf16 %v3694_v52, %v3678_v19  ;;  %v3712_v57 = vpack.c.bf16 %v3696_v44, %v3680_v14  ;;  %v3535_v58 = vpop.f32.mrb[92].mxu1  ;;  %v3578_v63 = vpop.f32.mrb[96].mxu0  ;;  %v7232_v14 = vld [vmem:[#allocation2 + $0xf8] ss:$412 sps:$4 sm:$0xff]  }
0x18c9   :  { %v3536_v1 = vadd.f32 %v3535_v58, %v3121_v22  ;;  %v3579_v4 = vadd.f32 %v3578_v63, %v3129_v32  ;;  %v3537_v5 = vpop.f32.mrb[93].mxu1  ;;  %v3580_v18 = vpop.f32.mrb[97].mxu0  ;;  %v7237_v58 = vld [vmem:[#allocation2 + $0x42c] ss:$412 sps:$4 sm:$0xff]   ;;  %v7240_v63 = vld [vmem:[#allocation2 + $0x434] ss:$412 sps:$4 sm:$0xff]  }
0x18ca   :  { %v3538_v9 = vadd.f32 %v3537_v5, %v3125_v16  ;;  %v3581_v11 = vadd.f32 %v3580_v18, %v3133_v42  ;;  %v3539_v29 = vpop.f32.mrb[94].mxu1  ;;  %v3582_v12 = vpop.f32.mrb[98].mxu0  ;;  %4001 = vmatprep.mubr.bf16.mxu1 %v3710_v54  ;;  %4042 = vmatprep.mubr.bf16.mxu0 %v3712_v57 }
0x18cb   :  { %v3540_v15 = vadd.f32 %v3539_v29, %v3121_v22  ;;  %v3583_v20 = vadd.f32 %v3582_v12, %v3129_v32  ;;  %v3541_v26 = vpop.f32.mrb[95].mxu1  ;;  %v3584_v59 = vpop.f32.mrb[99].mxu0  ;;  %v3681_v25 = vmax.f32 %v3536_v1, 0.0  ;;  %v3683_v30 = vmax.f32 %v3579_v4, 0.0 }
0x18cc   :  { %v3542_v62 = vadd.f32 %v3541_v26, %v3125_v16  ;;  %v3585_v23 = vadd.f32 %v3584_v59, %v3133_v42  ;;  %3972 = vmatpush1.bf16.xpose.msra.mxu1 %v7223_v2  ;;  %4013 = vmatpush1.bf16.xpose.msra.mxu0 %v7226_v3  ;;  %v3682_v32 = vmax.f32 %v3538_v9, 0.0  ;;  %v3684_v33 = vmax.f32 %v3581_v11, 0.0  ;;  %v7235_v59 = vld [vmem:[#allocation2 + $0x428] ss:$412 sps:$4 sm:$0xff]  }
0x18cd   :  { %v3697_v31 = vmax.f32 %v3540_v15, 0.0  ;;  %v3699_v22 = vmax.f32 %v3583_v20, 0.0  ;;  %4051 = vmatprep.subr.bf16.mxu1 %v7231_v7  ;;  %4092 = vmatprep.subr.bf16.mxu0 %v7234_v10 }
0x18ce   :  { %v3698_v35 = vmax.f32 %v3542_v62, 0.0  ;;  %v3700_v37 = vmax.f32 %v3585_v23, 0.0  ;;  %v7246_v62 = vld [vmem:[#allocation2 + $0x10c] ss:$412 sps:$4 sm:$0xff]   ;;  %v7241_v23 = vld [vmem:[#allocation2 + $0x100] ss:$412 sps:$4 sm:$0xff]  }
0x18cf   :  { %v3713_v38 = vpack.c.bf16 %v3697_v31, %v3681_v25  ;;  %v3715_v36 = vpack.c.bf16 %v3699_v22, %v3683_v30  ;;  %v7249_v25 = vld [vmem:[#allocation2 + $0x43c] ss:$412 sps:$4 sm:$0xff]   ;;  %v7252_v30 = vld [vmem:[#allocation2 + $0x444] ss:$412 sps:$4 sm:$0xff]  }
0x18d0   :  { %v3714_v41 = vpack.c.bf16 %v3698_v35, %v3682_v32  ;;  %v3716_v16 = vpack.c.bf16 %v3700_v37, %v3684_v33  ;;  %v3621_v42 = vpop.f32.mrb[96].mxu1  ;;  %v3664_v43 = vpop.f32.mrb[100].mxu0  ;;  %v7247_v31 = vld [vmem:[#allocation2 + $0x438] ss:$412 sps:$4 sm:$0xff]   ;;  %v7250_v22 = vld [vmem:[#allocation2 + $0x440] ss:$412 sps:$4 sm:$0xff]  }
0x18d1   :  { %v3622_v45 = vadd.f32 %v3621_v42, %v3137_v13  ;;  %v3665_v46 = vadd.f32 %v3664_v43, %v3145_v27  ;;  %v3623_v8 = vpop.f32.mrb[97].mxu1  ;;  %v3666_v19 = vpop.f32.mrb[101].mxu0  ;;  %v6555_v32 = vld [vmem:[%s8283_s3 + $0x2d] ss:$0 sm:$0xff] }
0x18d2   :  { %v3624_v52 = vadd.f32 %v3623_v8, %v3141_v21  ;;  %v3667_v44 = vadd.f32 %v3666_v19, %v3149_v24  ;;  %v3625_v54 = vpop.f32.mrb[98].mxu1  ;;  %v3668_v57 = vpop.f32.mrb[102].mxu0 }
0x18d3   :  { %v3626_v2 = vadd.f32 %v3625_v54, %v3137_v13  ;;  %v3669_v3 = vadd.f32 %v3668_v57, %v3145_v27  ;;  %4002 = vmatmul.mubr.bf16.vlgmr.msra.gmra.mrb[104].mxu1 %v3709_v34  ;;  %4043 = vmatmul.mubr.bf16.vlgmr.msra.gmra.mrb[108].mxu0 %v3711_v53  ;;  %v3627_v1 = vpop.f32.mrb[99].mxu1  ;;  %v3670_v4 = vpop.f32.mrb[103].mxu0  ;;  %v3685_v7 = vmax.f32 %v3622_v45, 0.0  ;;  %v3687_v10 = vmax.f32 %v3665_v46, 0.0  ;;  %v7238_v27 = vld [vmem:[#allocation2 + $0x430] ss:$412 sps:$4 sm:$0xff]  }
0x18d4   :  { %v3628_v5 = vadd.f32 %v3627_v1, %v3141_v21  ;;  %v3671_v18 = vadd.f32 %v3670_v4, %v3149_v24  ;;  %4052 = vmatpush1.bf16.xpose.msra.mxu1 %v7229_v28  ;;  %4083 = vmatprep.mubr.bf16.mxu1 %v3714_v41  ;;  %v3686_v29 = vmax.f32 %v3624_v52, 0.0  ;;  %v3688_v12 = vmax.f32 %v3667_v44, 0.0  ;;  %v7243_v21 = vld [vmem:[#allocation2 + $0x104] ss:$412 sps:$4 sm:$0xff]  }
0x18d5   :  { %v3701_v9 = vmax.f32 %v3626_v2, 0.0  ;;  %v3703_v11 = vmax.f32 %v3669_v3, 0.0  ;;  %4093 = vmatpush1.bf16.xpose.msra.mxu0 %v7232_v14  ;;  %4124 = vmatprep.mubr.bf16.mxu0 %v3716_v16  ;;  %v7244_v24 = vld [vmem:[#allocation2 + $0x108] ss:$412 sps:$4 sm:$0xff]  }
0x18d6   :  { %v3702_v15 = vmax.f32 %v3628_v5, 0.0  ;;  %v3704_v20 = vmax.f32 %v3671_v18, 0.0  ;;  %4053 = vmatprep.subr.bf16.mxu1 %v7237_v58  ;;  %4094 = vmatprep.subr.bf16.mxu0 %v7240_v63 }
0x18d7   :  { %v3717_v34 = vpack.c.bf16 %v3701_v9, %v3685_v7  ;;  %v3719_v53 = vpack.c.bf16 %v3703_v11, %v3687_v10 }
0x18d8   :  { %v3718_v13 = vpack.c.bf16 %v3702_v15, %v3686_v29  ;;  %v3720_v26 = vpack.c.bf16 %v3704_v20, %v3688_v12 }
0x18dc   :  { %4054 = vmatpush1.bf16.xpose.msra.mxu1 %v7235_v59 }
0x18dd   :  { %4095 = vmatpush1.bf16.xpose.msra.mxu0 %v7238_v27  ;;  %4133 = vmatprep.subr.bf16.mxu1 %v7243_v21 }
0x18de   :  { %4174 = vmatprep.subr.bf16.mxu0 %v7246_v62 }
0x18e3   :  { %4084 = vmatmul.mubr.bf16.vlgmr.msra.gmra.mrb[108].mxu1 %v3713_v38 }
0x18e4   :  { %4125 = vmatmul.mubr.bf16.vlgmr.msra.gmra.mrb[112].mxu0 %v3715_v36  ;;  %4134 = vmatpush1.bf16.xpose.msra.mxu1 %v7241_v23 }
0x18e5   :  { %4165 = vmatprep.mubr.bf16.mxu1 %v3718_v13  ;;  %4175 = vmatpush1.bf16.xpose.msra.mxu0 %v7244_v24 }
0x18e6   :  { %4206 = vmatprep.mubr.bf16.mxu0 %v3720_v26  ;;  %4135 = vmatprep.subr.bf16.mxu1 %v7249_v25 }
0x18e7   :  { %4176 = vmatprep.subr.bf16.mxu0 %v7252_v30 }
0x18ec   :  { %4136 = vmatpush1.bf16.xpose.msra.mxu1 %v7247_v31 }
0x18ed   :  { %4177 = vmatpush1.bf16.xpose.msra.mxu0 %v7250_v22  ;;  %6943 = vmatprep.subr.bf16.mxu1 %v7525_v6 }
0x18ee   :  { %6951 = vmatprep.subr.bf16.mxu0 %v7525_v6 }
0x18f3   :  { %4166 = vmatmul.mubr.bf16.vlgmr.msra.gmra.mrb[112].mxu1 %v3717_v34 }
0x18f4   :  { %4207 = vmatmul.mubr.bf16.vlgmr.msra.gmra.mrb[116].mxu0 %v3719_v53  ;;  %6947 = vmatprep.mubr.msk.bf16.mxu1 %vm7526_vm3, %v7525_v6 }
0x18f5   :  { %6953 = vmatprep.mubr.msk.bf16.mxu0 %vm7526_vm3, %v7525_v6 }
0x1996   :  { %v3921_v33 = vpop.f32.mrb[100].mxu1  ;;  %v3962_v35 = vpop.f32.mrb[104].mxu0 }
0x1997   :  { %v3922_v37 = vadd.f32 %v6555_v32, %v3921_v33  ;;  %v3923_v38 = vpop.f32.mrb[101].mxu1  ;;  %v3964_v36 = vpop.f32.mrb[105].mxu0 }
0x1998   :  { %v3924_v41 = vpop.f32.mrb[102].mxu1  ;;  %v3965_v16 = vpop.f32.mrb[106].mxu0 }
0x1999   :  { %v3963_v42 = vadd.f32 %v3962_v35, %v3922_v37  ;;  %v3925_v43 = vadd.f32 %v6555_v32, %v3924_v41  ;;  %v3926_v28 = vpop.f32.mrb[103].mxu1  ;;  %v3967_v45 = vpop.f32.mrb[107].mxu0 }
0x199b   :  { %v3966_v46 = vadd.f32 %v3965_v16, %v3925_v43 }
0x19a6   :  { %v4003_v8 = vpop.f32.mrb[104].mxu1  ;;  %v4044_v19 = vpop.f32.mrb[108].mxu0 }
0x19a7   :  { %v4004_v14 = vadd.f32 %v4003_v8, %v3963_v42  ;;  %v4005_v52 = vpop.f32.mrb[105].mxu1  ;;  %v4046_v44 = vpop.f32.mrb[109].mxu0 }
0x19a8   :  { %v4006_v54 = vpop.f32.mrb[106].mxu1  ;;  %v4047_v57 = vpop.f32.mrb[110].mxu0 }
0x19a9   :  { %v4045_v58 = vadd.f32 %v4044_v19, %v4004_v14  ;;  %v4007_v63 = vadd.f32 %v4006_v54, %v3966_v46  ;;  %v4008_v2 = vpop.f32.mrb[107].mxu1  ;;  %v4049_v3 = vpop.f32.mrb[111].mxu0  ;;  %v7253_v46 = vld [vmem:[#allocation2 + $0x110] ss:$412 sps:$4 sm:$0xff]  }
0x19aa   :  { %6944 = vmatpush3.bf16.msra.mxu1 %v7253_v46 }
0x19ab   :  { %v4048_v1 = vadd.f32 %v4047_v57, %v4007_v63  ;;  %6945 = vmatprep.subr.bf16.mxu1 %v7525_v6  ;;  %v6588_v63 = vld [vmem:[%s8283_s3 + $0x1b] ss:$0 sm:$0xff] }
0x19b6   :  { %v4085_v4 = vpop.f32.mrb[108].mxu1 }
0x19b7   :  { %v4086_v5 = vadd.f32 %v4085_v4, %v4045_v58  ;;  %v4126_v18 = vpop.f32.mrb[112].mxu0  ;;  %v4087_v7 = vpop.f32.mrb[109].mxu1  ;;  %v6589_v4 = vld [vmem:[%s8283_s3 + $0x1c] ss:$0 sm:$0xff] }
0x19b8   :  { %v4128_v10 = vpop.f32.mrb[113].mxu0  ;;  %v4088_v9 = vpop.f32.mrb[110].mxu1 }
0x19b9   :  { %v4127_v11 = vadd.f32 %v4126_v18, %v4086_v5  ;;  %v4089_v29 = vadd.f32 %v4088_v9, %v4048_v1  ;;  %v4129_v12 = vpop.f32.mrb[114].mxu0  ;;  %v4090_v15 = vpop.f32.mrb[111].mxu1  ;;  %v6590_v9 = vld [vmem:[%s8283_s3 + $0x2e] ss:$0 sm:$0xff] }
0x19ba   :  { %v4131_v20 = vpop.f32.mrb[115].mxu0 }
0x19bb   :  { %v4130_v34 = vadd.f32 %v4129_v12, %v4089_v29 }
0x19c6   :  { %v4167_v53 = vpop.f32.mrb[112].mxu1 }
0x19c7   :  { %v4168_v13 = vadd.f32 %v4167_v53, %v4127_v11  ;;  %v4208_v26 = vpop.f32.mrb[116].mxu0  ;;  %v4169_v59 = vpop.f32.mrb[113].mxu1 }
0x19c8   :  { %v4210_v27 = vpop.f32.mrb[117].mxu0  ;;  %v4170_v21 = vpop.f32.mrb[114].mxu1 }
0x19c9   :  { %v4209_v62 = vadd.f32 %v4208_v26, %v4168_v13  ;;  %v4171_v23 = vadd.f32 %v4170_v21, %v4130_v34  ;;  %v4211_v24 = vpop.f32.mrb[118].mxu0  ;;  %v4172_v25 = vpop.f32.mrb[115].mxu1 }
0x19ca   :  { %v4213_v30 = vpop.f32.mrb[119].mxu0 }
0x19cb   :  { %v4212_v31 = vadd.f32 %v4211_v24, %v4171_v23  ;;  %v4215_v22 = vadd.f32 %v4209_v62, %v7982_v48 }
0x19cd   :  { %v4217_v32 = vsel %vm251_vm4, %v4215_v22, 0.0  ;;  %v4216_v33 = vadd.f32 %v4212_v31, %v7984_v51  ;;  %v7254_v51 = vld [vmem:[#allocation2 + $0x448] ss:$412 sps:$4 sm:$0xff]  }
0x19ce   :  { %4218 = vadd.xlane.f32.xlu0 %v4217_v32  ;;  %6946 = vmatpush3.bf16.msra.mxu1 %v7254_v51 }
0x19cf   :  { %v4220_v35 = vsel %vm251_vm4, %v4216_v33, 0.0  ;;  %6957 = vmatprep.subr.bf16.mxu1 %v7525_v6 }
0x19d2   :  { %4221 = vadd.xlane.f32.xlu0 %v4220_v35 }
0x1a5b   :  { %v4219_v37 = vpop.xlane.xlu0 %4218 }
0x1a5c   :  { %v4223_v38 = vmul.f32 0.03125, %v4219_v37 }
0x1a5e   :  { %v4225_v36 = vsub.f32 %v4215_v22, %v4223_v38 }
0x1a5f   :  { %v4222_v41 = vpop.xlane.xlu0 %4221 }
0x1a60   :  { %v4224_v16 = vmul.f32 0.03125, %v4222_v41  ;;  %v4227_v42 = vmul.f32 %v4225_v36, %v4225_v36 }
0x1a62   :  { %v4226_v43 = vsub.f32 %v4216_v33, %v4224_v16  ;;  %v4229_v28 = vsel %vm251_vm4, %v4227_v42, 0.0 }
0x1a63   :  { %4230 = vadd.xlane.f32.xlu0 %v4229_v28 }
0x1a64   :  { %v4228_v45 = vmul.f32 %v4226_v43, %v4226_v43 }
0x1a66   :  { %v4232_v48 = vsel %vm251_vm4, %v4228_v45, 0.0 }
0x1a67   :  { %4233 = vadd.xlane.f32.xlu0 %v4232_v48 }
0x1af0   :  { %v4231_v8 = vpop.xlane.xlu0 %4230 }
0x1af1   :  { %v4235_v19 = vmul.f32 0.03125, %v4231_v8 }
0x1af3   :  { %v4237_v14 = vadd.f32 1e-05, %v4235_v19 }
0x1af4   :  { %v4234_v52 = vpop.xlane.xlu0 %4233 }
0x1af5   :  { %7429 = vrsqrt.f32 %v4237_v14  ;;  %v4236_v44 = vmul.f32 0.03125, %v4234_v52 }
0x1af7   :  { %v4238_v54 = vadd.f32 1e-05, %v4236_v44 }
0x1af9   :  { %7431 = vrsqrt.f32 %v4238_v54 }
0x1aff   :  { %v7430_v57 = vpop.eup %7429 }
0x1b00   :  { %v4241_v58 = vmul.f32 %v7430_v57, %v4225_v36 }
0x1b02   :  { %v4249_v3 = vmul.f32 %v6588_v63, %v4241_v58 }
0x1b03   :  { %v7432_v2 = vpop.eup %7431 }
0x1b04   :  { %v4242_v1 = vmul.f32 %v7432_v2, %v4226_v43  ;;  %v8057_v18 = vadd.f32 %v6589_v4, %v4249_v3 }
0x1b06   :  { %v4250_v5 = vmul.f32 %v6588_v63, %v4242_v1 }
0x1b08   :  { %v8059_v7 = vadd.f32 %v6589_v4, %v4250_v5 }
0x1b0a   :  { %v4340_v10 = vpack.c.bf16 %v8059_v7, %v8057_v18 }
0x1b0c   :  { %6948 = vmatmul.mubr.msk.bf16.vlgmr.msra.gmra.mrb[116].mxu1 %vm251_vm4, %v4340_v10 }
0x1b0d   :  { %6959 = vmatprep.mubr.msk.bf16.mxu1 %vm7526_vm3, %v7525_v6 }
0x1bdf   :  { %v4396_v11 = vpop.f32.mrb[116].mxu1 }
0x1be0   :  { %v6949_v29 = vpop.f32.mrb[117].mxu1  ;;  %v4397_v15 = vadd.f32 %v6590_v9, %v4396_v11 }
0x1be1   :  { %v4399_v12 = vpop.f32.mrb[118].mxu1 }
0x1be2   :  { %v4400_v20 = vadd.f32 %v6590_v9, %v4399_v12  ;;  %v6950_v34 = vpop.f32.mrb[119].mxu1  ;;  %v4264_v12 = vld [vmem:[#allocation2 + $0x114] sm:$0xf] }
0x1be4   :  { %v8069_v53 = vpack.c.bf16 %v4400_v20, %v4397_v15  ;;  %v4698_v15 = vsel %vm544_vm14, %v4264_v12, 0  ;;  %v4265_v20 = vld [vmem:[#allocation2 + $0x2b0] sm:$0xf] }
0x1be5   :  { %v4651_v34 = vsel %vm544_vm14, %v4265_v20, 0 }
0x1be6   :  { %4527 = vrot.lane.b32.xlu1 %v8069_v53, %s7529_s14  ;;  %4405 = vrot.lane.b32.xlu0 %v8069_v53, %s7528_s13 }
0x1bea   :  { %4525 = vrot.lane.b32.xlu0 %v8069_v53, %s7527_s1 }
0x1c58   :  { %v4406_v13 = vpop.permute.xlu0 %4405  ;;  %v4528_v59 = vpop.permute.xlu1 %4527 }
0x1c59   :  { %v4411_v26 = vsel %vm300_vm5, %v4406_v13, 0  ;;  %v4533_v27 = vsel %vm300_vm5, %v4528_v59, 0 }
0x1c5a   :  { %6952 = vmatpush3.bf16.xpose.msra.mxu0 %v4411_v26 }
0x1c5b   :  { %6963 = vmatprep.subr.bf16.mxu0 %v7525_v6 }
0x1c5c   :  { %v4526_v21 = vpop.permute.xlu0 %4525 }
0x1c61   :  { %6954 = vmatmul.mubr.msk.bf16.vlgmr.msra.gmra.mrb[120].mxu0 %vm300_vm5, %v8069_v53 }
0x1c62   :  { %6964 = vmatpush3.bf16.xpose.msra.mxu0 %v4533_v27  ;;  %6965 = vmatprep.mubr.msk.bf16.mxu0 %vm7526_vm3, %v7525_v6 }
0x1c63   :  { %6975 = vmatprep.subr.bf16.mxu0 %v7525_v6 }
0x1c69   :  { %6966 = vmatmul.mubr.msk.bf16.vlgmr.msra.gmra.mrb[124].mxu0 %vm300_vm5, %v4526_v21 }
0x1c6a   :  { %6977 = vmatprep.mubr.msk.bf16.mxu0 %vm7526_vm3, %v7525_v6  ;;  %6976 = vmatpush3.bf16.msra.mxu0 %v4651_v34 }
0x1c6b   :  { %6987 = vmatprep.subr.bf16.mxu0 %v7525_v6 }
0x1d34   :  { %v4447_v62 = vpop.f32.mrb[120].mxu0 }
0x1d35   :  { %v4448_v23 = vadd.f32 %v4447_v62, %v7642_v39  ;;  %v6955_v24 = vpop.f32.mrb[121].mxu0 }
0x1d36   :  { %v4450_v25 = vpop.f32.mrb[122].mxu0 }
0x1d37   :  { %v4451_v30 = vadd.f32 %v4450_v25, %v7644_v40  ;;  %v6956_v31 = vpop.f32.mrb[123].mxu0  ;;  %v4454_v22 = vsel %vm52_vm0, %v4448_v23, -inf }
0x1d38   :  { %4455 = vmax.xlane.f32.xlu0 %v4454_v22 }
0x1d39   :  { %v4457_v32 = vsel %vm52_vm0, %v4451_v30, -inf }
0x1d3a   :  { %4458 = vmax.xlane.f32.xlu1 %v4457_v32 }
0x1d3c   :  { %v4569_v33 = vpop.f32.mrb[124].mxu0 }
0x1d3d   :  { %v4570_v35 = vadd.f32 %v4569_v33, %v7642_v39  ;;  %v6967_v37 = vpop.f32.mrb[125].mxu0 }
0x1d3e   :  { %v4572_v38 = vpop.f32.mrb[126].mxu0 }
0x1d3f   :  { %v4573_v36 = vadd.f32 %v4572_v38, %v7644_v40  ;;  %v6968_v41 = vpop.f32.mrb[127].mxu0  ;;  %v4576_v16 = vsel %vm52_vm0, %v4570_v35, -inf }
0x1d40   :  { %4577 = vmax.xlane.f32.xlu0 %v4576_v16 }
0x1d41   :  { %v4579_v42 = vsel %vm52_vm0, %v4573_v36, -inf }
0x1d44   :  { %4580 = vmax.xlane.f32.xlu0 %v4579_v42 }
0x1d4b   :  { %4595 = vrot.lane.b32.xlu1 %v8069_v53, %s7531_s15 }
0x1d5a   :  { %4473 = vrot.lane.b32.xlu0 %v8069_v53, %s7532_s16 }
0x1dc5   :  { %v4456_v43 = vpop.xlane.xlu0 %4455 }
0x1dc6   :  { %v4460_v28 = vsub.f32 %v4448_v23, %v4456_v43 }
0x1dc7   :  { %v4459_v45 = vpop.xlane.xlu1 %4458 }
0x1dc8   :  { %v4462_v48 = vmul.f32 1.442695, %v4460_v28  ;;  %v4461_v46 = vsub.f32 %v4451_v30, %v4459_v45 }
0x1dca   :  { %v4464_v51 = vmul.f32 1.442695, %v4461_v46  ;;  %7433 = vpow2.f32 %v4462_v48 }
0x1dcb   :  { %v4596_v3 = vpop.permute.xlu1 %4595 }
0x1dcc   :  { %7435 = vpow2.f32 %v4464_v51 }
0x1dcd   :  { %v4578_v8 = vpop.xlane.xlu0 %4577 }
0x1dce   :  { %v4582_v19 = vsub.f32 %v4570_v35, %v4578_v8 }
0x1dd0   :  { %v4584_v14 = vmul.f32 1.442695, %v4582_v19 }
0x1dd1   :  { %v4581_v52 = vpop.xlane.xlu0 %4580 }
0x1dd2   :  { %7437 = vpow2.f32 %v4584_v14  ;;  %v4583_v44 = vsub.f32 %v4573_v36, %v4581_v52 }
0x1dd4   :  { %v4586_v54 = vmul.f32 1.442695, %v4583_v44  ;;  %v7434_v57 = vpop.eup %7433 }
0x1dd5   :  { %v4474_v58 = vpop.permute.xlu0 %4473  ;;  %v4466_v11 = vsel %vm52_vm0, %v7434_v57, 0.0 }
0x1dd6   :  { %v7436_v63 = vpop.eup %7435  ;;  %7439 = vpow2.f32 %v4586_v54  ;;  %6958 = vmatpush3.bf16.msra.mxu1 %v4474_v58 }
0x1dd7   :  { %v4472_v2 = vpack.c.bf16 %v7436_v63, %v7434_v57  ;;  %6969 = vmatprep.subr.bf16.mxu1 %v7525_v6  ;;  %v4469_v29 = vsel %vm52_vm0, %v7436_v63, 0.0 }
0x1dd9   :  { %6960 = vmatmul.mubr.msk.bf16.vlgmr.msra.gmra.mrb[120].mxu1 %vm52_vm0, %v4472_v2 }
0x1dda   :  { %6970 = vmatpush3.bf16.msra.mxu1 %v4596_v3  ;;  %6971 = vmatprep.mubr.msk.bf16.mxu1 %vm7526_vm3, %v7525_v6 }
0x1ddb   :  { %6981 = vmatprep.subr.bf16.mxu1 %v7525_v6 }
0x1ddc   :  { %v7438_v1 = vpop.eup %7437 }
0x1ddd   :  { %v4588_v4 = vsel %vm52_vm0, %v7438_v1, 0.0 }
0x1dde   :  { %4589 = vadd.xlane.f32.xlu1 %v4588_v4 }
0x1de0   :  { %v7440_v5 = vpop.eup %7439 }
0x1de1   :  { %v4591_v10 = vsel %vm52_vm0, %v7440_v5, 0.0  ;;  %v4594_v9 = vpack.c.bf16 %v7440_v5, %v7438_v1 }
0x1de2   :  { %4592 = vadd.xlane.f32.xlu0 %v4591_v10 }
0x1de3   :  { %6972 = vmatmul.mubr.msk.bf16.vlgmr.msra.gmra.mrb[124].mxu1 %vm52_vm0, %v4594_v9 }
0x1de4   :  { %6983 = vmatprep.mubr.msk.bf16.mxu1 %vm7526_vm3, %v7525_v6  ;;  %6982 = vmatpush3.bf16.msra.mxu1 %v4698_v15 }
0x1de5   :  { %6993 = vmatprep.subr.bf16.mxu1 %v7525_v6 }
0x1def   :  { %4741 = vrot.lane.b32.xlu1 %v8069_v53, %s7533_s17 }
0x1df8   :  { %4743 = vrot.lane.b32.xlu0 %v8069_v53, %s7534_s18 }
0x1e13   :  { %4467 = vadd.xlane.f32.xlu1 %v4466_v11 }
0x1e17   :  { %4470 = vadd.xlane.f32.xlu0 %v4469_v29 }
0x1e6b   :  { %v4590_v13 = vpop.xlane.xlu1 %4589 }
0x1e6f   :  { %v4593_v26 = vpop.xlane.xlu0 %4592  ;;  %v4742_v59 = vpop.permute.xlu1 %4741 }
0x1e73   :  { %v4744_v27 = vpop.permute.xlu0 %4743 }
0x1e74   :  { %v4749_v48 = vsel %vm300_vm5, %v4744_v27, 0 }
0x1ea0   :  { %v4468_v21 = vpop.xlane.xlu1 %4467 }
0x1ea1   :  { %7441 = vrcp.f32 %v4468_v21 }
0x1ea4   :  { %v4471_v62 = vpop.xlane.xlu0 %4470 }
0x1ea5   :  { %7443 = vrcp.f32 %v4471_v62 }
0x1ea6   :  { %7445 = vrcp.f32 %v4590_v13 }
0x1ea7   :  { %7447 = vrcp.f32 %v4593_v26 }
0x1eab   :  { %v7442_v24 = vpop.eup %7441 }
0x1eac   :  { %v4513_v23 = vpop.f32.mrb[120].mxu1 }
0x1ead   :  { %v6961_v25 = vpop.f32.mrb[121].mxu1  ;;  %v4521_v32 = vmul.f32 %v7442_v24, %v4513_v23 }
0x1eae   :  { %v4516_v30 = vpop.f32.mrb[122].mxu1 }
0x1eaf   :  { %v7444_v31 = vpop.eup %7443  ;;  %v6962_v22 = vpop.f32.mrb[123].mxu1 }
0x1eb0   :  { %v4523_v33 = vmul.f32 %v7444_v31, %v4516_v30  ;;  %v7446_v38 = vpop.eup %7445  ;;  %v4266_v30 = vld [vmem:[#allocation2 + $0x44c] sm:$0xf] }
0x1eb1   :  { %v7448_v41 = vpop.eup %7447  ;;  %v4867_v31 = vsel %vm544_vm14, %v4266_v30, 0 }
0x1eb2   :  { %v4524_v35 = vpack.c.bf16 %v4523_v33, %v4521_v32 }
0x1eb4   :  { %6984 = vmatmul.mubr.msk.bf16.vlgmr.msra.gmra.mrb[128].mxu1 %vm300_vm5, %v4524_v35 }
0x1eb5   :  { %6995 = vmatprep.mubr.msk.bf16.mxu1 %vm7526_vm3, %v7525_v6 }
0x1eb6   :  { %v4635_v37 = vpop.f32.mrb[124].mxu1 }
0x1eb7   :  { %v6973_v36 = vpop.f32.mrb[125].mxu1  ;;  %v4643_v42 = vmul.f32 %v7446_v38, %v4635_v37 }
0x1eb8   :  { %v4638_v16 = vpop.f32.mrb[126].mxu1 }
0x1eb9   :  { %v4645_v43 = vmul.f32 %v7448_v41, %v4638_v16  ;;  %v6974_v28 = vpop.f32.mrb[127].mxu1 }
0x1ebb   :  { %v4646_v45 = vpack.c.bf16 %v4645_v43, %v4643_v42 }
0x1ebd   :  { %6978 = vmatmul.mubr.msk.bf16.vlgmr.msra.gmra.mrb[128].mxu0 %vm300_vm5, %v4646_v45 }
0x1ebe   :  { %6988 = vmatpush3.bf16.xpose.msra.mxu0 %v4749_v48  ;;  %6989 = vmatprep.mubr.msk.bf16.mxu0 %vm7526_vm3, %v7525_v6 }
0x1ebf   :  { %6999 = vmatprep.subr.bf16.mxu0 %v7525_v6 }
0x1ec5   :  { %6990 = vmatmul.mubr.msk.bf16.vlgmr.msra.gmra.mrb[132].mxu0 %vm300_vm5, %v4742_v59 }
0x1ec6   :  { %7001 = vmatprep.mubr.msk.bf16.mxu0 %vm7526_vm3, %v7525_v6  ;;  %7000 = vmatpush3.bf16.msra.mxu0 %v4867_v31 }
0x1ec7   :  { %7011 = vmatprep.subr.bf16.mxu0 %v7525_v6 }
0x1f87   :  { %v4734_v46 = vpop.f32.mrb[128].mxu1 }
0x1f88   :  { %v6985_v51 = vpop.f32.mrb[129].mxu1 }
0x1f89   :  { %v4737_v8 = vpop.f32.mrb[130].mxu1 }
0x1f8a   :  { %v6986_v19 = vpop.f32.mrb[131].mxu1 }
0x1f90   :  { %v4687_v14 = vpop.f32.mrb[128].mxu0 }
0x1f91   :  { %v8131_v52 = vadd.f32 %v4734_v46, %v4687_v14  ;;  %v6979_v44 = vpop.f32.mrb[129].mxu0 }
0x1f92   :  { %v4690_v54 = vpop.f32.mrb[130].mxu0 }
0x1f93   :  { %v8133_v57 = vadd.f32 %v4737_v8, %v4690_v54  ;;  %v6980_v58 = vpop.f32.mrb[131].mxu0 }
0x1f98   :  { %v4785_v63 = vpop.f32.mrb[132].mxu0 }
0x1f99   :  { %v4786_v2 = vadd.f32 %v4785_v63, %v7642_v39  ;;  %v6991_v3 = vpop.f32.mrb[133].mxu0 }
0x1f9a   :  { %v4788_v1 = vpop.f32.mrb[134].mxu0 }
0x1f9b   :  { %v4789_v4 = vadd.f32 %v4788_v1, %v7644_v40  ;;  %v6992_v5 = vpop.f32.mrb[135].mxu0  ;;  %v4792_v10 = vsel %vm52_vm0, %v4786_v2, -inf }
0x1f9c   :  { %4793 = vmax.xlane.f32.xlu0 %v4792_v10 }
0x1f9d   :  { %v4795_v9 = vsel %vm52_vm0, %v4789_v4, -inf }
0x1f9e   :  { %4796 = vmax.xlane.f32.xlu1 %v4795_v9 }
0x1faf   :  { %4914 = vrot.lane.b32.xlu1 %v8069_v53, %s7535_s19 }
0x1fb2   :  { %4811 = vrot.lane.b32.xlu0 %v8069_v53, %s7536_s20 }
0x1fb3   :  { %4912 = vrot.lane.b32.xlu1 %v8069_v53, %s7537_s21 }
0x2029   :  { %v4794_v11 = vpop.xlane.xlu0 %4793 }
0x202a   :  { %v4798_v29 = vsub.f32 %v4786_v2, %v4794_v11 }
0x202b   :  { %v4797_v12 = vpop.xlane.xlu1 %4796 }
0x202c   :  { %v4800_v15 = vmul.f32 1.442695, %v4798_v29  ;;  %v4799_v20 = vsub.f32 %v4789_v4, %v4797_v12 }
0x202d   :  { %v4812_v34 = vpop.permute.xlu0 %4811 }
0x202e   :  { %7449 = vpow2.f32 %v4800_v15  ;;  %v4802_v13 = vmul.f32 1.442695, %v4799_v20  ;;  %6994 = vmatpush3.bf16.msra.mxu1 %v4812_v34  ;;  %v4267_v20 = vld [vmem:[#allocation2 + $0x5e8] sm:$0xf] }
0x202f   :  { %7005 = vmatprep.subr.bf16.mxu1 %v7525_v6  ;;  %v4915_v21 = vpop.permute.xlu1 %4914  ;;  %v5038_v34 = vsel %vm544_vm14, %v4267_v20, 0  ;;  %v6607_v20 = vld [vmem:[%s8283_s3 + $0x30] ss:$0 sm:$0xff] }
0x2030   :  { %7451 = vpow2.f32 %v4802_v13  ;;  %v4920_v24 = vsel %vm300_vm5, %v4915_v21, 0 }
0x2033   :  { %v4913_v25 = vpop.permute.xlu1 %4912 }
0x2038   :  { %v7450_v26 = vpop.eup %7449 }
0x2039   :  { %v4804_v59 = vsel %vm52_vm0, %v7450_v26, 0.0 }
0x203a   :  { %v7452_v27 = vpop.eup %7451  ;;  %4805 = vadd.xlane.f32.xlu0 %v4804_v59 }
0x203b   :  { %v4807_v62 = vsel %vm52_vm0, %v7452_v27, 0.0  ;;  %v4810_v23 = vpack.c.bf16 %v7452_v27, %v7450_v26 }
0x203c   :  { %4808 = vadd.xlane.f32.xlu1 %v4807_v62 }
0x203d   :  { %6996 = vmatmul.mubr.msk.bf16.vlgmr.msra.gmra.mrb[132].mxu1 %vm52_vm0, %v4810_v23 }
0x203e   :  { %7006 = vmatpush3.bf16.xpose.msra.mxu1 %v4920_v24  ;;  %7007 = vmatprep.mubr.msk.bf16.mxu1 %vm7526_vm3, %v7525_v6 }
0x203f   :  { %7017 = vmatprep.subr.bf16.mxu1 %v7525_v6 }
0x2045   :  { %7008 = vmatmul.mubr.msk.bf16.vlgmr.msra.gmra.mrb[136].mxu1 %vm300_vm5, %v4913_v25 }
0x2046   :  { %7019 = vmatprep.mubr.msk.bf16.mxu1 %vm7526_vm3, %v7525_v6  ;;  %7018 = vmatpush3.bf16.msra.mxu1 %v5038_v34 }
0x204d   :  { %4982 = vrot.lane.b32.xlu1 %v8069_v53, %s7538_s22 }
0x20c7   :  { %v4806_v22 = vpop.xlane.xlu0 %4805 }
0x20c8   :  { %7453 = vrcp.f32 %v4806_v22 }
0x20c9   :  { %v4809_v32 = vpop.xlane.xlu1 %4808 }
0x20ca   :  { %7455 = vrcp.f32 %v4809_v32 }
0x20cd   :  { %v4983_v53 = vpop.permute.xlu1 %4982 }
0x20d2   :  { %v7454_v35 = vpop.eup %7453 }
0x20d4   :  { %v7456_v38 = vpop.eup %7455 }
0x2110   :  { %v4851_v33 = vpop.f32.mrb[132].mxu1 }
0x2111   :  { %v6997_v37 = vpop.f32.mrb[133].mxu1  ;;  %v4859_v41 = vmul.f32 %v7454_v35, %v4851_v33 }
0x2112   :  { %v4854_v36 = vpop.f32.mrb[134].mxu1 }
0x2113   :  { %v4861_v16 = vmul.f32 %v7456_v38, %v4854_v36  ;;  %v6998_v42 = vpop.f32.mrb[135].mxu1 }
0x2115   :  { %v4862_v43 = vpack.c.bf16 %v4861_v16, %v4859_v41 }
0x2117   :  { %7002 = vmatmul.mubr.msk.bf16.vlgmr.msra.gmra.mrb[136].mxu0 %vm300_vm5, %v4862_v43 }
0x2118   :  { %7012 = vmatpush3.bf16.msra.mxu0 %v4983_v53  ;;  %v4956_v28 = vpop.f32.mrb[136].mxu1  ;;  %7013 = vmatprep.mubr.msk.bf16.mxu0 %vm7526_vm3, %v7525_v6 }
0x2119   :  { %v4957_v45 = vadd.f32 %v4956_v28, %v7642_v39  ;;  %v7009_v48 = vpop.f32.mrb[137].mxu1 }
0x211a   :  { %v4959_v46 = vpop.f32.mrb[138].mxu1 }
0x211b   :  { %v4960_v51 = vadd.f32 %v4959_v46, %v7644_v40  ;;  %v7010_v8 = vpop.f32.mrb[139].mxu1  ;;  %v4963_v19 = vsel %vm52_vm0, %v4957_v45, -inf }
0x211c   :  { %4964 = vmax.xlane.f32.xlu0 %v4963_v19 }
0x211d   :  { %v4966_v14 = vsel %vm52_vm0, %v4960_v51, -inf }
0x2120   :  { %4967 = vmax.xlane.f32.xlu0 %v4966_v14 }
0x21a9   :  { %v4965_v44 = vpop.xlane.xlu0 %4964 }
0x21aa   :  { %v4969_v54 = vsub.f32 %v4957_v45, %v4965_v44  ;;  %v7257_v44 = vld [vmem:[#allocation2 + $0x11c] ss:$412 sps:$4 sm:$0xff]  }
0x21ab   :  { %5381 = vmatprep.subr.bf16.mxu0 %v7257_v44  ;;  %v7314_v44 = vld [vmem:[#allocation2 + $0x49c] ss:$412 sps:$4 sm:$0xff]  }
0x21ac   :  { %v4971_v58 = vmul.f32 1.442695, %v4969_v54  ;;  %v7255_v54 = vld [vmem:[#allocation2 + $0x118] ss:$412 sps:$4 sm:$0xff]  }
0x21ad   :  { %v4968_v63 = vpop.xlane.xlu0 %4967 }
0x21ae   :  { %7457 = vpow2.f32 %v4971_v58  ;;  %v4970_v2 = vsub.f32 %v4960_v51, %v4968_v63  ;;  %v7258_v58 = vld [vmem:[#allocation2 + $0x120] ss:$412 sps:$4 sm:$0xff]   ;;  %v7263_v63 = vld [vmem:[#allocation2 + $0x454] ss:$412 sps:$4 sm:$0xff]  }
0x21b0   :  { %v4973_v3 = vmul.f32 1.442695, %v4970_v2  ;;  %v7266_v2 = vld [vmem:[#allocation2 + $0x45c] ss:$412 sps:$4 sm:$0xff]  }
0x21b2   :  { %7459 = vpow2.f32 %v4973_v3  ;;  %v7261_v3 = vld [vmem:[#allocation2 + $0x450] ss:$412 sps:$4 sm:$0xff]  }
0x21b8   :  { %v7458_v39 = vpop.eup %7457 }
0x21b9   :  { %v4975_v1 = vsel %vm52_vm0, %v7458_v39, 0.0 }
0x21ba   :  { %4976 = vadd.xlane.f32.xlu0 %v4975_v1  ;;  %v7269_v1 = vld [vmem:[#allocation2 + $0x12c] ss:$412 sps:$4 sm:$0xff]  }
0x21bc   :  { %v7460_v40 = vpop.eup %7459 }
0x21bd   :  { %v4978_v4 = vsel %vm52_vm0, %v7460_v40, 0.0  ;;  %v4981_v5 = vpack.c.bf16 %v7460_v40, %v7458_v39  ;;  %v7264_v39 = vld [vmem:[#allocation2 + $0x458] ss:$412 sps:$4 sm:$0xff]  }
0x21be   :  { %4979 = vadd.xlane.f32.xlu0 %v4978_v4  ;;  %v7272_v40 = vld [vmem:[#allocation2 + $0x134] ss:$412 sps:$4 sm:$0xff]  }
0x21bf   :  { %7014 = vmatmul.mubr.msk.bf16.vlgmr.msra.gmra.mrb[140].mxu0 %vm52_vm0, %v4981_v5 }
0x21c0   :  { %5413 = vmatprep.mubr.bf16.mxu0 %v7524_v0  ;;  %5382 = vmatpush1.bf16.msra.mxu0 %v7255_v54  ;;  %v7312_v54 = vld [vmem:[#allocation2 + $0x498] ss:$412 sps:$4 sm:$0xff]  }
0x21c1   :  { %5383 = vmatprep.subr.bf16.mxu0 %v7263_v63  ;;  %v4305_v63 = vld [vmem:[%s8283_s3 + $0x34] sm:$0xff] }
0x21c4   :  { %5384 = vmatpush1.bf16.msra.mxu0 %v7261_v3  ;;  %v5149_v3 = vrot.slane %v4305_v63, %v7773_v17 }
0x21c5   :  { %5467 = vmatprep.subr.bf16.mxu0 %v7269_v1  ;;  %v5153_v1 = vrot.slane %v4305_v63, %v7782_v50 }
0x21ea   :  { %v4903_v10 = vpop.f32.mrb[136].mxu0 }
0x21eb   :  { %v4910_v9 = vadd.f32 %v4903_v10, %v8131_v52  ;;  %v7003_v11 = vpop.f32.mrb[137].mxu0 }
0x21ec   :  { %v4906_v29 = vpop.f32.mrb[138].mxu0 }
0x21ed   :  { %v4911_v12 = vadd.f32 %v4906_v29, %v8133_v57  ;;  %v7004_v15 = vpop.f32.mrb[139].mxu0  ;;  %v6606_v57 = vld [vmem:[%s8283_s3 + $0x2f] ss:$0 sm:$0xff] }
0x2247   :  { %v4977_v13 = vpop.xlane.xlu0 %4976 }
0x2248   :  { %7461 = vrcp.f32 %v4977_v13 }
0x224b   :  { %v4980_v26 = vpop.xlane.xlu0 %4979 }
0x224c   :  { %7463 = vrcp.f32 %v4980_v26 }
0x2252   :  { %v7462_v27 = vpop.eup %7461 }
0x2256   :  { %v7464_v62 = vpop.eup %7463 }
0x2292   :  { %v5022_v59 = vpop.f32.mrb[140].mxu0 }
0x2293   :  { %v7015_v21 = vpop.f32.mrb[141].mxu0  ;;  %v5030_v24 = vmul.f32 %v7462_v27, %v5022_v59  ;;  %v6608_v59 = vld [vmem:[%s8283_s3 + $0x31] ss:$0 sm:$0xff] }
0x2294   :  { %v5025_v23 = vpop.f32.mrb[142].mxu0 }
0x2295   :  { %v5032_v52 = vmul.f32 %v7464_v62, %v5025_v23  ;;  %v7016_v25 = vpop.f32.mrb[143].mxu0  ;;  %v7267_v23 = vld [vmem:[#allocation2 + $0x128] ss:$412 sps:$4 sm:$0xff]  }
0x2296   :  { %v7275_v25 = vld [vmem:[#allocation2 + $0x464] ss:$412 sps:$4 sm:$0xff]  }
0x2297   :  { %v5033_v30 = vpack.c.bf16 %v5032_v52, %v5030_v24  ;;  %v7270_v24 = vld [vmem:[#allocation2 + $0x130] ss:$412 sps:$4 sm:$0xff]  }
0x2299   :  { %7020 = vmatmul.mubr.msk.bf16.vlgmr.msra.gmra.mrb[140].mxu1 %vm300_vm5, %v5033_v30  ;;  %v7278_v30 = vld [vmem:[#allocation2 + $0x46c] ss:$412 sps:$4 sm:$0xff]  }
0x229a   :  { %5456 = vmatprep.mubr.bf16.mxu1 %v7524_v0 }
0x236c   :  { %v5074_v31 = vpop.f32.mrb[140].mxu1 }
0x236d   :  { %v5081_v22 = vadd.f32 %v5074_v31, %v4910_v9  ;;  %v7021_v32 = vpop.f32.mrb[141].mxu1  ;;  %v7276_v31 = vld [vmem:[#allocation2 + $0x468] ss:$412 sps:$4 sm:$0xff]  }
0x236e   :  { %v5077_v33 = vpop.f32.mrb[142].mxu1  ;;  %v7284_v32 = vld [vmem:[#allocation2 + $0x144] ss:$412 sps:$4 sm:$0xff]  }
0x236f   :  { %v5089_v35 = vadd.f32 %v6606_v57, %v5081_v22  ;;  %v5082_v37 = vadd.f32 %v5077_v33, %v4911_v12  ;;  %v7022_v38 = vpop.f32.mrb[143].mxu1  ;;  %v7281_v22 = vld [vmem:[#allocation2 + $0x13c] ss:$412 sps:$4 sm:$0xff]  }
0x2370   :  { %v7279_v33 = vld [vmem:[#allocation2 + $0x138] ss:$412 sps:$4 sm:$0xff]  }
0x2371   :  { %v5090_v36 = vadd.f32 %v6606_v57, %v5082_v37  ;;  %v5091_v41 = vadd.f32 %v5089_v35, %v8057_v18  ;;  %v7273_v57 = vld [vmem:[#allocation2 + $0x460] ss:$412 sps:$4 sm:$0xff]   ;;  %v7287_v37 = vld [vmem:[#allocation2 + $0x474] ss:$412 sps:$4 sm:$0xff]  }
0x2372   :  { %v7282_v35 = vld [vmem:[#allocation2 + $0x140] ss:$412 sps:$4 sm:$0xff]  }
0x2373   :  { %v5093_v16 = vsel %vm251_vm4, %v5091_v41, 0.0  ;;  %v5092_v42 = vadd.f32 %v5090_v36, %v8059_v7  ;;  %v7260_v7 = vld [vmem:[#allocation2 + $0x124] ss:$412 sps:$4 sm:$0xff]   ;;  %v7290_v38 = vld [vmem:[#allocation2 + $0x47c] ss:$412 sps:$4 sm:$0xff]  }
0x2374   :  { %5094 = vadd.xlane.f32.xlu0 %v5093_v16  ;;  %5424 = vmatprep.subr.bf16.mxu1 %v7260_v7  ;;  %v7285_v36 = vld [vmem:[#allocation2 + $0x470] ss:$412 sps:$4 sm:$0xff]  }
0x2375   :  { %v5096_v43 = vsel %vm251_vm4, %v5092_v42, 0.0  ;;  %5425 = vmatpush1.bf16.msra.mxu1 %v7258_v58  ;;  %v7293_v16 = vld [vmem:[#allocation2 + $0x14c] ss:$412 sps:$4 sm:$0xff]   ;;  %v7320_v58 = vld [vmem:[#allocation2 + $0x174] ss:$412 sps:$4 sm:$0xff]  }
0x2376   :  { %5426 = vmatprep.subr.bf16.mxu1 %v7266_v2  ;;  %v7309_v7 = vld [vmem:[#allocation2 + $0x490] ss:$412 sps:$4 sm:$0xff]   ;;  %v5141_v2 = vrot.slane %v4305_v63, %v7770_v47 }
0x2378   :  { %5097 = vadd.xlane.f32.xlu0 %v5096_v43  ;;  %v7291_v43 = vld [vmem:[#allocation2 + $0x148] ss:$412 sps:$4 sm:$0xff]  }
0x2379   :  { %5427 = vmatpush1.bf16.msra.mxu1 %v7264_v39  ;;  %v5145_v39 = vrot.slane %v4305_v63, %v7779_v49 }
0x237a   :  { %5510 = vmatprep.subr.bf16.mxu1 %v7272_v40 }
0x2401   :  { %v5095_v53 = vpop.xlane.xlu0 %5094 }
0x2402   :  { %v5099_v28 = vmul.f32 0.03125, %v5095_v53  ;;  %v7294_v53 = vld [vmem:[#allocation2 + $0x150] ss:$412 sps:$4 sm:$0xff]  }
0x2404   :  { %v5101_v45 = vsub.f32 %v5091_v41, %v5099_v28  ;;  %v7288_v41 = vld [vmem:[#allocation2 + $0x478] ss:$412 sps:$4 sm:$0xff]   ;;  %v7299_v28 = vld [vmem:[#allocation2 + $0x484] ss:$412 sps:$4 sm:$0xff]  }
0x2405   :  { %v5098_v48 = vpop.xlane.xlu0 %5097 }
0x2406   :  { %v5100_v46 = vmul.f32 0.03125, %v5098_v48  ;;  %v5103_v51 = vmul.f32 %v5101_v45, %v5101_v45  ;;  %v7297_v48 = vld [vmem:[#allocation2 + $0x480] ss:$412 sps:$4 sm:$0xff]  }
0x2408   :  { %v5102_v8 = vsub.f32 %v5092_v42, %v5100_v46  ;;  %v5105_v19 = vsel %vm251_vm4, %v5103_v51, 0.0  ;;  %v7296_v42 = vld [vmem:[#allocation2 + $0x154] ss:$412 sps:$4 sm:$0xff]   ;;  %v7300_v46 = vld [vmem:[#allocation2 + $0x488] ss:$412 sps:$4 sm:$0xff]  }
0x2409   :  { %5106 = vadd.xlane.f32.xlu0 %v5105_v19  ;;  %v7305_v51 = vld [vmem:[#allocation2 + $0x15c] ss:$412 sps:$4 sm:$0xff]  }
0x240a   :  { %v5104_v14 = vmul.f32 %v5102_v8, %v5102_v8  ;;  %v7303_v19 = vld [vmem:[#allocation2 + $0x158] ss:$412 sps:$4 sm:$0xff]  }
0x240c   :  { %v5108_v18 = vsel %vm251_vm4, %v5104_v14, 0.0  ;;  %v7306_v14 = vld [vmem:[#allocation2 + $0x160] ss:$412 sps:$4 sm:$0xff]  }
0x240d   :  { %5109 = vadd.xlane.f32.xlu1 %v5108_v18  ;;  %v7311_v18 = vld [vmem:[#allocation2 + $0x494] ss:$412 sps:$4 sm:$0xff]  }
0x2496   :  { %v5107_v4 = vpop.xlane.xlu0 %5106 }
0x2497   :  { %v5111_v5 = vmul.f32 0.03125, %v5107_v4 }
0x2499   :  { %v5113_v10 = vadd.f32 1e-05, %v5111_v5 }
0x249a   :  { %v5110_v9 = vpop.xlane.xlu1 %5109 }
0x249b   :  { %7465 = vrsqrt.f32 %v5113_v10  ;;  %v5112_v11 = vmul.f32 0.03125, %v5110_v9 }
0x249d   :  { %v5114_v29 = vadd.f32 1e-05, %v5112_v11 }
0x249f   :  { %7467 = vrsqrt.f32 %v5114_v29 }
0x24a5   :  { %v7466_v12 = vpop.eup %7465 }
0x24a6   :  { %v5117_v15 = vmul.f32 %v7466_v12, %v5101_v45  ;;  %v7302_v45 = vld [vmem:[#allocation2 + $0x48c] ss:$412 sps:$4 sm:$0xff]  }
0x24a8   :  { %v5125_v13 = vmul.f32 %v6607_v20, %v5117_v15 }
0x24a9   :  { %v7468_v34 = vpop.eup %7467 }
0x24aa   :  { %v5118_v26 = vmul.f32 %v7468_v34, %v5102_v8  ;;  %v8191_v21 = vadd.f32 %v6608_v59, %v5125_v13  ;;  %v7308_v8 = vld [vmem:[#allocation2 + $0x164] ss:$412 sps:$4 sm:$0xff]  }
0x24ac   :  { %v5126_v27 = vmul.f32 %v6607_v20, %v5118_v26 }
0x24ae   :  { %v8193_v62 = vadd.f32 %v6608_v59, %v5126_v27  ;;  %v5157_v27 = vrot.slane %v4305_v63, %v7789_v55 }
0x24b0   :  { %v5135_v52 = vpack.c.bf16 %v8193_v62, %v8191_v21 }
0x24b2   :  { %6641 = vmatmul.mubr.msk.bf16.vlgmr.msra.gmra.mrb[144].mxu0 %vm251_vm4, %v5135_v52  ;;  %6642 = vmatmul.mubr.msk.bf16.vlgmr.msra.gmra.mrb[144].mxu1 %vm251_vm4, %v5135_v52 }
0x24b3   :  { %5468 = vmatpush1.bf16.msra.mxu0 %v7267_v23  ;;  %5511 = vmatpush1.bf16.msra.mxu1 %v7270_v24  ;;  %v5165_v23 = vrot.slane %v4305_v63, %v7792_v56 }
0x24b4   :  { %5469 = vmatprep.subr.bf16.mxu0 %v7275_v25  ;;  %5512 = vmatprep.subr.bf16.mxu1 %v7278_v30  ;;  %v5161_v25 = vrot.slane %v4305_v63, %v7795_v60  ;;  %v5169_v30 = vrot.slane %v4305_v63, %v7798_v61 }
0x24b5   :  { %5499 = vmatprep.mubr.bf16.mxu0 %v7524_v0  ;;  %5542 = vmatprep.mubr.bf16.mxu1 %v7524_v0 }
0x24b7   :  { %5470 = vmatpush1.bf16.msra.mxu0 %v7273_v57  ;;  %5513 = vmatpush1.bf16.msra.mxu1 %v7276_v31 }
0x24b8   :  { %5553 = vmatprep.subr.bf16.mxu0 %v7281_v22  ;;  %5596 = vmatprep.subr.bf16.mxu1 %v7284_v32 }
0x24ba   :  { %6643 = vmatmul.mubr.msk.bf16.vlgmr.msra.gmra.mrb[148].mxu0 %vm251_vm4, %v5135_v52  ;;  %6644 = vmatmul.mubr.msk.bf16.vlgmr.msra.gmra.mrb[148].mxu1 %vm251_vm4, %v5135_v52 }
0x24bb   :  { %5554 = vmatpush1.bf16.msra.mxu0 %v7279_v33  ;;  %5597 = vmatpush1.bf16.msra.mxu1 %v7282_v35 }
0x24bc   :  { %5555 = vmatprep.subr.bf16.mxu0 %v7287_v37  ;;  %5598 = vmatprep.subr.bf16.mxu1 %v7290_v38 }
0x24bd   :  { %5585 = vmatprep.mubr.bf16.mxu0 %v7524_v0  ;;  %5628 = vmatprep.mubr.bf16.mxu1 %v7524_v0 }
0x24bf   :  { %5556 = vmatpush1.bf16.msra.mxu0 %v7285_v36  ;;  %5599 = vmatpush1.bf16.msra.mxu1 %v7288_v41  ;;  %v8225_v36 = vld [vmem:[%s8283_s3 + $0x3c] sm:$0xff] }
0x24c0   :  { %5639 = vmatprep.subr.bf16.mxu0 %v7293_v16  ;;  %5682 = vmatprep.subr.bf16.mxu1 %v7296_v42  ;;  %v5181_v63 = vrot.slane %v8225_v36, %v7773_v17 }
0x24c2   :  { %6645 = vmatmul.mubr.msk.bf16.vlgmr.msra.gmra.mrb[152].mxu0 %vm251_vm4, %v5135_v52  ;;  %6646 = vmatmul.mubr.msk.bf16.vlgmr.msra.gmra.mrb[152].mxu1 %vm251_vm4, %v5135_v52 }
0x24c3   :  { %5640 = vmatpush1.bf16.msra.mxu0 %v7291_v43  ;;  %5683 = vmatpush1.bf16.msra.mxu1 %v7294_v53 }
0x24c4   :  { %5641 = vmatprep.subr.bf16.mxu0 %v7299_v28  ;;  %5684 = vmatprep.subr.bf16.mxu1 %v7302_v45  ;;  %v7315_v45 = vld [vmem:[#allocation2 + $0x168] ss:$412 sps:$4 sm:$0xff]  }
0x24c5   :  { %5671 = vmatprep.mubr.bf16.mxu0 %v7524_v0  ;;  %5714 = vmatprep.mubr.bf16.mxu1 %v7524_v0  ;;  %v7317_v0 = vld [vmem:[#allocation2 + $0x16c] ss:$412 sps:$4 sm:$0xff]  }
0x24c7   :  { %5642 = vmatpush1.bf16.msra.mxu0 %v7297_v48  ;;  %5685 = vmatpush1.bf16.msra.mxu1 %v7300_v46  ;;  %v7318_v48 = vld [vmem:[#allocation2 + $0x170] ss:$412 sps:$4 sm:$0xff]  }
0x24c8   :  { %5939 = vmatprep.subr.bf16.mxu0 %v7305_v51  ;;  %5980 = vmatprep.subr.bf16.mxu1 %v7308_v8 }
0x24ca   :  { %6647 = vmatmul.mubr.msk.bf16.vlgmr.msra.gmra.mrb[156].mxu0 %vm251_vm4, %v5135_v52  ;;  %6648 = vmatmul.mubr.msk.bf16.vlgmr.msra.gmra.mrb[156].mxu1 %vm251_vm4, %v5135_v52 }
0x24d0   :  { %5940 = vmatpush1.bf16.xpose.msra.mxu0 %v7303_v19  ;;  %5981 = vmatpush1.bf16.xpose.msra.mxu1 %v7306_v14  ;;  %v5173_v14 = vrot.slane %v8225_v36, %v7770_v47  ;;  %v5177_v47 = vrot.slane %v8225_v36, %v7779_v49 }
0x24d1   :  { %5941 = vmatprep.subr.bf16.mxu0 %v7311_v18  ;;  %5982 = vmatprep.subr.bf16.mxu1 %v7314_v44  ;;  %v7323_v18 = vld [vmem:[#allocation2 + $0x4a4] ss:$412 sps:$4 sm:$0xff]   ;;  %v7326_v44 = vld [vmem:[#allocation2 + $0x4ac] ss:$412 sps:$4 sm:$0xff]  }
0x24d8   :  { %5942 = vmatpush1.bf16.xpose.msra.mxu0 %v7309_v7  ;;  %5983 = vmatpush1.bf16.xpose.msra.mxu1 %v7312_v54 }
0x24d9   :  { %6021 = vmatprep.subr.bf16.mxu0 %v7317_v0  ;;  %6062 = vmatprep.subr.bf16.mxu1 %v7320_v58 }
0x2585   :  { %v5415_v40 = vpop.f32.mrb[144].mxu0  ;;  %v5458_v4 = vpop.f32.mrb[144].mxu1 }
0x2586   :  { %v5416_v5 = vadd.f32 %v5415_v40, %v5141_v2  ;;  %v5459_v10 = vadd.f32 %v5458_v4, %v5149_v3  ;;  %v5417_v9 = vpop.f32.mrb[145].mxu0  ;;  %v5460_v11 = vpop.f32.mrb[145].mxu1 }
0x2587   :  { %v5418_v29 = vadd.f32 %v5417_v9, %v5145_v39  ;;  %v5461_v12 = vadd.f32 %v5460_v11, %v5153_v1  ;;  %v5419_v15 = vpop.f32.mrb[146].mxu0  ;;  %v5462_v20 = vpop.f32.mrb[146].mxu1 }
0x2588   :  { %v5420_v34 = vadd.f32 %v5419_v15, %v5141_v2  ;;  %v5463_v13 = vadd.f32 %v5462_v20, %v5149_v3  ;;  %v5421_v26 = vpop.f32.mrb[147].mxu0  ;;  %v5464_v59 = vpop.f32.mrb[147].mxu1  ;;  %v5725_v57 = vmax.f32 %v5416_v5, 0.0  ;;  %v5727_v31 = vmax.f32 %v5459_v10, 0.0 }
0x2589   :  { %v5422_v24 = vadd.f32 %v5421_v26, %v5145_v39  ;;  %v5465_v52 = vadd.f32 %v5464_v59, %v5153_v1  ;;  %v5726_v33 = vmax.f32 %v5418_v29, 0.0  ;;  %v5728_v35 = vmax.f32 %v5461_v12, 0.0 }
0x258a   :  { %v5741_v22 = vmax.f32 %v5420_v34, 0.0  ;;  %v5743_v32 = vmax.f32 %v5463_v13, 0.0  ;;  %v5185_v5 = vrot.slane %v8225_v36, %v7782_v50 }
0x258b   :  { %v5742_v37 = vmax.f32 %v5422_v24, 0.0  ;;  %v5744_v38 = vmax.f32 %v5465_v52, 0.0  ;;  %v7324_v24 = vld [vmem:[#allocation2 + $0x4a8] ss:$412 sps:$4 sm:$0xff]  }
0x258c   :  { %v5757_v41 = vpack.c.bf16 %v5741_v22, %v5725_v57  ;;  %v5759_v16 = vpack.c.bf16 %v5743_v32, %v5727_v31  ;;  %v7329_v57 = vld [vmem:[#allocation2 + $0x17c] ss:$412 sps:$4 sm:$0xff]   ;;  %v7332_v31 = vld [vmem:[#allocation2 + $0x184] ss:$412 sps:$4 sm:$0xff]  }
0x258d   :  { %v5758_v42 = vpack.c.bf16 %v5742_v37, %v5726_v33  ;;  %v5760_v43 = vpack.c.bf16 %v5744_v38, %v5728_v35  ;;  %v5501_v53 = vpop.f32.mrb[148].mxu0  ;;  %v5544_v28 = vpop.f32.mrb[148].mxu1  ;;  %v5189_v37 = vrot.slane %v8225_v36, %v7789_v55 }
0x258e   :  { %v5502_v46 = vadd.f32 %v5501_v53, %v5157_v27  ;;  %v5545_v51 = vadd.f32 %v5544_v28, %v5165_v23  ;;  %v5503_v8 = vpop.f32.mrb[149].mxu0  ;;  %v5546_v19 = vpop.f32.mrb[149].mxu1  ;;  %v5193_v53 = vrot.slane %v8225_v36, %v7795_v60 }
0x258f   :  { %v5504_v7 = vadd.f32 %v5503_v8, %v5161_v25  ;;  %v5547_v54 = vadd.f32 %v5546_v19, %v5169_v30  ;;  %v5505_v0 = vpop.f32.mrb[150].mxu0  ;;  %v5548_v58 = vpop.f32.mrb[150].mxu1  ;;  %5971 = vmatprep.mubr.bf16.mxu0 %v5758_v42  ;;  %6012 = vmatprep.mubr.bf16.mxu1 %v5760_v43  ;;  %v5197_v43 = vrot.slane %v8225_v36, %v7792_v56 }
0x2590   :  { %v5506_v2 = vadd.f32 %v5505_v0, %v5157_v27  ;;  %v5549_v3 = vadd.f32 %v5548_v58, %v5165_v23  ;;  %v5507_v39 = vpop.f32.mrb[151].mxu0  ;;  %v5550_v1 = vpop.f32.mrb[151].mxu1  ;;  %5972 = vmatmul.mubr.bf16.vlgmr.msra.gmra.mrb[160].mxu0 %v5757_v41  ;;  %6013 = vmatmul.mubr.bf16.vlgmr.msra.gmra.mrb[160].mxu1 %v5759_v16  ;;  %v5729_v10 = vmax.f32 %v5502_v46, 0.0  ;;  %v5731_v9 = vmax.f32 %v5545_v51, 0.0  ;;  %v7321_v23 = vld [vmem:[#allocation2 + $0x4a0] ss:$412 sps:$4 sm:$0xff]  }
0x2591   :  { %v5508_v40 = vadd.f32 %v5507_v39, %v5161_v25  ;;  %v5551_v4 = vadd.f32 %v5550_v1, %v5169_v30  ;;  %6022 = vmatpush1.bf16.xpose.msra.mxu0 %v7315_v45  ;;  %6063 = vmatpush1.bf16.xpose.msra.mxu1 %v7318_v48  ;;  %v5730_v29 = vmax.f32 %v5504_v7, 0.0  ;;  %v5732_v12 = vmax.f32 %v5547_v54, 0.0  ;;  %v7330_v39 = vld [vmem:[#allocation2 + $0x180] ss:$412 sps:$4 sm:$0xff]  }
0x2592   :  { %v5745_v11 = vmax.f32 %v5506_v2, 0.0  ;;  %v5747_v17 = vmax.f32 %v5549_v3, 0.0  ;;  %6023 = vmatprep.subr.bf16.mxu0 %v7323_v18  ;;  %6064 = vmatprep.subr.bf16.mxu1 %v7326_v44  ;;  %v5201_v48 = vrot.slane %v8225_v36, %v7798_v61 }
0x2593   :  { %v5746_v15 = vmax.f32 %v5508_v40, 0.0  ;;  %v5748_v20 = vmax.f32 %v5551_v4, 0.0 }
0x2594   :  { %v5761_v34 = vpack.c.bf16 %v5745_v11, %v5729_v10  ;;  %v5763_v13 = vpack.c.bf16 %v5747_v17, %v5731_v9  ;;  %v7338_v10 = vld [vmem:[#allocation2 + $0x4bc] ss:$412 sps:$4 sm:$0xff]  }
0x2595   :  { %v5762_v49 = vpack.c.bf16 %v5746_v15, %v5730_v29  ;;  %v5764_v26 = vpack.c.bf16 %v5748_v20, %v5732_v12  ;;  %v5587_v59 = vpop.f32.mrb[152].mxu0  ;;  %v5630_v27 = vpop.f32.mrb[152].mxu1 }
0x2596   :  { %v5588_v52 = vadd.f32 %v5587_v59, %v5173_v14  ;;  %v5631_v50 = vadd.f32 %v5630_v27, %v5181_v63  ;;  %v5589_v25 = vpop.f32.mrb[153].mxu0  ;;  %v5632_v30 = vpop.f32.mrb[153].mxu1 }
0x2597   :  { %v5590_v22 = vadd.f32 %v5589_v25, %v5177_v47  ;;  %v5633_v32 = vadd.f32 %v5632_v30, %v5185_v5  ;;  %v5591_v33 = vpop.f32.mrb[154].mxu0  ;;  %v5634_v35 = vpop.f32.mrb[154].mxu1  ;;  %6053 = vmatprep.mubr.bf16.mxu0 %v5762_v49  ;;  %6094 = vmatprep.mubr.bf16.mxu1 %v5764_v26  ;;  %v7333_v30 = vld [vmem:[#allocation2 + $0x4b0] ss:$412 sps:$4 sm:$0xff]  }
0x2598   :  { %v5592_v38 = vadd.f32 %v5591_v33, %v5173_v14  ;;  %v5635_v41 = vadd.f32 %v5634_v35, %v5181_v63  ;;  %v5593_v16 = vpop.f32.mrb[155].mxu0  ;;  %v5636_v42 = vpop.f32.mrb[155].mxu1  ;;  %v5733_v46 = vmax.f32 %v5588_v52, 0.0  ;;  %v5735_v51 = vmax.f32 %v5631_v50, 0.0  ;;  %v7327_v63 = vld [vmem:[#allocation2 + $0x178] ss:$412 sps:$4 sm:$0xff]  }
0x2599   :  { %v5594_v28 = vadd.f32 %v5593_v16, %v5177_v47  ;;  %v5637_v45 = vadd.f32 %v5636_v42, %v5185_v5  ;;  %6024 = vmatpush1.bf16.xpose.msra.mxu0 %v7321_v23  ;;  %6065 = vmatpush1.bf16.xpose.msra.mxu1 %v7324_v24  ;;  %v5734_v19 = vmax.f32 %v5590_v22, 0.0  ;;  %v5736_v14 = vmax.f32 %v5633_v32, 0.0  ;;  %v7335_v5 = vld [vmem:[#allocation2 + $0x4b4] ss:$412 sps:$4 sm:$0xff]   ;;  %v7339_v32 = vld [vmem:[#allocation2 + $0x188] ss:$412 sps:$4 sm:$0xff]  }
0x259a   :  { %v5749_v55 = vmax.f32 %v5592_v38, 0.0  ;;  %v5751_v8 = vmax.f32 %v5635_v41, 0.0  ;;  %6103 = vmatprep.subr.bf16.mxu0 %v7329_v57  ;;  %6144 = vmatprep.subr.bf16.mxu1 %v7332_v31  ;;  %v7336_v57 = vld [vmem:[#allocation2 + $0x4b8] ss:$412 sps:$4 sm:$0xff]   ;;  %v7341_v31 = vld [vmem:[#allocation2 + $0x18c] ss:$412 sps:$4 sm:$0xff]  }
0x259b   :  { %v5750_v18 = vmax.f32 %v5594_v28, 0.0  ;;  %v5752_v56 = vmax.f32 %v5637_v45, 0.0  ;;  %v7344_v22 = vld [vmem:[#allocation2 + $0x194] ss:$412 sps:$4 sm:$0xff]   ;;  %v7347_v35 = vld [vmem:[#allocation2 + $0x4c4] ss:$412 sps:$4 sm:$0xff]  }
0x259c   :  { %v5765_v44 = vpack.c.bf16 %v5749_v55, %v5733_v46  ;;  %v5767_v7 = vpack.c.bf16 %v5751_v8, %v5735_v51  ;;  %v7342_v33 = vld [vmem:[#allocation2 + $0x190] ss:$412 sps:$4 sm:$0xff]   ;;  %v7345_v38 = vld [vmem:[#allocation2 + $0x4c0] ss:$412 sps:$4 sm:$0xff]   ;;  %v7348_v41 = vld [vmem:[#allocation2 + $0x4c8] ss:$412 sps:$4 sm:$0xff]  }
0x259d   :  { %v5766_v60 = vpack.c.bf16 %v5750_v18, %v5734_v19  ;;  %v5768_v54 = vpack.c.bf16 %v5752_v56, %v5736_v14  ;;  %v5673_v0 = vpop.f32.mrb[156].mxu0  ;;  %v5716_v58 = vpop.f32.mrb[156].mxu1  ;;  %v6649_v16 = vld [vmem:[%s8283_s3 + $0x44] ss:$0 sm:$0xff] }
0x259e   :  { %v5674_v2 = vadd.f32 %v5673_v0, %v5189_v37  ;;  %v5717_v3 = vadd.f32 %v5716_v58, %v5197_v43  ;;  %v5675_v61 = vpop.f32.mrb[157].mxu0  ;;  %v5718_v36 = vpop.f32.mrb[157].mxu1 }
0x259f   :  { %v5676_v1 = vadd.f32 %v5675_v61, %v5193_v53  ;;  %v5719_v47 = vadd.f32 %v5718_v36, %v5201_v48  ;;  %v5677_v40 = vpop.f32.mrb[158].mxu0  ;;  %v5720_v4 = vpop.f32.mrb[158].mxu1 }
0x25a0   :  { %v5678_v9 = vadd.f32 %v5677_v40, %v5189_v37  ;;  %v5721_v11 = vadd.f32 %v5720_v4, %v5197_v43  ;;  %6054 = vmatmul.mubr.bf16.vlgmr.msra.gmra.mrb[164].mxu0 %v5761_v34  ;;  %6095 = vmatmul.mubr.bf16.vlgmr.msra.gmra.mrb[164].mxu1 %v5763_v13  ;;  %v5679_v17 = vpop.f32.mrb[159].mxu0  ;;  %v5722_v29 = vpop.f32.mrb[159].mxu1  ;;  %v5737_v20 = vmax.f32 %v5674_v2, 0.0  ;;  %v5739_v49 = vmax.f32 %v5717_v3, 0.0  ;;  %v7350_v37 = vld [vmem:[#allocation2 + $0x4cc] ss:$412 sps:$4 sm:$0xff]  }
0x25a1   :  { %v5680_v12 = vadd.f32 %v5679_v17, %v5193_v53  ;;  %v5723_v15 = vadd.f32 %v5722_v29, %v5201_v48  ;;  %6104 = vmatpush1.bf16.xpose.msra.mxu0 %v7327_v63  ;;  %6135 = vmatprep.mubr.bf16.mxu0 %v5766_v60  ;;  %v5738_v27 = vmax.f32 %v5676_v1, 0.0  ;;  %v5740_v23 = vmax.f32 %v5719_v47, 0.0 }
0x25a2   :  { %v5753_v26 = vmax.f32 %v5678_v9, 0.0  ;;  %v5755_v59 = vmax.f32 %v5721_v11, 0.0  ;;  %6145 = vmatpush1.bf16.xpose.msra.mxu1 %v7330_v39  ;;  %6176 = vmatprep.mubr.bf16.mxu1 %v5768_v54 }
0x25a3   :  { %v5754_v24 = vmax.f32 %v5680_v12, 0.0  ;;  %v5756_v52 = vmax.f32 %v5723_v15, 0.0  ;;  %6105 = vmatprep.subr.bf16.mxu0 %v7335_v5  ;;  %6146 = vmatprep.subr.bf16.mxu1 %v7338_v10 }
0x25a4   :  { %v5769_v34 = vpack.c.bf16 %v5753_v26, %v5737_v20  ;;  %v5771_v13 = vpack.c.bf16 %v5755_v59, %v5739_v49 }
0x25a5   :  { %v5770_v50 = vpack.c.bf16 %v5754_v24, %v5738_v27  ;;  %v5772_v25 = vpack.c.bf16 %v5756_v52, %v5740_v23 }
0x25a9   :  { %6106 = vmatpush1.bf16.xpose.msra.mxu0 %v7333_v30 }
0x25aa   :  { %6147 = vmatpush1.bf16.xpose.msra.mxu1 %v7336_v57  ;;  %6185 = vmatprep.subr.bf16.mxu0 %v7341_v31 }
0x25ab   :  { %6226 = vmatprep.subr.bf16.mxu1 %v7344_v22 }
0x25b0   :  { %6136 = vmatmul.mubr.bf16.vlgmr.msra.gmra.mrb[168].mxu0 %v5765_v44 }
0x25b1   :  { %6177 = vmatmul.mubr.bf16.vlgmr.msra.gmra.mrb[168].mxu1 %v5767_v7  ;;  %6186 = vmatpush1.bf16.xpose.msra.mxu0 %v7339_v32 }
0x25b2   :  { %6217 = vmatprep.mubr.bf16.mxu0 %v5770_v50  ;;  %6227 = vmatpush1.bf16.xpose.msra.mxu1 %v7342_v33 }
0x25b3   :  { %6258 = vmatprep.mubr.bf16.mxu1 %v5772_v25  ;;  %6187 = vmatprep.subr.bf16.mxu0 %v7347_v35 }
0x25b4   :  { %6228 = vmatprep.subr.bf16.mxu1 %v7350_v37 }
0x25b9   :  { %6188 = vmatpush1.bf16.xpose.msra.mxu0 %v7345_v38 }
0x25ba   :  { %6229 = vmatpush1.bf16.xpose.msra.mxu1 %v7348_v41  ;;  %7023 = vmatprep.subr.bf16.mxu0 %v7525_v6 }
0x25c0   :  { %6218 = vmatmul.mubr.bf16.vlgmr.msra.gmra.mrb[172].mxu0 %v5769_v34 }
0x25c1   :  { %6259 = vmatmul.mubr.bf16.vlgmr.msra.gmra.mrb[172].mxu1 %v5771_v13  ;;  %7027 = vmatprep.mubr.msk.bf16.mxu0 %vm7526_vm3, %v7525_v6 }
0x2663   :  { %v5973_v42 = vpop.f32.mrb[160].mxu0  ;;  %v6014_v43 = vpop.f32.mrb[160].mxu1 }
0x2664   :  { %v5974_v53 = vadd.f32 %v6649_v16, %v5973_v42  ;;  %v5975_v28 = vpop.f32.mrb[161].mxu0  ;;  %v6016_v45 = vpop.f32.mrb[161].mxu1  ;;  %v7352_v42 = vld [vmem:[#allocation2 + $0x4d0] ss:$412 sps:$4 sm:$0xff]  }
0x2665   :  { %v5976_v48 = vpop.f32.mrb[162].mxu0  ;;  %v6017_v46 = vpop.f32.mrb[162].mxu1 }
0x2666   :  { %v6015_v51 = vadd.f32 %v6014_v43, %v5974_v53  ;;  %v5977_v55 = vadd.f32 %v6649_v16, %v5976_v48  ;;  %v5978_v8 = vpop.f32.mrb[163].mxu0  ;;  %v6019_v19 = vpop.f32.mrb[163].mxu1 }
0x2667   :  { %v6682_v8 = vld [vmem:[%s8283_s3 + $0x32] ss:$0 sm:$0xff] }
0x2668   :  { %v6018_v14 = vadd.f32 %v6017_v46, %v5977_v55 }
0x2673   :  { %v6055_v18 = vpop.f32.mrb[164].mxu0  ;;  %v6096_v56 = vpop.f32.mrb[164].mxu1 }
0x2674   :  { %v6056_v44 = vadd.f32 %v6055_v18, %v6015_v51  ;;  %v6057_v7 = vpop.f32.mrb[165].mxu0  ;;  %v6098_v60 = vpop.f32.mrb[165].mxu1 }
0x2675   :  { %v6058_v54 = vpop.f32.mrb[166].mxu0  ;;  %v6099_v0 = vpop.f32.mrb[166].mxu1 }
0x2676   :  { %v6097_v58 = vadd.f32 %v6096_v56, %v6056_v44  ;;  %v6059_v63 = vadd.f32 %v6058_v54, %v6018_v14  ;;  %v6060_v2 = vpop.f32.mrb[167].mxu0  ;;  %v6101_v3 = vpop.f32.mrb[167].mxu1  ;;  %v6684_v54 = vld [vmem:[%s8283_s3 + $0x45] ss:$0 sm:$0xff] }
0x2678   :  { %v6100_v61 = vadd.f32 %v6099_v0, %v6059_v63 }
0x2683   :  { %v6137_v36 = vpop.f32.mrb[168].mxu0 }
0x2684   :  { %v6138_v39 = vadd.f32 %v6137_v36, %v6097_v58  ;;  %v6178_v1 = vpop.f32.mrb[168].mxu1  ;;  %v6139_v47 = vpop.f32.mrb[169].mxu0 }
0x2685   :  { %v6180_v40 = vpop.f32.mrb[169].mxu1  ;;  %v6140_v4 = vpop.f32.mrb[170].mxu0 }
0x2686   :  { %v6179_v5 = vadd.f32 %v6178_v1, %v6138_v39  ;;  %v6141_v10 = vadd.f32 %v6140_v4, %v6100_v61  ;;  %v6181_v9 = vpop.f32.mrb[170].mxu1  ;;  %v6142_v11 = vpop.f32.mrb[171].mxu0 }
0x2687   :  { %v6183_v17 = vpop.f32.mrb[171].mxu1 }
0x2688   :  { %v6182_v29 = vadd.f32 %v6181_v9, %v6141_v10 }
0x2693   :  { %v6219_v12 = vpop.f32.mrb[172].mxu0 }
0x2694   :  { %v6220_v15 = vadd.f32 %v6219_v12, %v6179_v5  ;;  %v6260_v20 = vpop.f32.mrb[172].mxu1  ;;  %v6221_v49 = vpop.f32.mrb[173].mxu0 }
0x2695   :  { %v6262_v26 = vpop.f32.mrb[173].mxu1  ;;  %v6222_v59 = vpop.f32.mrb[174].mxu0 }
0x2696   :  { %v6261_v27 = vadd.f32 %v6260_v20, %v6220_v15  ;;  %v6223_v23 = vadd.f32 %v6222_v59, %v6182_v29  ;;  %v6263_v24 = vpop.f32.mrb[174].mxu1  ;;  %v6224_v52 = vpop.f32.mrb[175].mxu0 }
0x2697   :  { %v6265_v34 = vpop.f32.mrb[175].mxu1 }
0x2698   :  { %v6267_v13 = vadd.f32 %v6261_v27, %v8191_v21  ;;  %v6264_v50 = vadd.f32 %v6263_v24, %v6223_v23 }
0x269a   :  { %v6268_v25 = vadd.f32 %v6264_v50, %v8193_v62  ;;  %v6269_v30 = vsel %vm251_vm4, %v6267_v13, 0.0  ;;  %v7351_v62 = vld [vmem:[#allocation2 + $0x198] ss:$412 sps:$4 sm:$0xff]  }
0x269b   :  { %6270 = vadd.xlane.f32.xlu0 %v6269_v30  ;;  %7024 = vmatpush3.bf16.msra.mxu0 %v7351_v62 }
0x269c   :  { %v6272_v57 = vsel %vm251_vm4, %v6268_v25, 0.0  ;;  %7025 = vmatprep.subr.bf16.mxu0 %v7525_v6  ;;  %v6683_v6 = vld [vmem:[%s8283_s3 + $0x33] ss:$0 sm:$0xff] }
0x269f   :  { %6273 = vadd.xlane.f32.xlu0 %v6272_v57  ;;  %7026 = vmatpush3.bf16.msra.mxu0 %v7352_v42 }
0x2728   :  { %v6271_v31 = vpop.xlane.xlu0 %6270 }
0x2729   :  { %v6275_v22 = vmul.f32 0.03125, %v6271_v31 }
0x272b   :  { %v6277_v32 = vsub.f32 %v6267_v13, %v6275_v22 }
0x272c   :  { %v6274_v33 = vpop.xlane.xlu0 %6273 }
0x272d   :  { %v6276_v35 = vmul.f32 0.03125, %v6274_v33  ;;  %v6279_v37 = vmul.f32 %v6277_v32, %v6277_v32 }
0x272f   :  { %v6278_v38 = vsub.f32 %v6268_v25, %v6276_v35  ;;  %v6281_v41 = vsel %vm251_vm4, %v6279_v37, 0.0 }
0x2730   :  { %6282 = vadd.xlane.f32.xlu0 %v6281_v41 }
0x2731   :  { %v6280_v21 = vmul.f32 %v6278_v38, %v6278_v38 }
0x2733   :  { %v6284_v16 = vsel %vm251_vm4, %v6280_v21, 0.0 }
0x2734   :  { %6285 = vadd.xlane.f32.xlu0 %v6284_v16 }
0x27bd   :  { %v6283_v43 = vpop.xlane.xlu0 %6282 }
0x27be   :  { %v6287_v53 = vmul.f32 0.03125, %v6283_v43 }
0x27c0   :  { %v6289_v28 = vadd.f32 1e-05, %v6287_v53 }
0x27c1   :  { %v6286_v45 = vpop.xlane.xlu0 %6285 }
0x27c2   :  { %7469 = vrsqrt.f32 %v6289_v28  ;;  %v6288_v48 = vmul.f32 0.03125, %v6286_v45 }
0x27c4   :  { %v6290_v46 = vadd.f32 1e-05, %v6288_v48 }
0x27c6   :  { %7471 = vrsqrt.f32 %v6290_v46 }
0x27cc   :  { %v7470_v51 = vpop.eup %7469 }
0x27cd   :  { %v6293_v55 = vmul.f32 %v7470_v51, %v6277_v32 }
0x27cf   :  { %v6301_v14 = vmul.f32 %v6682_v8, %v6293_v55 }
0x27d0   :  { %v7472_v19 = vpop.eup %7471 }
0x27d1   :  { %v6294_v18 = vmul.f32 %v7472_v19, %v6278_v38  ;;  %v6309_v44 = vadd.f32 %v6683_v6, %v6301_v14 }
0x27d3   :  { %v6302_v56 = vmul.f32 %v6682_v8, %v6294_v18 }
0x27d5   :  { %v6310_v7 = vadd.f32 %v6683_v6, %v6302_v56 }
0x27d7   :  { %v6316_v60 = vpack.c.bf16 %v6310_v7, %v6309_v44 }
0x27d9   :  { %7028 = vmatmul.mubr.msk.bf16.vlgmr.msra.gmra.mrb[176].mxu0 %vm251_vm4, %v6316_v60 }
0x28ac   :  { %v6372_v0 = vpop.f32.mrb[176].mxu0 }
0x28ad   :  { %v6373_v58 = vadd.f32 %v6684_v54, %v6372_v0  ;;  %v7029_v63 = vpop.f32.mrb[177].mxu0 }
0x28ae   :  { %v6375_v2 = vpop.f32.mrb[178].mxu0 }
0x28af   :  { %6379 = vst.msk [vmem:[#allocation5] sm:$0xff] %vm52_vm0, %v6373_v58  ;;  %v6376_v3 = vadd.f32 %v6684_v54, %v6375_v2  ;;  %v7030_v61 = vpop.f32.mrb[179].mxu0 }
0x28b1   :  { %6380 = vst.msk [vmem:[#allocation5 + $0x8] sm:$0xff] %vm52_vm0, %v6376_v3 }
0x28b2   :  { %7506 = shalt.err (!%p7503_p12)
}
0x28b3   :  { %s7507_s8 = scalar_lea.hbm %s8284_s4, 256 }
0x28b4   :  { %p7508_p13 = scmp.ne.s32.totalorder %s8284_s4, %s7507_s8  ;;  %p7511_p0 = scmp.lt.u32.totalorder %s7507_s8, %s8284_s4 }
0x28b6   :  { %p7513_p1 = pnand %p7511_p0, %p7508_p13 }
0x28b8   :  { %7516 = shalt.err (!%p7513_p1)
}
0x28b9   :  { %s7540_s11 = smov 128   ;;  %s7541_s12 = smov 8  }
0x28ba   :  { %6392 = dma.vmem_to_hbm [thread:$0]  %s6387_s5, 256, %s8284_s4, [#allocation4], %s7540_s11, %s7540_s11, %s7541_s12  }
0x28bb   :  { %7519 = dma.done.wait [#allocation4], 256  }
0x28bc   :  { %7520 = vsyncadd [#allocation4], 4294967040 }
0x28bd   :  { %6396 = vsyncpa [#allocation3], 1 }
0x28be   :  { %6397 = vsyncpa [#allocation4], 1 }

</bundles_post_ra>
